<compile_context>
chip_gen: v7x
topology: tpu7x:2x2x1
jax: 0.10.0
libtpu: 0.0.40
codegen_flags: <defaults>
</compile_context>

<pallas_src>
import functools

import jax
import jax.numpy as jnp
from jax.experimental import pallas as pl
from jax.experimental.pallas import tpu as pltpu


def _residual_stack_kernel(x_ref, w1_ref, w2_ref, out_ref, xpad_ref, *,
                           num_layers: int, compute_dtype):
    """Full residual stack for one batch element.

    x_ref    : (1, H, W, C)          input activation
    w1_ref   : (L, 9*C, Crh)         flattened 3x3 conv weights (im2col layout)
    w2_ref   : (L, Crh, C)           1x1 conv weights
    out_ref  : (1, H, W, C)
    xpad_ref : (H+2, W+2, C) f32     VMEM scratch: ReLU(x) interior, zero halo
    """
    _, H, W, C = x_ref.shape

    # Zero the padded scratch once; only the interior is rewritten per layer,
    # so the 1-pixel halo stays zero for every layer.
    xpad_ref[...] = jnp.zeros_like(xpad_ref)

    # Residual carry, kept in f32 on-chip for the whole stack.
    x = x_ref[0].astype(jnp.float32)                       # (H, W, C)

    for l in range(num_layers):                            # static unroll
        # ReLU only on data actually consumed; write into the padded scratch.
        xpad_ref[1:H + 1, 1:W + 1, :] = jnp.maximum(x, 0.0)
        xp = xpad_ref[...]                                 # (H+2, W+2, C)

        # im2col: one big MXU matmul (K = 9*C) instead of 9 K=C taps.
        cols = [xp[di:di + H, dj:dj + W, :]
                for di in range(3) for dj in range(3)]     # 9 x (H, W, C)
        patches = (jnp.concatenate(cols, axis=-1)          # (H, W, 9*C)
                   .reshape(H * W, 9 * C)
                   .astype(compute_dtype))

        h = jnp.dot(patches, w1_ref[l],
                    preferred_element_type=jnp.float32)    # (H*W, Crh) f32
        h = jnp.maximum(h, 0.0)                            # ReLU (f32)
        blk = jnp.dot(h.astype(compute_dtype), w2_ref[l],
                      preferred_element_type=jnp.float32)  # (H*W, C) f32

        x = x + blk.reshape(H, W, C)                       # residual add

    # Final ReLU of the stack, single store back to HBM.
    out_ref[...] = jnp.maximum(x, 0.0).reshape(1, H, W, C).astype(out_ref.dtype)


def residual_stack(x, params, *, compute_dtype=jnp.bfloat16):
    """x: (N, H, W, C) NHWC.

    params: list of (w1, w2) per residual layer with
      w1: (3, 3, C, Crh)   [PyTorch conv1 weight (Crh, C, 3, 3).permute(2,3,1,0)]
      w2: (Crh, C)         [PyTorch conv2 weight (C, Crh, 1, 1)[:, :, 0, 0].T]
    """
    N, H, W, C = x.shape
    L = len(params)
    Crh = params[0][0].shape[-1]
    for (w1, w2) in params:
        if w1.shape != (3, 3, C, Crh):
            raise ValueError(f"bad w1 shape {w1.shape}, expected {(3, 3, C, Crh)}")
        if w2.shape != (Crh, C):
            raise ValueError("residual add requires Cout == Cin: w2 must be "
                             f"{(Crh, C)}, got {w2.shape}")

    # Relayout/stack weights once on the host side:
    #   (L, 9*C, Crh) im2col layout (tap-major, channel-minor) and (L, Crh, C),
    # cast to the MXU compute dtype.
    w1_all = jnp.stack([w1.reshape(9 * C, Crh) for (w1, _) in params]
                       ).astype(compute_dtype)
    w2_all = jnp.stack([w2 for (_, w2) in params]).astype(compute_dtype)

    kernel = functools.partial(_residual_stack_kernel,
                               num_layers=L, compute_dtype=compute_dtype)

    return pl.pallas_call(
        kernel,
        out_shape=jax.ShapeDtypeStruct((N, H, W, C), x.dtype),
        grid_spec=pltpu.PrefetchScalarGridSpec(
            num_scalar_prefetch=0,
            grid=(N,),
            in_specs=[
                pl.BlockSpec((1, H, W, C), lambda n: (n, 0, 0, 0)),
                pl.BlockSpec((L, 9 * C, Crh), lambda n: (0, 0, 0)),
                pl.BlockSpec((L, Crh, C), lambda n: (0, 0, 0)),
            ],
            out_specs=pl.BlockSpec((1, H, W, C), lambda n: (n, 0, 0, 0)),
            scratch_shapes=[pltpu.VMEM((H + 2, W + 2, C), jnp.float32)],
        ),
        compiler_params=pltpu.CompilerParams(
            dimension_semantics=("parallel",)),
    )(x, w1_all, w2_all)


# ---------- pure-JAX reference (same bf16-matmul / f32-accumulate math) ----------
def _ref_stack(x, params, compute_dtype=jnp.bfloat16):
    def conv3x3(h, w):  # h: (N,H,W,Cin), w: (3,3,Cin,Cout)
        N, H, W, Cin = h.shape
        hp = jnp.pad(h, ((0, 0), (1, 1), (1, 1), (0, 0)))
        out = jnp.zeros((N, H, W, w.shape[-1]), jnp.float32)
        for di in range(3):
            for dj in range(3):
                out = out + jnp.einsum(
                    "nhwc,co->nhwo",
                    hp[:, di:di + H, dj:dj + W, :].astype(compute_dtype),
                    w[di, dj].astype(compute_dtype),
                    preferred_element_type=jnp.float32)
        return out

    x = x.astype(jnp.float32)
    for (w1, w2) in params:
        h = conv3x3(jax.nn.relu(x), w1)
        h = jnp.einsum("nhwc,co->nhwo",
                       jax.nn.relu(h).astype(compute_dtype),
                       w2.astype(compute_dtype),
                       preferred_element_type=jnp.float32)
        x = x + h
    return jax.nn.relu(x)


if __name__ == "__main__":
    # Shapes from the module spec: num_hiddens=64, num_residual_hiddens=32,
    # num_residual_layers=2 (in_channels == num_hiddens for the residual add).
    N, H, W = 2, 16, 16
    num_hiddens = 64
    num_residual_hiddens = 32
    num_residual_layers = 2

    key = jax.random.PRNGKey(0)
    kx, *kws = jax.random.split(key, 1 + 2 * num_residual_layers)

    x = jax.random.normal(kx, (N, H, W, num_hiddens), dtype=jnp.float32)

    params = []
    for i in range(num_residual_layers):
        w1 = jax.random.normal(
            kws[2 * i], (3, 3, num_hiddens, num_residual_hiddens),
            dtype=jnp.float32) * 0.1
        w2 = jax.random.normal(
            kws[2 * i + 1], (num_residual_hiddens, num_hiddens),
            dtype=jnp.float32) * 0.1
        params.append((w1, w2))

    out = residual_stack(x, params)
    out = jax.block_until_ready(out)

    ref = _ref_stack(x, params)
    assert out.shape == (N, H, W, num_hiddens)
    max_err = float(jnp.max(jnp.abs(out - ref)))
    assert bool(jnp.allclose(out, ref, atol=1e-2, rtol=1e-2)), max_err

    print("KERNEL_OK")
</pallas_src>

<mosaic_0001>
module attributes {stable_mosaic.version = 11 : i64} {
  func.func @_residual_stack_kernel(%arg0: i32, %arg1: memref<1x16x16x64xf32, #tpu.memory_space<vmem>>, %arg2: memref<2x576x32xbf16, #tpu.memory_space<vmem>>, %arg3: memref<2x32x64xbf16, #tpu.memory_space<vmem>>, %arg4: memref<1x16x16x64xf32, #tpu.memory_space<vmem>>, %arg5: memref<18x18x64xf32, #tpu.memory_space<vmem>>) attributes {dimension_semantics = [#tpu.dimension_semantics<parallel>], iteration_bounds = array<i64: 2>, scalar_prefetch = 0 : i64, scratch_operands = 1 : i64, tpu.core_type = #tpu.core_type<tc>, window_params = [{transform_indices = @transform_0, window_bounds = array<i64: 1, 16, 16, 64>}, {pipeline_mode = #tpu.pipeline_mode<synchronous>, transform_indices = @transform_1, window_bounds = array<i64: 2, 576, 32>}, {pipeline_mode = #tpu.pipeline_mode<synchronous>, transform_indices = @transform_2, window_bounds = array<i64: 2, 32, 64>}, {transform_indices = @transform_3, window_bounds = array<i64: 1, 16, 16, 64>}]} {
    %cst = arith.constant 0.000000e+00 : f32
    %0 = vector.broadcast %cst : f32 to vector<18x18x64xf32>
    %c0 = arith.constant 0 : index
    %c0_0 = arith.constant 0 : index
    %c0_1 = arith.constant 0 : index
    %1 = vector.load %arg5[%c0, %c0_0, %c0_1] : memref<18x18x64xf32, #tpu.memory_space<vmem>>, vector<18x18x64xf32>
    tpu.vector_store %arg5[%c0, %c0_0, %c0_1], %0 {strides = array<i32>} : memref<18x18x64xf32, #tpu.memory_space<vmem>>, vector<18x18x64xf32>,
    %c0_2 = arith.constant 0 : index
    %c0_3 = arith.constant 0 : index
    %c0_4 = arith.constant 0 : index
    %c0_5 = arith.constant 0 : index
    %2 = vector.load %arg1[%c0_2, %c0_3, %c0_4, %c0_5] : memref<1x16x16x64xf32, #tpu.memory_space<vmem>>, vector<1x16x16x64xf32>
    %3 = vector.shape_cast %2 : vector<1x16x16x64xf32> to vector<16x16x64xf32>
    %cst_6 = arith.constant 0.000000e+00 : f32
    %4 = vector.broadcast %cst_6 : f32 to vector<16x16x64xf32>
    %5 = arith.maximumf %3, %4 : vector<16x16x64xf32>
    %c1 = arith.constant 1 : index
    %c1_7 = arith.constant 1 : index
    %c0_8 = arith.constant 0 : index
    %6 = vector.load %arg5[%c1, %c1_7, %c0_8] : memref<18x18x64xf32, #tpu.memory_space<vmem>>, vector<16x16x64xf32>
    tpu.vector_store %arg5[%c1, %c1_7, %c0_8], %5 {strides = array<i32>} : memref<18x18x64xf32, #tpu.memory_space<vmem>>, vector<16x16x64xf32>,
    %c0_9 = arith.constant 0 : index
    %c0_10 = arith.constant 0 : index
    %c0_11 = arith.constant 0 : index
    %7 = vector.load %arg5[%c0_9, %c0_10, %c0_11] : memref<18x18x64xf32, #tpu.memory_space<vmem>>, vector<18x18x64xf32>
    %8 = vector.extract_strided_slice %7 {offsets = [0, 0, 0], sizes = [16, 16, 64], strides = [1, 1, 1]} : vector<18x18x64xf32> to vector<16x16x64xf32>
    %9 = vector.extract_strided_slice %7 {offsets = [0, 1, 0], sizes = [16, 16, 64], strides = [1, 1, 1]} : vector<18x18x64xf32> to vector<16x16x64xf32>
    %10 = vector.extract_strided_slice %7 {offsets = [0, 2, 0], sizes = [16, 16, 64], strides = [1, 1, 1]} : vector<18x18x64xf32> to vector<16x16x64xf32>
    %11 = vector.extract_strided_slice %7 {offsets = [1, 0, 0], sizes = [16, 16, 64], strides = [1, 1, 1]} : vector<18x18x64xf32> to vector<16x16x64xf32>
    %12 = vector.extract_strided_slice %7 {offsets = [1, 1, 0], sizes = [16, 16, 64], strides = [1, 1, 1]} : vector<18x18x64xf32> to vector<16x16x64xf32>
    %13 = vector.extract_strided_slice %7 {offsets = [1, 2, 0], sizes = [16, 16, 64], strides = [1, 1, 1]} : vector<18x18x64xf32> to vector<16x16x64xf32>
    %14 = vector.extract_strided_slice %7 {offsets = [2, 0, 0], sizes = [16, 16, 64], strides = [1, 1, 1]} : vector<18x18x64xf32> to vector<16x16x64xf32>
    %15 = vector.extract_strided_slice %7 {offsets = [2, 1, 0], sizes = [16, 16, 64], strides = [1, 1, 1]} : vector<18x18x64xf32> to vector<16x16x64xf32>
    %16 = vector.extract_strided_slice %7 {offsets = [2, 2, 0], sizes = [16, 16, 64], strides = [1, 1, 1]} : vector<18x18x64xf32> to vector<16x16x64xf32>
    %17 = tpu.concatenate %8, %9, %10, %11, %12, %13, %14, %15, %16 in 2 : vector<16x16x64xf32>, vector<16x16x64xf32>, vector<16x16x64xf32>, vector<16x16x64xf32>, vector<16x16x64xf32>, vector<16x16x64xf32>, vector<16x16x64xf32>, vector<16x16x64xf32>, vector<16x16x64xf32> -> vector<16x16x576xf32>
    %18 = vector.shape_cast %17 : vector<16x16x576xf32> to vector<256x576xf32>
    %19 = arith.truncf %18 : vector<256x576xf32> to vector<256x576xbf16>
    %c0_12 = arith.constant 0 : index
    %c0_13 = arith.constant 0 : index
    %c0_14 = arith.constant 0 : index
    %20 = vector.load %arg2[%c0_12, %c0_13, %c0_14] : memref<2x576x32xbf16, #tpu.memory_space<vmem>>, vector<1x576x32xbf16>
    %21 = vector.shape_cast %20 : vector<1x576x32xbf16> to vector<576x32xbf16>
    %cst_15 = arith.constant dense<0.000000e+00> : vector<256x32xf32>
    %22 = tpu.matmul %19, %21, %cst_15 {dimension_numbers = #tpu.dot_dimension_numbers<[1], [0], [0], [1], [0, 0, 1, 1], [], []>} : vector<256x576xbf16>, vector<576x32xbf16>, vector<256x32xf32> -> vector<256x32xf32>
    %cst_16 = arith.constant 0.000000e+00 : f32
    %23 = vector.broadcast %cst_16 : f32 to vector<256x32xf32>
    %24 = arith.maximumf %22, %23 : vector<256x32xf32>
    %25 = arith.truncf %24 : vector<256x32xf32> to vector<256x32xbf16>
    %c0_17 = arith.constant 0 : index
    %c0_18 = arith.constant 0 : index
    %c0_19 = arith.constant 0 : index
    %26 = vector.load %arg3[%c0_17, %c0_18, %c0_19] : memref<2x32x64xbf16, #tpu.memory_space<vmem>>, vector<1x32x64xbf16>
    %27 = vector.shape_cast %26 : vector<1x32x64xbf16> to vector<32x64xbf16>
    %cst_20 = arith.constant dense<0.000000e+00> : vector<256x64xf32>
    %28 = tpu.matmul %25, %27, %cst_20 {dimension_numbers = #tpu.dot_dimension_numbers<[1], [0], [0], [1], [0, 0, 1, 1], [], []>} : vector<256x32xbf16>, vector<32x64xbf16>, vector<256x64xf32> -> vector<256x64xf32>
    %29 = vector.shape_cast %28 : vector<256x64xf32> to vector<16x16x64xf32>
    %30 = arith.addf %3, %29 : vector<16x16x64xf32>
    %cst_21 = arith.constant 0.000000e+00 : f32
    %31 = vector.broadcast %cst_21 : f32 to vector<16x16x64xf32>
    %32 = arith.maximumf %30, %31 : vector<16x16x64xf32>
    %c1_22 = arith.constant 1 : index
    %c1_23 = arith.constant 1 : index
    %c0_24 = arith.constant 0 : index
    %33 = vector.load %arg5[%c1_22, %c1_23, %c0_24] : memref<18x18x64xf32, #tpu.memory_space<vmem>>, vector<16x16x64xf32>
    tpu.vector_store %arg5[%c1_22, %c1_23, %c0_24], %32 {strides = array<i32>} : memref<18x18x64xf32, #tpu.memory_space<vmem>>, vector<16x16x64xf32>,
    %c0_25 = arith.constant 0 : index
    %c0_26 = arith.constant 0 : index
    %c0_27 = arith.constant 0 : index
    %34 = vector.load %arg5[%c0_25, %c0_26, %c0_27] : memref<18x18x64xf32, #tpu.memory_space<vmem>>, vector<18x18x64xf32>
    %35 = vector.extract_strided_slice %34 {offsets = [0, 0, 0], sizes = [16, 16, 64], strides = [1, 1, 1]} : vector<18x18x64xf32> to vector<16x16x64xf32>
    %36 = vector.extract_strided_slice %34 {offsets = [0, 1, 0], sizes = [16, 16, 64], strides = [1, 1, 1]} : vector<18x18x64xf32> to vector<16x16x64xf32>
    %37 = vector.extract_strided_slice %34 {offsets = [0, 2, 0], sizes = [16, 16, 64], strides = [1, 1, 1]} : vector<18x18x64xf32> to vector<16x16x64xf32>
    %38 = vector.extract_strided_slice %34 {offsets = [1, 0, 0], sizes = [16, 16, 64], strides = [1, 1, 1]} : vector<18x18x64xf32> to vector<16x16x64xf32>
    %39 = vector.extract_strided_slice %34 {offsets = [1, 1, 0], sizes = [16, 16, 64], strides = [1, 1, 1]} : vector<18x18x64xf32> to vector<16x16x64xf32>
    %40 = vector.extract_strided_slice %34 {offsets = [1, 2, 0], sizes = [16, 16, 64], strides = [1, 1, 1]} : vector<18x18x64xf32> to vector<16x16x64xf32>
    %41 = vector.extract_strided_slice %34 {offsets = [2, 0, 0], sizes = [16, 16, 64], strides = [1, 1, 1]} : vector<18x18x64xf32> to vector<16x16x64xf32>
    %42 = vector.extract_strided_slice %34 {offsets = [2, 1, 0], sizes = [16, 16, 64], strides = [1, 1, 1]} : vector<18x18x64xf32> to vector<16x16x64xf32>
    %43 = vector.extract_strided_slice %34 {offsets = [2, 2, 0], sizes = [16, 16, 64], strides = [1, 1, 1]} : vector<18x18x64xf32> to vector<16x16x64xf32>
    %44 = tpu.concatenate %35, %36, %37, %38, %39, %40, %41, %42, %43 in 2 : vector<16x16x64xf32>, vector<16x16x64xf32>, vector<16x16x64xf32>, vector<16x16x64xf32>, vector<16x16x64xf32>, vector<16x16x64xf32>, vector<16x16x64xf32>, vector<16x16x64xf32>, vector<16x16x64xf32> -> vector<16x16x576xf32>
    %45 = vector.shape_cast %44 : vector<16x16x576xf32> to vector<256x576xf32>
    %46 = arith.truncf %45 : vector<256x576xf32> to vector<256x576xbf16>
    %c1_28 = arith.constant 1 : index
    %c0_29 = arith.constant 0 : index
    %c0_30 = arith.constant 0 : index
    %47 = vector.load %arg2[%c1_28, %c0_29, %c0_30] : memref<2x576x32xbf16, #tpu.memory_space<vmem>>, vector<1x576x32xbf16>
    %48 = vector.shape_cast %47 : vector<1x576x32xbf16> to vector<576x32xbf16>
    %cst_31 = arith.constant dense<0.000000e+00> : vector<256x32xf32>
    %49 = tpu.matmul %46, %48, %cst_31 {dimension_numbers = #tpu.dot_dimension_numbers<[1], [0], [0], [1], [0, 0, 1, 1], [], []>} : vector<256x576xbf16>, vector<576x32xbf16>, vector<256x32xf32> -> vector<256x32xf32>
    %cst_32 = arith.constant 0.000000e+00 : f32
    %50 = vector.broadcast %cst_32 : f32 to vector<256x32xf32>
    %51 = arith.maximumf %49, %50 : vector<256x32xf32>
    %52 = arith.truncf %51 : vector<256x32xf32> to vector<256x32xbf16>
    %c1_33 = arith.constant 1 : index
    %c0_34 = arith.constant 0 : index
    %c0_35 = arith.constant 0 : index
    %53 = vector.load %arg3[%c1_33, %c0_34, %c0_35] : memref<2x32x64xbf16, #tpu.memory_space<vmem>>, vector<1x32x64xbf16>
    %54 = vector.shape_cast %53 : vector<1x32x64xbf16> to vector<32x64xbf16>
    %cst_36 = arith.constant dense<0.000000e+00> : vector<256x64xf32>
    %55 = tpu.matmul %52, %54, %cst_36 {dimension_numbers = #tpu.dot_dimension_numbers<[1], [0], [0], [1], [0, 0, 1, 1], [], []>} : vector<256x32xbf16>, vector<32x64xbf16>, vector<256x64xf32> -> vector<256x64xf32>
    %56 = vector.shape_cast %55 : vector<256x64xf32> to vector<16x16x64xf32>
    %57 = arith.addf %30, %56 : vector<16x16x64xf32>
    %cst_37 = arith.constant 0.000000e+00 : f32
    %58 = vector.broadcast %cst_37 : f32 to vector<16x16x64xf32>
    %59 = arith.maximumf %57, %58 : vector<16x16x64xf32>
    %60 = vector.shape_cast %59 : vector<16x16x64xf32> to vector<1x16x16x64xf32>
    %c0_38 = arith.constant 0 : index
    %c0_39 = arith.constant 0 : index
    %c0_40 = arith.constant 0 : index
    %c0_41 = arith.constant 0 : index
    %61 = vector.load %arg4[%c0_38, %c0_39, %c0_40, %c0_41] : memref<1x16x16x64xf32, #tpu.memory_space<vmem>>, vector<1x16x16x64xf32>
    tpu.vector_store %arg4[%c0_38, %c0_39, %c0_40, %c0_41], %60 {strides = array<i32>} : memref<1x16x16x64xf32, #tpu.memory_space<vmem>>, vector<1x16x16x64xf32>,
    return
  }
  func.func @transform_0(%arg0: i32) -> (i32, i32, i32, i32) {
    %c0_i32 = arith.constant 0 : i32
    %c0_i32_0 = arith.constant 0 : i32
    %c0_i32_1 = arith.constant 0 : i32
    %c0_i32_2 = arith.constant 0 : i32
    return %arg0, %c0_i32, %c0_i32_0, %c0_i32_1 : i32, i32, i32, i32
  }
  func.func @transform_1(%arg0: i32) -> (i32, i32, i32) {
    %c0_i32 = arith.constant 0 : i32
    %c0_i32_0 = arith.constant 0 : i32
    %c0_i32_1 = arith.constant 0 : i32
    %c0_i32_2 = arith.constant 0 : i32
    return %c0_i32, %c0_i32_0, %c0_i32_1 : i32, i32, i32
  }
  func.func @transform_2(%arg0: i32) -> (i32, i32, i32) {
    %c0_i32 = arith.constant 0 : i32
    %c0_i32_0 = arith.constant 0 : i32
    %c0_i32_1 = arith.constant 0 : i32
    %c0_i32_2 = arith.constant 0 : i32
    return %c0_i32, %c0_i32_0, %c0_i32_1 : i32, i32, i32
  }
  func.func @transform_3(%arg0: i32) -> (i32, i32, i32, i32) {
    %c0_i32 = arith.constant 0 : i32
    %c0_i32_0 = arith.constant 0 : i32
    %c0_i32_1 = arith.constant 0 : i32
    %c0_i32_2 = arith.constant 0 : i32
    return %arg0, %c0_i32, %c0_i32_0, %c0_i32_1 : i32, i32, i32, i32
  }
}

</mosaic_0001>

<bundles_post_ra>
// kernel: tpu_custom_call.1
= control target key start
LH: loop header
LB: loop body
LE: loop exit
PB: predicated region body
PF: predicated region fallthrough
CT: control target
= control target key end

     0   :  { %8 = vsyncpa [#allocation4], 0  ;;  %s9054_s0 = inlined_call_operand.vmem [shape: f32[2,16,16,64], index: 0, kind: input, shape index: {}]   ;;  %s9055_s1 = inlined_call_operand.vmem [shape: bf16[2,576,32], index: 1, kind: input, shape index: {}]   ;;  %s9056_s2 = inlined_call_operand.vmem [shape: bf16[2,32,64], index: 2, kind: input, shape index: {}]   ;;  %s9057_s3 = inlined_call_operand.hbm [shape: f32[2,16,16,64], index: 3, kind: output, shape index: {}]  }
   0x1   :  { %10 = vsyncpa [#allocation4 + $0x1], 0  ;;  %s6108_s12 = smov 0   ;;  %s6110_s13 = smov 0  }
   0x2   :  { %s6112_s14 = smov 0   ;;  %s6114_s15 = smov 0  }
   0x3 LB: > { %s6129_s16 = sadd.s32 4294967295, %s6081_s15   ;;  %s4424_s17 = sadd.s32 4294967294, %s6081_s15   ;;  %s6081_s15 = sphi %s6114_s15, %s9551_s15   ;;  %s6077_s14 = sphi %s6112_s14, %s9550_s14   ;;  %s6073_s13 = sphi %s6110_s13, %s9549_s13   ;;  %s6069_s12 = sphi %s6108_s12, %s9548_s12  }
   0x4   : > { %s6133_s18 = sadd.s32 1, %s6081_s15   ;;  %s91_s19 = sadd.s32 1, %s6077_s14 }
   0x5   : > { %s88_s20 = ssub.s32 %s6081_s15, %s6133_s18  ;;  %p101_p0 = scmp.ne.s32.totalorder %s6077_s14, %s6073_s13 }
   0x6   : > { %p89_p1 = scmp.eq.s32.totalorder %s88_s20, 0  ;;  %p102_p2 = scmp.eq.s32.totalorder %s6129_s16, 1 }
   0x7   : > { %p107_p3 = scmp.ne.s32.totalorder %s6073_s13, %s6069_s12  ;;  %p108_p4 = scmp.eq.s32.totalorder %s4424_s17, 1 }
   0x8   : > { %s6144_s21 = scalar_select %p89_p1, %s6077_s14, %s91_s19  }
   0x9   : > { %p6146_p5 = por %p102_p2, %p101_p0  ;;  %p6150_p6 = por %p108_p4, %p107_p3 }
   0xa   : > { %p4427_p7 = scmp.ge.s32.totalorder %s6081_s15, 1  ;;  %p140_p8 = scmp.lt.s32.totalorder %s6081_s15, 3 }
   0xc   : > { %p141_p9 = pnand %p4427_p7, %p140_p8 }
   0xe   : > { %144 = sbr.rel (%p141_p9) target bundleno = 1523 (0x5f3), region = 32 }
  0x15   : > { %p164_p10 = scmp.lt.s32.totalorder %s6129_s16, 1  ;;  %vm170_vm0 = vcmask 523264   ;;  %vm173_vm1 = vcmask 517120   ;;  %v6083_v0 = vmov 0.0   ;;  %v5873_v1 = vld [vmem:[%s9055_s1 + $0x40] sm:$0xff]   ;;  %v5875_v3 = vld [vmem:[%s9055_s1 + $0x48] sm:$0xff]  }
  0x16   : > { %175 = vst.msk [vmem:[#allocation2 + $0x18] sm:$0xff] %vm170_vm0, %v6083_v0  ;;  %176 = vst.msk [vmem:[#allocation2 + $0x20] sm:$0xff] %vm170_vm0, %v6083_v0  ;;  %v5874_v2 = vld [vmem:[%s9055_s1] sm:$0xff]   ;;  %4654 = vmatprep.subr.bf16.mxu0 %v5873_v1  ;;  %v5876_v4 = vld [vmem:[%s9055_s1 + $0x8] sm:$0xff]   ;;  %vm425_vm2 = vcmask 1046528   ;;  %s6084_s17 = smov 64  }
  0x17   : > { %177 = vst.msk [vmem:[#allocation2 + $0x28] sm:$0x3] %vm173_vm1, %v6083_v0  ;;  %174 = vst.msk [vmem:[#allocation2 + $0x10] sm:$0x3] %vm173_vm1, %v6083_v0  ;;  %s165_s26 = scalar_select %p164_p10, %s6129_s16, 1  ;;  %4655 = vmatpush3.bf16.msra.mxu0 %v5874_v2  ;;  %v5877_v5 = vld [vmem:[%s9055_s1 + $0x50] sm:$0xff]  }
  0x18   : > { %171 = vst.msk [vmem:[#allocation2] sm:$0xff] %vm170_vm0, %v6083_v0  ;;  %172 = vst.msk [vmem:[#allocation2 + $0x8] sm:$0xff] %vm170_vm0, %v6083_v0  ;;  %4656 = vmatprep.subr.bf16.mxu0 %v5875_v3  ;;  %vm602_vm3 = vcmask 1045504   ;;  %vm2030_vm4 = vcmask 261120   ;;  %s161_s7 = sand.u32 1, %s6073_s13   ;;  %s4653_s11 = sshll.u32 %s6129_s16, 12 }
  0x19   : > { %178 = vst.msk [vmem:[#allocation2 + $0x30] sm:$0xff] %vm170_vm0, %v6083_v0  ;;  %179 = vst.msk [vmem:[#allocation2 + $0x38] sm:$0xff] %vm170_vm0, %v6083_v0  ;;  %s4652_s4 = sshll.u32 %s165_s26, 8  ;;  %s4428_s8 = sshll.u32 %s161_s7, 8 }
  0x1a   : > { %180 = vst.msk [vmem:[#allocation2 + $0x40] sm:$0x3] %vm173_vm1, %v6083_v0  ;;  %183 = vst.msk [vmem:[#allocation2 + $0x58] sm:$0x3] %vm173_vm1, %v6083_v0  ;;  %s6229_s9 = scalar_lea.vmem %s9054_s0, %s4652_s4  ;;  %s8908_s10 = scalar_lea.vmem [#allocation3], %s4428_s8 }
  0x1b   : > { %181 = vst.msk [vmem:[#allocation2 + $0x48] sm:$0xff] %vm170_vm0, %v6083_v0  ;;  %182 = vst.msk [vmem:[#allocation2 + $0x50] sm:$0xff] %vm170_vm0, %v6083_v0  ;;  %v226_v6 = vld [vmem:[%s6229_s9] sm:$0xff]  ;;  %v227_v7 = vld [vmem:[%s6229_s9 + $0x8] sm:$0xff]  ;;  %4657 = vmatpush3.bf16.msra.mxu0 %v5876_v4  ;;  %s4362_s19 = sshll.u32 %s8908_s10, 4  ;;  %s9001_s25 = scalar_lea.hbm %s9057_s3, %s4653_s11  ;;  %s9003_s19 = int_to_ptr.vmem [resolvable:$true] %s4362_s19 }
  0x1c   : > { %184 = vst.msk [vmem:[#allocation2 + $0x60] sm:$0xff] %vm170_vm0, %v6083_v0  ;;  %185 = vst.msk [vmem:[#allocation2 + $0x68] sm:$0xff] %vm170_vm0, %v6083_v0  ;;  %v228_v8 = vld [vmem:[%s6229_s9 + $0x10] sm:$0xff]  ;;  %v258_v9 = vmax.f32 %v226_v6, 0.0  ;;  %v259_v10 = vmax.f32 %v227_v7, 0.0  ;;  %v229_v11 = vld [vmem:[%s6229_s9 + $0x18] sm:$0xff]  ;;  %4658 = vmatprep.subr.bf16.mxu0 %v5877_v5 }
  0x1d   : > { %186 = vst.msk [vmem:[#allocation2 + $0x70] sm:$0x3] %vm173_vm1, %v6083_v0  ;;  %189 = vst.msk [vmem:[#allocation2 + $0x88] sm:$0x3] %vm173_vm1, %v6083_v0  ;;  %v260_v12 = vmax.f32 %v228_v8, 0.0  ;;  %v230_v13 = vld [vmem:[%s6229_s9 + $0x20] sm:$0xff] }
  0x1e   : > { %187 = vst.msk [vmem:[#allocation2 + $0x78] sm:$0xff] %vm170_vm0, %v6083_v0  ;;  %188 = vst.msk [vmem:[#allocation2 + $0x80] sm:$0xff] %vm170_vm0, %v6083_v0  ;;  %v231_v14 = vld [vmem:[%s6229_s9 + $0x28] sm:$0xff]  ;;  %v261_v15 = vmax.f32 %v229_v11, 0.0  ;;  %v6242_v18 = vld [vmem:[#allocation2 + $0x10] sm:$0x3] }
  0x1f   : > { %190 = vst.msk [vmem:[#allocation2 + $0x90] sm:$0xff] %vm170_vm0, %v6083_v0  ;;  %191 = vst.msk [vmem:[#allocation2 + $0x98] sm:$0xff] %vm170_vm0, %v6083_v0  ;;  %v323_v16 = vld [vmem:[#allocation2] sm:$0xff]  ;;  %v6240_v17 = vld [vmem:[#allocation2 + $0x8] sm:$0xff]  ;;  %v262_v19 = vmax.f32 %v230_v13, 0.0  ;;  %v263_v21 = vmax.f32 %v231_v14, 0.0 }
  0x20   : > { %192 = vst.msk [vmem:[#allocation2 + $0xa0] sm:$0x3] %vm173_vm1, %v6083_v0  ;;  %195 = vst.msk [vmem:[#allocation2 + $0xb8] sm:$0x3] %vm173_vm1, %v6083_v0  ;;  %v426_v20 = vrot.slane %v323_v16, 1  ;;  %v232_v22 = vld [vmem:[%s6229_s9 + $0x30] sm:$0xff] }
  0x21   : > { %193 = vst.msk [vmem:[#allocation2 + $0xa8] sm:$0xff] %vm170_vm0, %v6083_v0  ;;  %194 = vst.msk [vmem:[#allocation2 + $0xb0] sm:$0xff] %vm170_vm0, %v6083_v0  ;;  %v233_v23 = vld [vmem:[%s6229_s9 + $0x38] sm:$0xff]  ;;  %v427_v24 = vrot.slane %v6240_v17, 1  ;;  %v264_v25 = vmax.f32 %v232_v22, 0.0  ;;  %v234_v27 = vld [vmem:[%s6229_s9 + $0x40] sm:$0xff] }
  0x22   : > { %196 = vst.msk [vmem:[#allocation2 + $0xc0] sm:$0xff] %vm170_vm0, %v6083_v0  ;;  %197 = vst.msk [vmem:[#allocation2 + $0xc8] sm:$0xff] %vm170_vm0, %v6083_v0  ;;  %v265_v26 = vmax.f32 %v233_v23, 0.0  ;;  %v235_v28 = vld [vmem:[%s6229_s9 + $0x48] sm:$0xff]  ;;  %v236_v29 = vld [vmem:[%s6229_s9 + $0x50] sm:$0xff]  ;;  %v429_v30 = vrot.slane %v6242_v18, 1 }
  0x23   : > { %198 = vst.msk [vmem:[#allocation2 + $0xd0] sm:$0x3] %vm173_vm1, %v6083_v0  ;;  %201 = vst.msk [vmem:[#allocation2 + $0xe8] sm:$0x3] %vm173_vm1, %v6083_v0  ;;  %v266_v31 = vmax.f32 %v234_v27, 0.0  ;;  %v267_v32 = vmax.f32 %v235_v28, 0.0  ;;  %v428_v53 = vsel %vm425_vm2, %v426_v20, %v427_v24 }
  0x24   : > { %199 = vst.msk [vmem:[#allocation2 + $0xd8] sm:$0xff] %vm170_vm0, %v6083_v0  ;;  %200 = vst.msk [vmem:[#allocation2 + $0xe0] sm:$0xff] %vm170_vm0, %v6083_v0  ;;  %v237_v33 = vld [vmem:[%s6229_s9 + $0x58] sm:$0xff]  ;;  %v238_v34 = vld [vmem:[%s6229_s9 + $0x60] sm:$0xff]  ;;  %v268_v36 = vmax.f32 %v236_v29, 0.0  ;;  %v430_v63 = vsel %vm425_vm2, %v427_v24, %v429_v30  ;;  %s9013_s16 = scalar_lea.sflag [#allocation4], %s161_s7 }
  0x25   : > { %202 = vst.msk [vmem:[#allocation2 + $0xf0] sm:$0xff] %vm170_vm0, %v6083_v0  ;;  %203 = vst.msk [vmem:[#allocation2 + $0xf8] sm:$0xff] %vm170_vm0, %v6083_v0  ;;  %v239_v35 = vld [vmem:[%s6229_s9 + $0x68] sm:$0xff]  ;;  %v269_v37 = vmax.f32 %v237_v33, 0.0  ;;  %v270_v38 = vmax.f32 %v238_v34, 0.0  ;;  %v240_v39 = vld [vmem:[%s6229_s9 + $0x70] sm:$0xff]  ;;  %v5378_v14 = vpack.i.bf16 %v430_v63, %v428_v53 }
  0x26   : > { %204 = vst.msk [vmem:[#allocation2 + $0x100] sm:$0x3] %vm173_vm1, %v6083_v0  ;;  %207 = vst.msk [vmem:[#allocation2 + $0x118] sm:$0x3] %vm173_vm1, %v6083_v0  ;;  %v241_v40 = vld [vmem:[%s6229_s9 + $0x78] sm:$0xff]  ;;  %v242_v41 = vld [vmem:[%s6229_s9 + $0x80] sm:$0xff] }
  0x27   : > { %205 = vst.msk [vmem:[#allocation2 + $0x108] sm:$0xff] %vm170_vm0, %v6083_v0  ;;  %206 = vst.msk [vmem:[#allocation2 + $0x110] sm:$0xff] %vm170_vm0, %v6083_v0  ;;  %v271_v42 = vmax.f32 %v239_v35, 0.0  ;;  %v272_v43 = vmax.f32 %v240_v39, 0.0  ;;  %v273_v44 = vmax.f32 %v241_v40, 0.0  ;;  %v243_v45 = vld [vmem:[%s6229_s9 + $0x88] sm:$0xff] }
  0x28   : > { %208 = vst.msk [vmem:[#allocation2 + $0x120] sm:$0xff] %vm170_vm0, %v6083_v0  ;;  %209 = vst.msk [vmem:[#allocation2 + $0x128] sm:$0xff] %vm170_vm0, %v6083_v0  ;;  %v274_v46 = vmax.f32 %v242_v41, 0.0  ;;  %v244_v47 = vld [vmem:[%s6229_s9 + $0x90] sm:$0xff]  ;;  %v275_v48 = vmax.f32 %v243_v45, 0.0  ;;  %v245_v49 = vld [vmem:[%s6229_s9 + $0x98] sm:$0xff] }
  0x29   : > { %210 = vst.msk [vmem:[#allocation2 + $0x130] sm:$0x3] %vm173_vm1, %v6083_v0  ;;  %213 = vst.msk [vmem:[#allocation2 + $0x148] sm:$0x3] %vm173_vm1, %v6083_v0  ;;  %v276_v50 = vmax.f32 %v244_v47, 0.0  ;;  %v246_v51 = vld [vmem:[%s6229_s9 + $0xa0] sm:$0xff] }
  0x2a   : > { %211 = vst.msk [vmem:[#allocation2 + $0x138] sm:$0xff] %vm170_vm0, %v6083_v0  ;;  %212 = vst.msk [vmem:[#allocation2 + $0x140] sm:$0xff] %vm170_vm0, %v6083_v0  ;;  %v247_v52 = vld [vmem:[%s6229_s9 + $0xa8] sm:$0xff]  ;;  %v277_v54 = vmax.f32 %v245_v49, 0.0  ;;  %v278_v55 = vmax.f32 %v246_v51, 0.0  ;;  %v248_v57 = vld [vmem:[%s6229_s9 + $0xb0] sm:$0xff] }
  0x2b   : > { %214 = vst.msk [vmem:[#allocation2 + $0x150] sm:$0xff] %vm170_vm0, %v6083_v0  ;;  %215 = vst.msk [vmem:[#allocation2 + $0x158] sm:$0xff] %vm170_vm0, %v6083_v0  ;;  %v279_v56 = vmax.f32 %v247_v52, 0.0  ;;  %v249_v58 = vld [vmem:[%s6229_s9 + $0xb8] sm:$0xff]  ;;  %v250_v59 = vld [vmem:[%s6229_s9 + $0xc0] sm:$0xff] }
  0x2c   : > { %216 = vst.msk [vmem:[#allocation2 + $0x160] sm:$0x3] %vm173_vm1, %v6083_v0  ;;  %219 = vst.msk [vmem:[#allocation2 + $0x178] sm:$0x3] %vm173_vm1, %v6083_v0  ;;  %v281_v1 = vmax.f32 %v249_v58, 0.0  ;;  %v282_v2 = vmax.f32 %v250_v59, 0.0 }
  0x2d   : > { %217 = vst.msk [vmem:[#allocation2 + $0x168] sm:$0xff] %vm170_vm0, %v6083_v0  ;;  %218 = vst.msk [vmem:[#allocation2 + $0x170] sm:$0xff] %vm170_vm0, %v6083_v0  ;;  %v251_v51 = vld [vmem:[%s6229_s9 + $0xc8] sm:$0xff] }
  0x2e   : > { %220 = vst.msk [vmem:[#allocation2 + $0x180] sm:$0xff] %vm170_vm0, %v6083_v0  ;;  %221 = vst.msk [vmem:[#allocation2 + $0x188] sm:$0xff] %vm170_vm0, %v6083_v0 }
  0x2f   : > { %222 = vst.msk [vmem:[#allocation2 + $0x190] sm:$0x3] %vm173_vm1, %v6083_v0  ;;  %225 = vst.msk [vmem:[#allocation2 + $0x1a8] sm:$0x3] %vm173_vm1, %v6083_v0 }
  0x30   : > { %223 = vst.msk [vmem:[#allocation2 + $0x198] sm:$0xff] %vm170_vm0, %v6083_v0  ;;  %224 = vst.msk [vmem:[#allocation2 + $0x1a0] sm:$0xff] %vm170_vm0, %v6083_v0  ;;  %v280_v0 = vmax.f32 %v248_v57, 0.0 }
  0x31   : > { %291 = vst.msk [vmem:[#allocation2 + $0x19] sm:$0xff] %vm170_vm0, %v258_v9  ;;  %292 = vst.msk [vmem:[#allocation2 + $0x21] sm:$0xff] %vm170_vm0, %v259_v10 }
  0x32   : > { %293 = vst.msk [vmem:[#allocation2 + $0x31] sm:$0xff] %vm170_vm0, %v260_v12  ;;  %294 = vst.msk [vmem:[#allocation2 + $0x39] sm:$0xff] %vm170_vm0, %v261_v15 }
  0x33   : > { %295 = vst.msk [vmem:[#allocation2 + $0x49] sm:$0xff] %vm170_vm0, %v262_v19  ;;  %296 = vst.msk [vmem:[#allocation2 + $0x51] sm:$0xff] %vm170_vm0, %v263_v21 }
  0x34   : > { %297 = vst.msk [vmem:[#allocation2 + $0x61] sm:$0xff] %vm170_vm0, %v264_v25  ;;  %298 = vst.msk [vmem:[#allocation2 + $0x69] sm:$0xff] %vm170_vm0, %v265_v26 }
  0x35   : > { %299 = vst.msk [vmem:[#allocation2 + $0x79] sm:$0xff] %vm170_vm0, %v266_v31  ;;  %300 = vst.msk [vmem:[#allocation2 + $0x81] sm:$0xff] %vm170_vm0, %v267_v32 }
  0x36   : > { %301 = vst.msk [vmem:[#allocation2 + $0x91] sm:$0xff] %vm170_vm0, %v268_v36  ;;  %302 = vst.msk [vmem:[#allocation2 + $0x99] sm:$0xff] %vm170_vm0, %v269_v37 }
  0x37   : > { %303 = vst.msk [vmem:[#allocation2 + $0xa9] sm:$0xff] %vm170_vm0, %v270_v38  ;;  %304 = vst.msk [vmem:[#allocation2 + $0xb1] sm:$0xff] %vm170_vm0, %v271_v42 }
  0x38   : > { %305 = vst.msk [vmem:[#allocation2 + $0xc1] sm:$0xff] %vm170_vm0, %v272_v43  ;;  %306 = vst.msk [vmem:[#allocation2 + $0xc9] sm:$0xff] %vm170_vm0, %v273_v44  ;;  %v6283_v60 = vld [vmem:[#allocation2 + $0x18] sm:$0xff]  ;;  %v6285_v61 = vld [vmem:[#allocation2 + $0x20] sm:$0xff] }
  0x39   : > { %307 = vst.msk [vmem:[#allocation2 + $0xd9] sm:$0xff] %vm170_vm0, %v274_v46  ;;  %v6287_v62 = vld [vmem:[#allocation2 + $0x30] sm:$0xff]  ;;  %308 = vst.msk [vmem:[#allocation2 + $0xe1] sm:$0xff] %vm170_vm0, %v275_v48  ;;  %v5373_v3 = vpack.i.bf16 %v6285_v61, %v6283_v60  ;;  %v6294_v4 = vld [vmem:[#allocation2 + $0x38] sm:$0xff]  ;;  %v431_v6 = vrot.slane %v6283_v60, 1  ;;  %v432_v7 = vrot.slane %v6285_v61, 1 }
  0x3a   : > { %309 = vst.msk [vmem:[#allocation2 + $0xf1] sm:$0xff] %vm170_vm0, %v276_v50  ;;  %v6296_v5 = vld [vmem:[#allocation2 + $0x28] sm:$0x3]  ;;  %310 = vst.msk [vmem:[#allocation2 + $0xf9] sm:$0xff] %vm170_vm0, %v277_v54  ;;  %v5383_v8 = vpack.i.bf16 %v6294_v4, %v6287_v62  ;;  %v6308_v11 = vld [vmem:[#allocation2 + $0x40] sm:$0x3] }
  0x3b   : > { %311 = vst.msk [vmem:[#allocation2 + $0x109] sm:$0xff] %vm170_vm0, %v278_v55  ;;  %312 = vst.msk [vmem:[#allocation2 + $0x111] sm:$0xff] %vm170_vm0, %v279_v56  ;;  %v6305_v9 = vld [vmem:[#allocation2 + $0x48] sm:$0xff]  ;;  %v434_v10 = vrot.slane %v6296_v5, 1  ;;  %v436_v12 = vrot.slane %v6287_v62, 1  ;;  %v437_v13 = vrot.slane %v6294_v4, 1  ;;  %5374 = vrot.lane.b32.xlu0 %v5373_v3, %s6084_s17  ;;  %v6319_v16 = vsel %vm425_vm2, %v431_v6, %v432_v7 }
  0x3c   : > { %313 = vst.msk [vmem:[#allocation2 + $0x121] sm:$0xff] %vm170_vm0, %v280_v0  ;;  %314 = vst.msk [vmem:[#allocation2 + $0x129] sm:$0xff] %vm170_vm0, %v281_v1  ;;  %v6316_v15 = vld [vmem:[#allocation2 + $0x50] sm:$0xff]  ;;  %v439_v17 = vrot.slane %v6308_v11, 1  ;;  %v6322_v18 = vld [vmem:[#allocation2 + $0x58] sm:$0x3]  ;;  %5384 = vrot.lane.b32.xlu1 %v5383_v8, %s6084_s17 }
  0x3d   : > { %315 = vst.msk [vmem:[#allocation2 + $0x139] sm:$0xff] %vm170_vm0, %v282_v2  ;;  %9199 = vst [vmem:[#allocation6_spill] sm:$0xff] %v6319_v16  ;;  %v441_v19 = vrot.slane %v6305_v9, 1  ;;  %v6327_v20 = vsel %vm425_vm2, %v432_v7, %v434_v10  ;;  %v6330_v21 = vsel %vm425_vm2, %v436_v12, %v437_v13  ;;  %v442_v22 = vrot.slane %v6316_v15, 1  ;;  %v6339_v26 = vld [vmem:[#allocation2 + $0x70] sm:$0x3] }
  0x3e   : > { %9200 = vst [vmem:[#allocation7_spill] sm:$0xff] %v6327_v20  ;;  %9201 = vst [vmem:[#allocation8_spill] sm:$0xff] %v6330_v21  ;;  %v5388_v23 = vpack.i.bf16 %v6327_v20, %v6319_v16  ;;  %v6336_v24 = vsel %vm425_vm2, %v437_v13, %v439_v17  ;;  %v444_v25 = vrot.slane %v6322_v18, 1  ;;  %v5393_v27 = vpack.i.bf16 %v6316_v15, %v6305_v9  ;;  %v6344_v28 = vld [vmem:[#allocation2 + $0x60] sm:$0xff]  ;;  %v6346_v29 = vld [vmem:[#allocation2 + $0x68] sm:$0xff] }
  0x3f   : > { %9202 = vst [vmem:[#allocation9_spill] sm:$0xff] %v6336_v24  ;;  %5379 = vrot.lane.b32.xlu0 %v5378_v14, %s6084_s17  ;;  %v5398_v30 = vpack.i.bf16 %v6336_v24, %v6330_v21  ;;  %v6351_v31 = vsel %vm425_vm2, %v441_v19, %v442_v22  ;;  %v446_v33 = vrot.slane %v6344_v28, 1  ;;  %v447_v34 = vrot.slane %v6346_v29, 1  ;;  %v6360_v36 = vld [vmem:[#allocation2 + $0x88] sm:$0x3]  ;;  %v6362_v37 = vld [vmem:[#allocation2 + $0x78] sm:$0xff] }
  0x40   : > { %9203 = vst [vmem:[#allocation10_spill] sm:$0xff] %v6351_v31  ;;  %5389 = vrot.lane.b32.xlu1 %v5388_v23, %s6084_s17  ;;  %v6355_v32 = vsel %vm425_vm2, %v442_v22, %v444_v25  ;;  %v449_v35 = vrot.slane %v6339_v26, 1  ;;  %v5403_v38 = vpack.i.bf16 %v6346_v29, %v6344_v28  ;;  %v6367_v39 = vld [vmem:[#allocation2 + $0x80] sm:$0xff]  ;;  %v451_v41 = vrot.slane %v6362_v37, 1  ;;  %v6381_v46 = vld [vmem:[#allocation2 + $0x90] sm:$0xff]  ;;  %v6383_v47 = vld [vmem:[#allocation2 + $0x98] sm:$0xff] }
  0x41   : > { %9204 = vst [vmem:[#allocation11_spill] sm:$0xff] %v6355_v32  ;;  %v5408_v40 = vpack.i.bf16 %v6355_v32, %v6351_v31  ;;  %v6374_v42 = vsel %vm425_vm2, %v446_v33, %v447_v34  ;;  %v452_v44 = vrot.slane %v6367_v39, 1  ;;  %v454_v45 = vrot.slane %v6360_v36, 1  ;;  %v6385_v48 = vld [vmem:[#allocation2 + $0xa0] sm:$0x3]  ;;  %v6387_v49 = vld [vmem:[#allocation2 + $0xa8] sm:$0xff] }
  0x42   : > { %9205 = vst [vmem:[#allocation12_spill] sm:$0xff] %v6374_v42  ;;  %v6377_v43 = vsel %vm425_vm2, %v447_v34, %v449_v35  ;;  %v6389_v50 = vld [vmem:[#allocation2 + $0xb8] sm:$0x3]  ;;  %v5413_v52 = vpack.i.bf16 %v6367_v39, %v6362_v37  ;;  %v6397_v54 = vld [vmem:[#allocation2 + $0xb0] sm:$0xff]  ;;  %v456_v55 = vrot.slane %v6381_v46, 1  ;;  %v457_v59 = vrot.slane %v6383_v47, 1 }
  0x43   : > { %5394 = vrot.lane.b32.xlu0 %v5393_v27, %s6084_s17  ;;  %9206 = vst [vmem:[#allocation13_spill] sm:$0xff] %v6377_v43  ;;  %v5418_v53 = vpack.i.bf16 %v6377_v43, %v6374_v42  ;;  %v252_v56 = vld [vmem:[%s6229_s9 + $0xd0] sm:$0xff]  ;;  %v6403_v57 = vsel %vm425_vm2, %v451_v41, %v452_v44  ;;  %v6406_v58 = vsel %vm425_vm2, %v452_v44, %v454_v45  ;;  %v459_v63 = vrot.slane %v6385_v48, 1  ;;  %v5879_v1 = vld [vmem:[%s9055_s1 + $0x58] sm:$0xff]   ;;  %v254_v7 = vld [vmem:[%s6229_s9 + $0xe0] sm:$0xff] }
  0x44   : > { %5399 = vrot.lane.b32.xlu1 %v5398_v30, %s6084_s17  ;;  %9207 = vst [vmem:[#allocation14_spill] sm:$0xff] %v6403_v57  ;;  %9208 = vst [vmem:[#allocation15_spill] sm:$0xff] %v6406_v58  ;;  %v5878_v0 = vld [vmem:[%s9055_s1 + $0x10] sm:$0xff]   ;;  %v461_v2 = vrot.slane %v6387_v49, 1  ;;  %v283_v3 = vmax.f32 %v251_v51, 0.0  ;;  %v253_v6 = vld [vmem:[%s6229_s9 + $0xd8] sm:$0xff]  ;;  %v5423_v14 = vpack.i.bf16 %v6383_v47, %v6381_v46  ;;  %v5428_v17 = vpack.i.bf16 %v6406_v58, %v6403_v57 }
  0x45   : > { %v6419_v8 = vld [vmem:[#allocation2 + $0xc0] sm:$0xff]  ;;  %v462_v10 = vrot.slane %v6397_v54, 1  ;;  %v6422_v12 = vld [vmem:[#allocation2 + $0xd0] sm:$0x3]  ;;  %v255_v13 = vld [vmem:[%s6229_s9 + $0xe8] sm:$0xff]  ;;  %4659 = vmatpush3.bf16.msra.mxu0 %v5878_v0  ;;  %v464_v19 = vrot.slane %v6389_v50, 1  ;;  %v6439_v25 = vsel %vm425_vm2, %v456_v55, %v457_v59  ;;  %v6442_v27 = vsel %vm425_vm2, %v457_v59, %v459_v63 }
  0x46   : > { %316 = vst.msk [vmem:[#allocation2 + $0x141] sm:$0xff] %vm170_vm0, %v283_v3  ;;  %4660 = vmatprep.subr.bf16.mxu0 %v5879_v1  ;;  %v5880_v22 = vld [vmem:[%s9055_s1 + $0x18] sm:$0xff]   ;;  %v6436_v23 = vld [vmem:[#allocation2 + $0xc8] sm:$0xff]  ;;  %9209 = vst [vmem:[#allocation16_spill] sm:$0xff] %v6439_v25  ;;  %v284_v34 = vmax.f32 %v252_v56, 0.0  ;;  %v285_v35 = vmax.f32 %v253_v6, 0.0  ;;  %v5438_v3 = vpack.i.bf16 %v6442_v27, %v6439_v25 }
  0x47   : > { %5404 = vrot.lane.b32.xlu0 %v5403_v38, %s6084_s17  ;;  %9210 = vst [vmem:[#allocation17_spill] sm:$0xff] %v6442_v27  ;;  %v6444_v30 = vld [vmem:[#allocation2 + $0xe8] sm:$0x3]  ;;  %v6446_v33 = vld [vmem:[#allocation2 + $0x100] sm:$0x3]  ;;  %v466_v44 = vrot.slane %v6419_v8, 1  ;;  %v6476_v6 = vsel %vm425_vm2, %v461_v2, %v462_v10  ;;  %v6479_v58 = vsel %vm425_vm2, %v462_v10, %v464_v19 }
  0x48   : > { %5409 = vrot.lane.b32.xlu1 %v5408_v40, %s6084_s17  ;;  %v5881_v38 = vld [vmem:[%s9055_s1 + $0x60] sm:$0xff]   ;;  %v6451_v40 = vld [vmem:[#allocation2 + $0xd8] sm:$0xff]  ;;  %v256_v51 = vld [vmem:[%s6229_s9 + $0xf0] sm:$0xff]  ;;  %v467_v59 = vrot.slane %v6436_v23, 1  ;;  %317 = vst.msk [vmem:[#allocation2 + $0x151] sm:$0xff] %vm170_vm0, %v284_v34  ;;  %v286_v63 = vmax.f32 %v254_v7, 0.0 }
  0x49   : > { %v6453_v41 = vld [vmem:[#allocation2 + $0xe0] sm:$0xff]  ;;  %v6456_v45 = vld [vmem:[#allocation2 + $0x118] sm:$0x3]  ;;  %v6462_v55 = vld [vmem:[#allocation2 + $0xf0] sm:$0xff]  ;;  %318 = vst.msk [vmem:[#allocation2 + $0x159] sm:$0xff] %vm170_vm0, %v285_v35  ;;  %v287_v0 = vmax.f32 %v255_v13, 0.0  ;;  %4661 = vmatpush3.bf16.msra.mxu0 %v5880_v22 }
  0x4a   : > { %v6464_v56 = vld [vmem:[#allocation2 + $0xf8] sm:$0xff]  ;;  %v5882_v1 = vld [vmem:[%s9055_s1 + $0x20] sm:$0xff]   ;;  %9211 = vst [vmem:[#allocation18_spill] sm:$0xff] %v6476_v6  ;;  %9212 = vst [vmem:[#allocation19_spill] sm:$0xff] %v6479_v58  ;;  %v469_v34 = vrot.slane %v6422_v12, 1  ;;  %4662 = vmatprep.subr.bf16.mxu0 %v5881_v38  ;;  %v471_v2 = vrot.slane %v6451_v40, 1 }
  0x4b   : > { %5414 = vrot.lane.b32.xlu0 %v5413_v52, %s6084_s17  ;;  %v257_v52 = vld [vmem:[%s6229_s9 + $0xf8] sm:$0xff]  ;;  %v6482_v7 = vld [vmem:[#allocation2 + $0x108] sm:$0xff]  ;;  %v6484_v13 = vld [vmem:[#allocation2 + $0x110] sm:$0xff]  ;;  %v472_v10 = vrot.slane %v6453_v41, 1  ;;  %319 = vst.msk [vmem:[#allocation2 + $0x169] sm:$0xff] %vm170_vm0, %v286_v63  ;;  %v288_v27 = vmax.f32 %v256_v51, 0.0 }
  0x4c   : > { %5419 = vrot.lane.b32.xlu1 %v5418_v53, %s6084_s17  ;;  %v5433_v53 = vpack.i.bf16 %v6397_v54, %v6387_v49  ;;  %v6486_v22 = vld [vmem:[#allocation2 + $0x120] sm:$0xff]  ;;  %v6494_v19 = vld [vmem:[#allocation2 + $0x128] sm:$0xff]  ;;  %v6496_v35 = vld [vmem:[#allocation2 + $0x130] sm:$0x3]  ;;  %320 = vst.msk [vmem:[#allocation2 + $0x171] sm:$0xff] %vm170_vm0, %v287_v0  ;;  %v289_v38 = vmax.f32 %v257_v52, 0.0  ;;  %v5443_v52 = vpack.i.bf16 %v6436_v23, %v6419_v8 }
  0x4d   : > { %v474_v25 = vrot.slane %v6444_v30, 1  ;;  %v6504_v42 = vld [vmem:[#allocation2 + $0x138] sm:$0xff]  ;;  %321 = vst.msk [vmem:[#allocation2 + $0x181] sm:$0xff] %vm170_vm0, %v288_v27  ;;  %4663 = vmatpush3.bf16.msra.mxu0 %v5882_v1  ;;  %v5884_v51 = vld [vmem:[%s9055_s1 + $0x28] sm:$0xff]   ;;  %v5885_v0 = vld [vmem:[%s9055_s1 + $0x70] sm:$0xff]   ;;  %v5448_v27 = vpack.i.bf16 %v6479_v58, %v6476_v6  ;;  %v6526_v1 = vsel %vm425_vm2, %v466_v44, %v467_v59  ;;  %v6560_v32 = vsel %vm425_vm2, %v471_v2, %v472_v10 }
  0x4e   : > { %322 = vst.msk [vmem:[#allocation2 + $0x189] sm:$0xff] %vm170_vm0, %v289_v38  ;;  %9213 = vst [vmem:[#allocation20_spill] sm:$0xff] %v6526_v1  ;;  %v5886_v44 = vld [vmem:[%s9055_s1 + $0x30] sm:$0xff]   ;;  %v6575_v63 = vld [vmem:[%s9055_s1 + $0x100] sm:$0xff]   ;;  %v5463_v38 = vpack.i.bf16 %v6464_v56, %v6462_v55  ;;  %v9249_v20 = vrot.slane %v6283_v60, 2 }
  0x4f   : > { %5424 = vrot.lane.b32.xlu0 %v5423_v14, %s6084_s17  ;;  %v5883_v14 = vld [vmem:[%s9055_s1 + $0x68] sm:$0xff]   ;;  %v6556_v43 = vld [vmem:[#allocation2 + $0x150] sm:$0xff]  ;;  %9215 = vst [vmem:[#allocation22_spill] sm:$0xff] %v6560_v32  ;;  %v6563_v31 = vsel %vm425_vm2, %v472_v10, %v474_v25  ;;  %9217 = vst [vmem:[#allocation24_spill] sm:$0xff] %v6575_v63 }
  0x50   : > { %5429 = vrot.lane.b32.xlu1 %v5428_v17, %s6084_s17  ;;  %4664 = vmatprep.subr.bf16.mxu0 %v5883_v14  ;;  %v6546_v14 = vld [vmem:[#allocation2 + $0x148] sm:$0x3]  ;;  %9216 = vst [vmem:[#allocation23_spill] sm:$0xff] %v6563_v31  ;;  %v6577_v2 = vld [vmem:[#allocation2 + $0x158] sm:$0xff]  ;;  %v5890_v10 = vld [vmem:[%s9055_s1 + $0xc0] sm:$0xff]  }
  0x51   : > { %4665 = vmatpush3.bf16.msra.mxu0 %v5884_v51  ;;  %v5887_v51 = vld [vmem:[%s9055_s1 + $0x78] sm:$0xff]   ;;  %v5891_v17 = vld [vmem:[%s9055_s1 + $0x80] sm:$0xff]   ;;  %4766 = vmatprep.subr.bf16.mxu1 %v5890_v10  ;;  %v5903_v60 = vld [vmem:[%s9055_s1 + $0xf0] sm:$0xff]  }
  0x52   : > { %4666 = vmatprep.subr.bf16.mxu0 %v5885_v0  ;;  %v6586_v0 = vld [vmem:[#allocation2 + $0x168] sm:$0xff]  ;;  %4767 = vmatpush3.bf16.msra.mxu1 %v5891_v17  ;;  %v5473_v17 = vpack.i.bf16 %v6484_v13, %v6482_v7 }
  0x53   : > { %5434 = vrot.lane.b32.xlu0 %v5433_v53, %s6084_s17  ;;  %v6529_v53 = vsel %vm425_vm2, %v467_v59, %v469_v34  ;;  %v5453_v59 = vpack.i.bf16 %v6453_v41, %v6451_v40  ;;  %v6544_v34 = vld [vmem:[#allocation2 + $0x140] sm:$0xff]  ;;  %v6595_v25 = vld [vmem:[#allocation2 + $0x178] sm:$0x3] }
  0x54   : > { %5439 = vrot.lane.b32.xlu1 %v5438_v3, %s6084_s17  ;;  %9214 = vst [vmem:[#allocation21_spill] sm:$0xff] %v6529_v53  ;;  %v6566_v3 = vld [vmem:[#allocation2 + $0x160] sm:$0x3] }
  0x55   : > { %4667 = vmatpush3.bf16.msra.mxu0 %v5886_v44  ;;  %v5468_v44 = vpack.i.bf16 %v6563_v31, %v6560_v32  ;;  %v5892_v32 = vld [vmem:[%s9055_s1 + $0xc8] sm:$0xff]  }
  0x56   : > { %4668 = vmatprep.subr.bf16.mxu0 %v5887_v51  ;;  %v9221_v51 = vrot.slane %v6446_v33, 1  ;;  %4768 = vmatprep.subr.bf16.mxu1 %v5892_v32  ;;  %v9230_v32 = vrot.slane %v6494_v19, 1 }
  0x57   : > { %5444 = vrot.lane.b32.xlu0 %v5443_v52, %s6084_s17  ;;  %v5458_v52 = vpack.i.bf16 %v6529_v53, %v6526_v1  ;;  %v9219_v53 = vrot.slane %v6462_v55, 1 }
  0x58   : > { %5449 = vrot.lane.b32.xlu1 %v5448_v27, %s6084_s17  ;;  %v5888_v27 = vld [vmem:[%s9055_s1 + $0x38] sm:$0xff]   ;;  %v9234_v6 = vmov %v9230_v32 }
  0x59   : > { %4669 = vmatpush3.bf16.msra.mxu0 %v5888_v27 }
  0x5a   : > { %5178 = vmatprep.subr.bf16.mxu0 %v6575_v63  ;;  %v9263_v63 = vrot.slane %v6308_v11, 2  ;;  %v9266_v11 = vrot.slane %v6305_v9, 2 }
  0x5b   : > { %5454 = vrot.lane.b32.xlu0 %v5453_v59, %s6084_s17  ;;  %v9218_v59 = vrot.slane %v6464_v56, 1 }
  0x5c   : > { %5459 = vrot.lane.b32.xlu1 %v5458_v52, %s6084_s17  ;;  %v6611_v52 = vld [vmem:[#allocation2 + $0x170] sm:$0xff] }
  0x5d   : > { %v6602_v1 = vsel %vm425_vm2, %v9219_v53, %v9218_v59  ;;  %v9222_v57 = vmov %v9218_v59  ;;  %v9224_v53 = vrot.slane %v6484_v13, 1  ;;  %v9227_v59 = vrot.slane %v6456_v45, 1 }
  0x5e   : > { %9220 = vst [vmem:[#allocation25_spill] sm:$0xff] %v6602_v1  ;;  %v6609_v58 = vsel %vm425_vm2, %v9222_v57, %v9221_v51  ;;  %v5893_v57 = vld [vmem:[%s9055_s1 + $0x88] sm:$0xff]   ;;  %v9225_v51 = vrot.slane %v6482_v7, 1 }
  0x5f   : > { %9223 = vst [vmem:[#allocation26_spill] sm:$0xff] %v6609_v58  ;;  %5464 = vrot.lane.b32.xlu0 %v5463_v38, %s6084_s17  ;;  %v5478_v27 = vpack.i.bf16 %v6609_v58, %v6602_v1  ;;  %v5895_v38 = vld [vmem:[%s9055_s1 + $0xd0] sm:$0xff]   ;;  %4769 = vmatpush3.bf16.msra.mxu1 %v5893_v57 }
  0x60   : > { %5469 = vrot.lane.b32.xlu1 %v5468_v44, %s6084_s17  ;;  %v6642_v10 = vsel %vm425_vm2, %v9225_v51, %v9224_v53  ;;  %v9228_v44 = vmov %v9224_v53  ;;  %4770 = vmatprep.subr.bf16.mxu1 %v5895_v38  ;;  %v5896_v51 = vld [vmem:[%s9055_s1 + $0x90] sm:$0xff]   ;;  %v5898_v53 = vld [vmem:[%s9055_s1 + $0x98] sm:$0xff]  }
  0x61   : > { %9226 = vst [vmem:[#allocation27_spill] sm:$0xff] %v6642_v10  ;;  %v6649_v31 = vsel %vm425_vm2, %v9228_v44, %v9227_v59  ;;  %v5483_v59 = vpack.i.bf16 %v6494_v19, %v6486_v22  ;;  %v9231_v44 = vrot.slane %v6486_v22, 1 }
  0x62   : > { %9229 = vst [vmem:[#allocation28_spill] sm:$0xff] %v6649_v31  ;;  %v5488_v1 = vpack.i.bf16 %v6649_v31, %v6642_v10  ;;  %v5493_v31 = vpack.i.bf16 %v6544_v34, %v6504_v42  ;;  %v9237_v10 = vrot.slane %v6504_v42, 1 }
  0x63   : > { %5474 = vrot.lane.b32.xlu0 %v5473_v17, %s6084_s17  ;;  %v5897_v17 = vld [vmem:[%s9055_s1 + $0xd8] sm:$0xff]   ;;  %v6678_v57 = vsel %vm425_vm2, %v9231_v44, %v9230_v32  ;;  %4771 = vmatpush3.bf16.msra.mxu1 %v5896_v51  ;;  %v5899_v44 = vld [vmem:[%s9055_s1 + $0xe0] sm:$0xff]  }
  0x64   : > { %5479 = vrot.lane.b32.xlu1 %v5478_v27, %s6084_s17  ;;  %9232 = vst [vmem:[#allocation29_spill] sm:$0xff] %v6678_v57  ;;  %v9233_v27 = vrot.slane %v6496_v35, 1  ;;  %4772 = vmatprep.subr.bf16.mxu1 %v5897_v17  ;;  %v9236_v17 = vrot.slane %v6544_v34, 1 }
  0x66   : > { %v6685_v38 = vsel %vm425_vm2, %v9234_v6, %v9233_v27  ;;  %v6710_v24 = vsel %vm425_vm2, %v9237_v10, %v9236_v17  ;;  %v9239_v27 = vrot.slane %v6546_v14, 1  ;;  %v9240_v58 = vmov %v9236_v17  ;;  %v5900_v10 = vld [vmem:[%s9055_s1 + $0xa0] sm:$0xff]  }
  0x67   : > { %9235 = vst [vmem:[#allocation30_spill] sm:$0xff] %v6685_v38  ;;  %5484 = vrot.lane.b32.xlu0 %v5483_v59, %s6084_s17  ;;  %v5498_v32 = vpack.i.bf16 %v6685_v38, %v6678_v57  ;;  %9238 = vst [vmem:[#allocation31_spill] sm:$0xff] %v6710_v24  ;;  %4773 = vmatpush3.bf16.msra.mxu1 %v5898_v53  ;;  %v5503_v17 = vpack.i.bf16 %v6577_v2, %v6556_v43  ;;  %v9242_v53 = vrot.slane %v6577_v2, 1 }
  0x68   : > { %5489 = vrot.lane.b32.xlu1 %v5488_v1, %s6084_s17  ;;  %v6719_v1 = vsel %vm425_vm2, %v9240_v58, %v9239_v27  ;;  %4774 = vmatprep.subr.bf16.mxu1 %v5899_v44  ;;  %v5901_v27 = vld [vmem:[%s9055_s1 + $0xe8] sm:$0xff]   ;;  %v9243_v57 = vrot.slane %v6556_v43, 1  ;;  %v9245_v6 = vrot.slane %v6566_v3, 1  ;;  %v6750_v44 = vld [vmem:[#allocation2 + $0x180] sm:$0xff] }
  0x69   : > { %9241 = vst [vmem:[#allocation32_spill] sm:$0xff] %v6719_v1  ;;  %v9246_v59 = vmov %v9242_v53  ;;  %v5508_v21 = vpack.i.bf16 %v6719_v1, %v6710_v24  ;;  %v9250_v1 = vrot.slane %v6296_v5, 2  ;;  %v5904_v5 = vld [vmem:[%s9055_s1 + $0xb0] sm:$0xff]  }
  0x6a   : > { %v6741_v51 = vsel %vm425_vm2, %v9243_v57, %v9242_v53  ;;  %v6748_v58 = vsel %vm425_vm2, %v9246_v59, %v9245_v6  ;;  %v6757_v57 = vld [vmem:[#allocation2 + $0x188] sm:$0xff]  ;;  %v9248_v59 = vrot.slane %v6285_v61, 2 }
  0x6b   : > { %5494 = vrot.lane.b32.xlu0 %v5493_v31, %s6084_s17  ;;  %9244 = vst [vmem:[#allocation33_spill] sm:$0xff] %v6741_v51  ;;  %9247 = vst [vmem:[#allocation34_spill] sm:$0xff] %v6748_v58  ;;  %v5902_v6 = vld [vmem:[%s9055_s1 + $0xa8] sm:$0xff]   ;;  %4775 = vmatpush3.bf16.msra.mxu1 %v5900_v10  ;;  %v5513_v31 = vpack.i.bf16 %v6611_v52, %v6586_v0  ;;  %v5518_v16 = vpack.i.bf16 %v6748_v58, %v6741_v51  ;;  %v852_v61 = vrot.slane %v6757_v57, 2  ;;  %v5906_v10 = vld [vmem:[%s9055_s1 + $0xb8] sm:$0xff]  }
  0x6c   : > { %5499 = vrot.lane.b32.xlu1 %v5498_v32, %s6084_s17  ;;  %v6768_v38 = vsel %vm602_vm3, %v9249_v20, %v9248_v59  ;;  %v6770_v32 = vld [vmem:[#allocation2 + $0x190] sm:$0x3]  ;;  %v9251_v53 = vmov %v9248_v59  ;;  %4776 = vmatprep.subr.bf16.mxu1 %v5901_v27  ;;  %v851_v20 = vrot.slane %v6750_v44, 2  ;;  %v9261_v59 = vrot.slane %v6294_v4, 2 }
  0x6d   : > { %v6779_v24 = vsel %vm602_vm3, %v9251_v53, %v9250_v1  ;;  %v854_v1 = vrot.slane %v6770_v32, 2 }
  0x6e   : > { %9252 = vst [vmem:[#allocation35_spill] sm:$0xff] %v6779_v24  ;;  %v6806_v27 = vsel %vm602_vm3, %v851_v20, %v852_v61  ;;  %v5528_v20 = vpack.i.bf16 %v6757_v57, %v6750_v44 }
  0x6f   : > { %5504 = vrot.lane.b32.xlu0 %v5503_v17, %s6084_s17  ;;  %4777 = vmatpush3.bf16.msra.mxu1 %v5902_v6  ;;  %9253 = vst [vmem:[#allocation36_spill] sm:$0xff] %v6806_v27  ;;  %v6809_v53 = vsel %vm602_vm3, %v852_v61, %v854_v1  ;;  %v5523_v17 = vpack.i.bf16 %v6779_v24, %v6768_v38  ;;  %v9255_v61 = vrot.slane %v6611_v52, 1  ;;  %v9264_v24 = vmov %v9261_v59 }
  0x70   : > { %5509 = vrot.lane.b32.xlu1 %v5508_v21, %s6084_s17  ;;  %v5905_v21 = vld [vmem:[%s9055_s1 + $0xf8] sm:$0xff]   ;;  %9254 = vst [vmem:[#allocation37_spill] sm:$0xff] %v6809_v53  ;;  %4778 = vmatprep.subr.bf16.mxu1 %v5903_v60  ;;  %v9256_v60 = vrot.slane %v6586_v0, 1 }
  0x71   : > { %v9259_v6 = vmov %v9255_v61 }
  0x72   : > { %v6827_v1 = vsel %vm425_vm2, %v9256_v60, %v9255_v61  ;;  %v6848_v61 = vsel %vm602_vm3, %v9264_v24, %v9263_v63  ;;  %v9267_v24 = vrot.slane %v6322_v18, 2  ;;  %v9271_v60 = vrot.slane %v6339_v26, 2 }
  0x73   : > { %5514 = vrot.lane.b32.xlu0 %v5513_v31, %s6084_s17  ;;  %9257 = vst [vmem:[#allocation38_spill] sm:$0xff] %v6827_v1  ;;  %v9258_v31 = vrot.slane %v6595_v25, 1  ;;  %4779 = vmatpush3.bf16.msra.mxu1 %v5904_v5  ;;  %v9274_v26 = vrot.slane %v6362_v37, 2 }
  0x74   : > { %5519 = vrot.lane.b32.xlu1 %v5518_v16, %s6084_s17  ;;  %v9262_v16 = vrot.slane %v6287_v62, 2  ;;  %4780 = vmatprep.subr.bf16.mxu1 %v5905_v21  ;;  %v9270_v21 = vrot.slane %v6344_v28, 2  ;;  %v9273_v28 = vrot.slane %v6367_v39, 2 }
  0x75   : > { %v6834_v58 = vsel %vm425_vm2, %v9259_v6, %v9258_v31 }
  0x76   : > { %9260 = vst [vmem:[#allocation39_spill] sm:$0xff] %v6834_v58  ;;  %v6841_v51 = vsel %vm602_vm3, %v9262_v16, %v9261_v59  ;;  %v5533_v6 = vpack.i.bf16 %v6834_v58, %v6827_v1  ;;  %v9265_v59 = vrot.slane %v6316_v15, 2  ;;  %v9275_v16 = vrot.slane %v6360_v36, 2 }
  0x77   : > { %5524 = vrot.lane.b32.xlu0 %v5523_v17, %s6084_s17  ;;  %v5538_v62 = vpack.i.bf16 %v6848_v61, %v6841_v51  ;;  %v9269_v17 = vrot.slane %v6346_v29, 2  ;;  %4781 = vmatpush3.bf16.msra.mxu1 %v5906_v10  ;;  %v6895_v29 = vsel %vm602_vm3, %v9274_v26, %v9273_v28  ;;  %v9276_v10 = vmov %v9273_v28 }
  0x78   : > { %5529 = vrot.lane.b32.xlu1 %v5528_v20, %s6084_s17  ;;  %v6861_v4 = vsel %vm602_vm3, %v9266_v11, %v9265_v59  ;;  %v9268_v63 = vmov %v9265_v59  ;;  %v9277_v59 = vrot.slane %v6383_v47, 2  ;;  %v9283_v47 = vrot.slane %v6389_v50, 2 }
  0x79   : > { %v6868_v5 = vsel %vm602_vm3, %v9268_v63, %v9267_v24  ;;  %v6875_v20 = vsel %vm602_vm3, %v9270_v21, %v9269_v17  ;;  %v9272_v9 = vmov %v9269_v17  ;;  %v9279_v24 = vrot.slane %v6385_v48, 2 }
  0x7a   : > { %v6882_v31 = vsel %vm602_vm3, %v9272_v9, %v9271_v60  ;;  %v5543_v15 = vpack.i.bf16 %v6868_v5, %v6861_v4  ;;  %v9280_v37 = vmov %v9277_v59  ;;  %v9282_v17 = vrot.slane %v6387_v49, 2 }
  0x7b   : > { %5534 = vrot.lane.b32.xlu0 %v5533_v6, %s6084_s17  ;;  %v5548_v18 = vpack.i.bf16 %v6882_v31, %v6875_v20  ;;  %v6902_v6 = vsel %vm602_vm3, %v9276_v10, %v9275_v16  ;;  %v6916_v63 = vsel %vm602_vm3, %v9280_v37, %v9279_v24  ;;  %v9285_v9 = vrot.slane %v6436_v23, 2 }
  0x7c   : > { %5539 = vrot.lane.b32.xlu1 %v5538_v62, %s6084_s17  ;;  %v9278_v62 = vrot.slane %v6381_v46, 2  ;;  %v5553_v36 = vpack.i.bf16 %v6902_v6, %v6895_v29  ;;  %v9281_v46 = vrot.slane %v6397_v54, 2  ;;  %v9287_v28 = vrot.slane %v6422_v12, 2 }
  0x7d   : > { %v9288_v49 = vmov %v9285_v9  ;;  %v9291_v16 = vrot.slane %v6451_v40, 2  ;;  %v9292_v23 = vrot.slane %v6444_v30, 2  ;;  %v9295_v24 = vrot.slane %v6462_v55, 2 }
  0x7e   : > { %v6909_v11 = vsel %vm602_vm3, %v9278_v62, %v9277_v59  ;;  %v6929_v48 = vsel %vm602_vm3, %v9282_v17, %v9281_v46  ;;  %v9284_v21 = vmov %v9281_v46  ;;  %v6950_v26 = vsel %vm602_vm3, %v9288_v49, %v9287_v28 }
  0x7f   : > { %5544 = vrot.lane.b32.xlu0 %v5543_v15, %s6084_s17  ;;  %v5558_v39 = vpack.i.bf16 %v6916_v63, %v6909_v11  ;;  %v6936_v60 = vsel %vm602_vm3, %v9284_v21, %v9283_v47  ;;  %v9286_v15 = vrot.slane %v6419_v8, 2  ;;  %9289 = vst [vmem:[#allocation40_spill] sm:$0xff] %v6950_v26  ;;  %v9290_v8 = vrot.slane %v6453_v41, 2 }
  0x80   : > { %5549 = vrot.lane.b32.xlu1 %v5548_v18, %s6084_s17  ;;  %v5563_v50 = vpack.i.bf16 %v6936_v60, %v6929_v48  ;;  %v9294_v62 = vrot.slane %v6464_v56, 2  ;;  %v9298_v55 = vrot.slane %v6484_v13, 2  ;;  %v9299_v46 = vrot.slane %v6482_v7, 2 }
  0x81   : > { %v6943_v18 = vsel %vm602_vm3, %v9286_v15, %v9285_v9  ;;  %v6963_v12 = vsel %vm602_vm3, %v9291_v16, %v9290_v8  ;;  %v9293_v10 = vmov %v9290_v8  ;;  %v9300_v56 = vrot.slane %v6456_v45, 2 }
  0x82   : > { %v5568_v54 = vpack.i.bf16 %v6950_v26, %v6943_v18  ;;  %v6970_v59 = vsel %vm602_vm3, %v9293_v10, %v9292_v23  ;;  %v6977_v37 = vsel %vm602_vm3, %v9295_v24, %v9294_v62  ;;  %v9297_v40 = vmov %v9294_v62 }
  0x83   : > { %5554 = vrot.lane.b32.xlu0 %v5553_v36, %s6084_s17  ;;  %v9296_v36 = vrot.slane %v6446_v33, 2  ;;  %v5573_v30 = vpack.i.bf16 %v6970_v59, %v6963_v12  ;;  %v6997_v33 = vsel %vm602_vm3, %v9299_v46, %v9298_v55  ;;  %v9301_v17 = vmov %v9298_v55 }
  0x84   : > { %5559 = vrot.lane.b32.xlu1 %v5558_v39, %s6084_s17  ;;  %v7004_v47 = vsel %vm602_vm3, %v9301_v17, %v9300_v56  ;;  %v9302_v21 = vrot.slane %v6494_v19, 2  ;;  %v9303_v9 = vrot.slane %v6486_v22, 2  ;;  %v9304_v28 = vrot.slane %v6496_v35, 2 }
  0x85   : > { %v6984_v39 = vsel %vm602_vm3, %v9297_v40, %v9296_v36  ;;  %v5583_v45 = vpack.i.bf16 %v7004_v47, %v6997_v33  ;;  %v9306_v13 = vrot.slane %v6544_v34, 2  ;;  %v9309_v35 = vrot.slane %v6546_v14, 2  ;;  %v7057_v34 = vld [vmem:[#allocation2 + $0x1a0] sm:$0xff]  ;;  %v7059_v40 = vld [vmem:[#allocation2 + $0x1a8] sm:$0x3] }
  0x86   : > { %v5578_v41 = vpack.i.bf16 %v6984_v39, %v6977_v37  ;;  %v7011_v15 = vsel %vm602_vm3, %v9303_v9, %v9302_v21  ;;  %v9305_v7 = vmov %v9302_v21  ;;  %v9311_v23 = vrot.slane %v6577_v2, 2  ;;  %9315 = vst [vmem:[#allocation42_spill] sm:$0xff] %v7057_v34  ;;  %9316 = vst [vmem:[#allocation43_spill] sm:$0xff] %v7059_v40 }
  0x87   : > { %5564 = vrot.lane.b32.xlu0 %v5563_v50, %s6084_s17  ;;  %v7018_v49 = vsel %vm602_vm3, %v9305_v7, %v9304_v28  ;;  %v9307_v50 = vrot.slane %v6504_v42, 2  ;;  %v9310_v8 = vmov %v9306_v13  ;;  %v9312_v42 = vrot.slane %v6556_v43, 2 }
  0x88   : > { %5569 = vrot.lane.b32.xlu1 %v5568_v54, %s6084_s17  ;;  %v7030_v54 = vld [vmem:[#allocation2 + $0x198] sm:$0xff]  ;;  %v5588_v19 = vpack.i.bf16 %v7018_v49, %v7011_v15  ;;  %v7040_v16 = vsel %vm602_vm3, %v9310_v8, %v9309_v35  ;;  %v9313_v62 = vrot.slane %v6566_v3, 2  ;;  %v9314_v24 = vmov %v9311_v23  ;;  %v5950_v8 = vld [vmem:[#allocation2 + $0x8] sm:$0xff] }
  0x89   : > { %v7028_v22 = vsel %vm602_vm3, %v9307_v50, %v9306_v13  ;;  %9308 = vst [vmem:[#allocation41_spill] sm:$0xff] %v7030_v54  ;;  %v7047_v10 = vsel %vm602_vm3, %v9312_v42, %v9311_v23  ;;  %v681_v14 = vrot.slane %v6595_v25, 2  ;;  %v9317_v3 = vrot.slane %v6757_v57, 1  ;;  %v5951_v42 = vld [vmem:[#allocation2 + $0x10] sm:$0x3] }
  0x8a   : > { %v7054_v36 = vsel %vm602_vm3, %v9314_v24, %v9313_v62  ;;  %v5593_v43 = vpack.i.bf16 %v7040_v16, %v7028_v22  ;;  %v9318_v2 = vrot.slane %v6750_v44, 1  ;;  %v9320_v25 = vrot.slane %v6770_v32, 1 }
  0x8b   : > { %5574 = vrot.lane.b32.xlu0 %v5573_v30, %s6084_s17  ;;  %v5598_v30 = vpack.i.bf16 %v7054_v36, %v7047_v10  ;;  %v9321_v55 = vmov %v9317_v3  ;;  %v955_v56 = vrot.slane %v7030_v54, 1  ;;  %v956_v17 = vrot.slane %v7057_v34, 1 }
  0x8c   : > { %5579 = vrot.lane.b32.xlu1 %v5578_v41, %s6084_s17  ;;  %v7071_v41 = vsel %vm425_vm2, %v9318_v2, %v9317_v3  ;;  %v7079_v46 = vsel %vm425_vm2, %v9321_v55, %v9320_v25  ;;  %v958_v21 = vrot.slane %v7059_v40, 1  ;;  %v9323_v44 = vrot.slane %v6611_v52, 2 }
  0x8d   : > { %9319 = vst [vmem:[#allocation44_spill] sm:$0xff] %v7071_v41  ;;  %9322 = vst [vmem:[#allocation45_spill] sm:$0xff] %v7079_v46  ;;  %v9324_v9 = vrot.slane %v6586_v0, 2  ;;  %v5603_v7 = vpack.i.bf16 %v7079_v46, %v7071_v41  ;;  %v957_v0 = vsel %vm425_vm2, %v955_v56, %v956_v17  ;;  %v5618_v50 = vpack.i.bf16 %v6809_v53, %v6806_v27 }
  0x8e   : > { %v9325_v32 = vmov %v9323_v44  ;;  %v959_v13 = vsel %vm425_vm2, %v956_v17, %v958_v21  ;;  %v604_v23 = vrot.slane %v5950_v8, 2  ;;  %v606_v62 = vrot.slane %v5951_v42, 2 }
  0x8f   : > { %5584 = vrot.lane.b32.xlu0 %v5583_v45, %s6084_s17  ;;  %v7089_v28 = vsel %vm602_vm3, %v9324_v9, %v9323_v44  ;;  %v7094_v57 = vsel %vm602_vm3, %v9325_v32, %v681_v14  ;;  %v5613_v52 = vpack.i.bf16 %v959_v13, %v957_v0  ;;  %v9326_v32 = vld [vmem:[#allocation35_spill] sm:$0xff] }
  0x90   : > { %5589 = vrot.lane.b32.xlu1 %v5588_v19, %s6084_s17  ;;  %v5608_v45 = vpack.i.bf16 %v7094_v57, %v7089_v28  ;;  %v5949_v19 = vld [vmem:[#allocation2] sm:$0xff] }
  0x91   : > { %v603_v35 = vrot.slane %v5949_v19, 2 }
  0x93   : > { %5594 = vrot.lane.b32.xlu0 %v5593_v43, %s6084_s17  ;;  %v605_v14 = vsel %vm602_vm3, %v603_v35, %v604_v23  ;;  %v607_v43 = vsel %vm602_vm3, %v604_v23, %v606_v62 }
  0x94   : > { %5599 = vrot.lane.b32.xlu1 %v5598_v30, %s6084_s17 }
  0x97   : > { %5604 = vrot.lane.b32.xlu0 %v5603_v7, %s6084_s17 }
  0x98   : > { %5609 = vrot.lane.b32.xlu1 %v5608_v45, %s6084_s17 }
  0x9b   : > { %5614 = vrot.lane.b32.xlu0 %v5613_v52, %s6084_s17 }
  0x9c   : > { %5619 = vrot.lane.b32.xlu1 %v5618_v50, %s6084_s17 }
  0xad   : > { %v5375_v24 = vpop.permute.xlu0 %5374 }
  0xae   : > { %v5377_v30 = vunpack.i.h.bf16 %v5375_v24  ;;  %v5376_v3 = vunpack.i.l.bf16 %v5375_v24  ;;  %v5385_v2 = vpop.permute.xlu1 %5384 }
  0xaf   : > { %v5387_v25 = vunpack.i.h.bf16 %v5385_v2  ;;  %v5386_v55 = vunpack.i.l.bf16 %v5385_v2 }
  0xb0   : > { %v1013_v56 = vsel %vm170_vm0, %v605_v14, %v5376_v3  ;;  %v1014_v17 = vsel %vm170_vm0, %v607_v43, %v5377_v30 }
  0xb1   : > { %v5380_v21 = vpop.permute.xlu0 %5379  ;;  %v1082_v44 = vpack.c.bf16 %v1014_v17, %v1013_v56  ;;  %v1015_v9 = vsel %vm170_vm0, %v6768_v38, %v5386_v55  ;;  %v1016_v7 = vsel %vm170_vm0, %v9326_v32, %v5387_v25  ;;  %v5894_v38 = vld [vmem:[%s9055_s1 + $0x108] sm:$0xff]   ;;  %v9327_v25 = vld [vmem:[#allocation24_spill] sm:$0xff]  ;;  %v5952_v55 = vld [vmem:[#allocation2 + $0x18] sm:$0xff] }
  0xb2   : > { %v5382_v45 = vunpack.i.h.bf16 %v5380_v21  ;;  %v5381_v0 = vunpack.i.l.bf16 %v5380_v21  ;;  %v5390_v13 = vpop.permute.xlu1 %5389  ;;  %v1087_v52 = vpack.c.bf16 %v1016_v7, %v1015_v9  ;;  %v5953_v56 = vld [vmem:[#allocation2 + $0x20] sm:$0xff]  ;;  %v5954_v9 = vld [vmem:[#allocation2 + $0x30] sm:$0xff]  ;;  %v5955_v7 = vld [vmem:[#allocation2 + $0x38] sm:$0xff] }
  0xb3   : > { %1515 = vmatprep.mubr.bf16.mxu0 %v1082_v44  ;;  %v5392_v50 = vunpack.i.h.bf16 %v5390_v13  ;;  %v5391_v35 = vunpack.i.l.bf16 %v5390_v13 }
  0xb4   : > { %v981_v23 = vsel %vm170_vm0, %v5949_v19, %v5381_v0  ;;  %v982_v42 = vsel %vm170_vm0, %v5950_v8, %v5382_v45  ;;  %v5907_v0 = vld [vmem:[%s9055_s1 + $0x110] sm:$0xff]  }
  0xb5   : > { %v5395_v62 = vpop.permute.xlu0 %5394  ;;  %v1081_v24 = vpack.c.bf16 %v982_v42, %v981_v23  ;;  %v983_v19 = vsel %vm170_vm0, %v5952_v55, %v5391_v35  ;;  %v984_v8 = vsel %vm170_vm0, %v5953_v56, %v5392_v50 }
  0xb6   : > { %v5397_v14 = vunpack.i.h.bf16 %v5395_v62  ;;  %v5396_v43 = vunpack.i.l.bf16 %v5395_v62  ;;  %v5400_v30 = vpop.permute.xlu1 %5399  ;;  %v1086_v50 = vpack.c.bf16 %v984_v8, %v983_v19 }
  0xb7   : > { %1516 = vmatmul.mubr.bf16.vlgmr.msra.gmra.mrb[0].mxu0 %v1081_v24  ;;  %v5402_v3 = vunpack.i.h.bf16 %v5400_v30  ;;  %v5401_v2 = vunpack.i.l.bf16 %v5400_v30  ;;  %v5908_v24 = vld [vmem:[%s9055_s1 + $0x118] sm:$0xff]  }
  0xb8   : > { %5179 = vmatpush3.bf16.msra.mxu0 %v9327_v25  ;;  %1523 = vmatprep.mubr.bf16.mxu0 %v1087_v52  ;;  %v1017_v21 = vsel %vm170_vm0, %v6841_v51, %v5396_v43  ;;  %v1018_v44 = vsel %vm170_vm0, %v6848_v61, %v5397_v14 }
  0xb9   : > { %v5405_v17 = vpop.permute.xlu0 %5404  ;;  %v985_v32 = vsel %vm170_vm0, %v5954_v9, %v5401_v2  ;;  %v986_v45 = vsel %vm170_vm0, %v5955_v7, %v5402_v3  ;;  %5180 = vmatprep.subr.bf16.mxu0 %v5894_v38  ;;  %v1091_v35 = vpack.c.bf16 %v1018_v44, %v1017_v21  ;;  %v5956_v21 = vld [vmem:[#allocation2 + $0x48] sm:$0xff]  ;;  %v5957_v9 = vld [vmem:[#allocation2 + $0x50] sm:$0xff] }
  0xba   : > { %v5410_v13 = vpop.permute.xlu1 %5409  ;;  %v1084_v52 = vpack.c.bf16 %v986_v45, %v985_v32  ;;  %v5407_v23 = vunpack.i.h.bf16 %v5405_v17  ;;  %v5406_v42 = vunpack.i.l.bf16 %v5405_v17 }
  0xbb   : > { %v5412_v2 = vunpack.i.h.bf16 %v5410_v13  ;;  %v5411_v25 = vunpack.i.l.bf16 %v5410_v13 }
  0xbc   : > { %1676 = vmatprep.mubr.bf16.mxu1 %v1084_v52  ;;  %5181 = vmatpush3.bf16.msra.mxu0 %v5894_v38  ;;  %v1019_v30 = vsel %vm170_vm0, %v6861_v4, %v5406_v42  ;;  %v1020_v3 = vsel %vm170_vm0, %v6868_v5, %v5407_v23 }
  0xbd   : > { %v5415_v62 = vpop.permute.xlu0 %5414  ;;  %5182 = vmatprep.subr.bf16.mxu0 %v5907_v0  ;;  %v1095_v55 = vpack.c.bf16 %v1020_v3, %v1019_v30  ;;  %v987_v44 = vsel %vm170_vm0, %v5956_v21, %v5411_v25  ;;  %v988_v32 = vsel %vm170_vm0, %v5957_v9, %v5412_v2  ;;  %v5958_v3 = vld [vmem:[#allocation2 + $0x60] sm:$0xff]  ;;  %v5959_v25 = vld [vmem:[#allocation2 + $0x68] sm:$0xff] }
  0xbe   : > { %v5420_v14 = vpop.permute.xlu1 %5419  ;;  %v5417_v19 = vunpack.i.h.bf16 %v5415_v62  ;;  %v5416_v56 = vunpack.i.l.bf16 %v5415_v62 }
  0xbf   : > { %1524 = vmatmul.mubr.bf16.gmra.mrb[4].mxu0 %v1086_v50  ;;  %v7150_v50 = vpack.c.bf16 %v988_v32, %v987_v44 }
  0xc0   : > { %1531 = vmatprep.mubr.bf16.mxu0 %v1091_v35  ;;  %5183 = vmatpush3.bf16.msra.mxu0 %v5907_v0  ;;  %v1021_v45 = vsel %vm170_vm0, %v6875_v20, %v5416_v56  ;;  %v1022_v0 = vsel %vm170_vm0, %v6882_v31, %v5417_v19  ;;  %v5422_v35 = vunpack.i.h.bf16 %v5420_v14 }
  0xc1   : > { %v5425_v43 = vpop.permute.xlu0 %5424  ;;  %5184 = vmatprep.subr.bf16.mxu0 %v5908_v24  ;;  %v1099_v23 = vpack.c.bf16 %v1022_v0, %v1021_v45 }
  0xc2   : > { %v5430_v38 = vpop.permute.xlu1 %5429  ;;  %v5427_v42 = vunpack.i.h.bf16 %v5425_v43  ;;  %v5426_v62 = vunpack.i.l.bf16 %v5425_v43 }
  0xc3   : > { %v5432_v44 = vunpack.i.h.bf16 %v5430_v38  ;;  %v5431_v9 = vunpack.i.l.bf16 %v5430_v38 }
  0xc4   : > { %5185 = vmatpush3.bf16.msra.mxu0 %v5908_v24  ;;  %v1024_v43 = vsel %vm170_vm0, %v6902_v6, %v5427_v42  ;;  %v5961_v42 = vld [vmem:[#allocation2 + $0x80] sm:$0xff] }
  0xc5   : > { %v5435_v8 = vpop.permute.xlu0 %5434 }
  0xc6   : > { %v5440_v17 = vpop.permute.xlu1 %5439  ;;  %v5437_v45 = vunpack.i.h.bf16 %v5435_v8  ;;  %v5436_v0 = vunpack.i.l.bf16 %v5435_v8 }
  0xc7   : > { %1532 = vmatmul.mubr.bf16.gmra.mrb[8].mxu0 %v1084_v52  ;;  %v5421_v52 = vunpack.i.l.bf16 %v5420_v14  ;;  %v1023_v14 = vsel %vm170_vm0, %v6895_v29, %v5426_v62 }
  0xc8   : > { %1539 = vmatprep.mubr.bf16.mxu0 %v1095_v55  ;;  %v990_v55 = vsel %vm170_vm0, %v5959_v25, %v5422_v35  ;;  %v1103_v32 = vpack.c.bf16 %v1024_v43, %v1023_v14  ;;  %v1025_v38 = vsel %vm170_vm0, %v6909_v11, %v5436_v0  ;;  %v1026_v8 = vsel %vm170_vm0, %v6916_v63, %v5437_v45  ;;  %v5962_v0 = vld [vmem:[#allocation2 + $0x90] sm:$0xff]  ;;  %v5963_v45 = vld [vmem:[#allocation2 + $0x98] sm:$0xff] }
  0xc9   : > { %v5445_v7 = vpop.permute.xlu0 %5444  ;;  %v989_v2 = vsel %vm170_vm0, %v5958_v3, %v5421_v52  ;;  %v992_v3 = vsel %vm170_vm0, %v5961_v42, %v5432_v44  ;;  %v5442_v14 = vunpack.i.h.bf16 %v5440_v17  ;;  %v5441_v43 = vunpack.i.l.bf16 %v5440_v17 }
  0xca   : > { %v7148_v13 = vpop.permute.xlu1 %5449  ;;  %v7167_v21 = vpack.c.bf16 %v990_v55, %v989_v2  ;;  %v5447_v27 = vunpack.i.h.bf16 %v5445_v7 }
  0xcb   : > { %v993_v42 = vsel %vm170_vm0, %v5962_v0, %v5441_v43  ;;  %v994_v53 = vsel %vm170_vm0, %v5963_v45, %v5442_v14 }
  0xcd   : > { %v7152_v24 = vpop.permute.xlu0 %5454 }
  0xce   : > { %v7154_v30 = vpop.permute.xlu1 %5459  ;;  %v5457_v0 = vunpack.i.h.bf16 %v7152_v24  ;;  %v5456_v14 = vunpack.i.l.bf16 %v7152_v24 }
  0xcf   : > { %1540 = vmatmul.mubr.bf16.gmra.mrb[12].mxu0 %v7150_v50  ;;  %v5462_v34 = vunpack.i.h.bf16 %v7154_v30 }
  0xd0   : > { %1547 = vmatprep.mubr.bf16.mxu0 %v1099_v23  ;;  %v5960_v23 = vld [vmem:[#allocation2 + $0x78] sm:$0xff]  ;;  %v1030_v24 = vsel %vm170_vm0, %v6950_v26, %v5457_v0 }
  0xd1   : > { %v7159_v19 = vpop.permute.xlu0 %5464  ;;  %v991_v62 = vsel %vm170_vm0, %v5960_v23, %v5431_v9  ;;  %v5446_v9 = vunpack.i.l.bf16 %v5445_v7  ;;  %v1028_v7 = vsel %vm170_vm0, %v6936_v60, %v5447_v27  ;;  %v5964_v27 = vld [vmem:[#allocation2 + $0xa8] sm:$0xff] }
  0xd2   : > { %v7165_v56 = vpop.permute.xlu1 %5469  ;;  %v7184_v55 = vpack.c.bf16 %v992_v3, %v991_v62  ;;  %v5467_v58 = vunpack.i.h.bf16 %v7159_v19  ;;  %v5466_v0 = vunpack.i.l.bf16 %v7159_v19  ;;  %v9331_v19 = vld [vmem:[#allocation9_spill] sm:$0xff] }
  0xd3   : > { %v1027_v17 = vsel %vm170_vm0, %v6929_v48, %v5446_v9  ;;  %v5965_v9 = vld [vmem:[#allocation2 + $0xb0] sm:$0xff] }
  0xd4   : > { %v1111_v43 = vpack.c.bf16 %v1028_v7, %v1027_v17 }
  0xd5   : > { %v7169_v52 = vpop.permute.xlu0 %5474 }
  0xd6   : > { %v7171_v35 = vpop.permute.xlu1 %5479 }
  0xd7   : > { %1548 = vmatmul.mubr.bf16.gmra.mrb[16].mxu0 %v7167_v21 }
  0xd8   : > { %1555 = vmatprep.mubr.bf16.mxu0 %v1103_v32  ;;  %v1107_v32 = vpack.c.bf16 %v1026_v8, %v1025_v38  ;;  %v7201_v38 = vpack.c.bf16 %v994_v53, %v993_v42  ;;  %v5452_v8 = vunpack.i.h.bf16 %v7148_v13 }
  0xd9   : > { %v7176_v2 = vpop.permute.xlu0 %5484 }
  0xda   : > { %v7182_v25 = vpop.permute.xlu1 %5489  ;;  %v996_v42 = vsel %vm170_vm0, %v5965_v9, %v5452_v8  ;;  %v9329_v9 = vld [vmem:[#allocation7_spill] sm:$0xff] }
  0xdd   : > { %v7186_v23 = vpop.permute.xlu0 %5494 }
  0xde   : > { %v7188_v44 = vpop.permute.xlu1 %5499 }
  0xdf   : > { %1556 = vmatmul.mubr.bf16.gmra.mrb[20].mxu0 %v7184_v55 }
  0xe0   : > { %1563 = vmatprep.mubr.bf16.mxu0 %v1107_v32  ;;  %v5451_v32 = vunpack.i.l.bf16 %v7148_v13  ;;  %v1029_v13 = vsel %vm170_vm0, %v6943_v18, %v5456_v14 }
  0xe1   : > { %v7193_v62 = vpop.permute.xlu0 %5504  ;;  %v1115_v14 = vpack.c.bf16 %v1030_v24, %v1029_v13  ;;  %v5967_v13 = vld [vmem:[#allocation2 + $0xc8] sm:$0xff] }
  0xe2   : > { %v7199_v3 = vpop.permute.xlu1 %5509  ;;  %v995_v53 = vsel %vm170_vm0, %v5964_v27, %v5451_v32  ;;  %v5461_v32 = vunpack.i.l.bf16 %v7154_v30  ;;  %v9328_v27 = vld [vmem:[#allocation6_spill] sm:$0xff]  ;;  %v998_v24 = vsel %vm170_vm0, %v5967_v13, %v5462_v34  ;;  %v5472_v34 = vunpack.i.h.bf16 %v7165_v56 }
  0xe3   : > { %v5477_v13 = vunpack.i.h.bf16 %v7169_v52 }
  0xe5   : > { %v7207_v45 = vpop.permute.xlu0 %5514 }
  0xe6   : > { %v7209_v40 = vpop.permute.xlu1 %5519 }
  0xe7   : > { %1564 = vmatmul.mubr.bf16.gmra.mrb[24].mxu0 %v7201_v38 }
  0xe8   : > { %1571 = vmatprep.mubr.bf16.mxu0 %v1111_v43  ;;  %v7221_v43 = vpack.c.bf16 %v996_v42, %v995_v53  ;;  %v5966_v42 = vld [vmem:[#allocation2 + $0xc0] sm:$0xff] }
  0xe9   : > { %v5525_v46 = vpop.permute.xlu0 %5524 }
  0xea   : > { %v5527_v17 = vunpack.i.h.bf16 %v5525_v46  ;;  %v5526_v7 = vunpack.i.l.bf16 %v5525_v46  ;;  %v7218_v41 = vpop.permute.xlu1 %5529 }
  0xec   : > { %v1045_v8 = vsel %vm170_vm0, %v9328_v27, %v5526_v7  ;;  %v1046_v54 = vsel %vm170_vm0, %v9329_v9, %v5527_v17  ;;  %v997_v17 = vsel %vm170_vm0, %v5966_v42, %v5461_v32  ;;  %v9330_v7 = vld [vmem:[#allocation8_spill] sm:$0xff]  ;;  %v1031_v9 = vsel %vm170_vm0, %v6963_v12, %v5466_v0  ;;  %v5968_v0 = vld [vmem:[#allocation2 + $0xd8] sm:$0xff] }
  0xed   : > { %v1083_v46 = vpack.c.bf16 %v1046_v54, %v1045_v8  ;;  %v7230_v1 = vpop.permute.xlu0 %5534 }
  0xee   : > { %v5540_v26 = vpop.permute.xlu1 %5539 }
  0xef   : > { %1572 = vmatmul.mubr.bf16.gmra.mrb[28].mxu0 %v7221_v43  ;;  %1677 = vmatmul.mubr.bf16.vlgmr.msra.gmra.mrb[0].mxu1 %v1083_v46  ;;  %v5542_v53 = vunpack.i.h.bf16 %v5540_v26  ;;  %v5541_v30 = vunpack.i.l.bf16 %v5540_v26  ;;  %v1032_v26 = vsel %vm170_vm0, %v6970_v59, %v5467_v58 }
  0xf0   : > { %1684 = vmatprep.mubr.bf16.mxu1 %v7150_v50  ;;  %1579 = vmatprep.mubr.bf16.mxu0 %v1115_v14  ;;  %v5471_v50 = vunpack.i.l.bf16 %v7165_v56  ;;  %v7245_v14 = vpack.c.bf16 %v998_v24, %v997_v17  ;;  %v5969_v17 = vld [vmem:[#allocation2 + $0xe0] sm:$0xff]  ;;  %v9332_v56 = vld [vmem:[#allocation10_spill] sm:$0xff] }
  0xf1   : > { %v1047_v54 = vsel %vm170_vm0, %v9330_v7, %v5541_v30  ;;  %v1048_v27 = vsel %vm170_vm0, %v9331_v19, %v5542_v53  ;;  %v5545_v8 = vpop.permute.xlu0 %5544  ;;  %v1119_v30 = vpack.c.bf16 %v1032_v26, %v1031_v9  ;;  %v5476_v53 = vunpack.i.l.bf16 %v7169_v52 }
  0xf2   : > { %v1088_v32 = vpack.c.bf16 %v1048_v27, %v1047_v54  ;;  %v5547_v46 = vunpack.i.h.bf16 %v5545_v8  ;;  %v5546_v42 = vunpack.i.l.bf16 %v5545_v8  ;;  %v999_v58 = vsel %vm170_vm0, %v5968_v0, %v5471_v50  ;;  %v9333_v54 = vld [vmem:[#allocation11_spill] sm:$0xff]  ;;  %v5550_v27 = vpop.permute.xlu1 %5549 }
  0xf3   : > { %v1000_v24 = vsel %vm170_vm0, %v5969_v17, %v5472_v34  ;;  %v1033_v52 = vsel %vm170_vm0, %v6977_v37, %v5476_v53  ;;  %v1034_v8 = vsel %vm170_vm0, %v6984_v39, %v5477_v13  ;;  %v5481_v9 = vunpack.i.l.bf16 %v7171_v35  ;;  %v5970_v53 = vld [vmem:[#allocation2 + $0xf0] sm:$0xff]  ;;  %v5971_v0 = vld [vmem:[#allocation2 + $0xf8] sm:$0xff] }
  0xf4   : > { %v1049_v7 = vsel %vm170_vm0, %v9332_v56, %v5546_v42  ;;  %v1050_v19 = vsel %vm170_vm0, %v9333_v54, %v5547_v46  ;;  %v5482_v50 = vunpack.i.h.bf16 %v7171_v35  ;;  %v5551_v34 = vunpack.i.l.bf16 %v5550_v27  ;;  %v9334_v35 = vld [vmem:[#allocation12_spill] sm:$0xff] }
  0xf5   : > { %v1092_v26 = vpack.c.bf16 %v1050_v19, %v1049_v7  ;;  %v1123_v42 = vpack.c.bf16 %v1034_v8, %v1033_v52  ;;  %v5486_v46 = vunpack.i.l.bf16 %v7176_v2  ;;  %v1001_v13 = vsel %vm170_vm0, %v5970_v53, %v5481_v9  ;;  %v5555_v7 = vpop.permute.xlu0 %5554 }
  0xf6   : > { %v1051_v17 = vsel %vm170_vm0, %v9334_v35, %v5551_v34  ;;  %v5491_v19 = vunpack.i.l.bf16 %v7182_v25  ;;  %v5492_v52 = vunpack.i.h.bf16 %v7182_v25  ;;  %v5557_v8 = vunpack.i.h.bf16 %v5555_v7  ;;  %v5972_v34 = vld [vmem:[#allocation2 + $0x108] sm:$0xff]  ;;  %v9336_v25 = vld [vmem:[#allocation14_spill] sm:$0xff] }
  0xf7   : > { %1580 = vmatmul.mubr.bf16.gmra.mrb[32].mxu0 %v7245_v14  ;;  %1685 = vmatmul.mubr.bf16.gmra.mrb[4].mxu1 %v1088_v32  ;;  %v5552_v32 = vunpack.i.h.bf16 %v5550_v27  ;;  %v5556_v9 = vunpack.i.l.bf16 %v5555_v7 }
  0xf8   : > { %1692 = vmatprep.mubr.bf16.mxu1 %v7167_v21  ;;  %1587 = vmatprep.mubr.bf16.mxu0 %v1119_v30  ;;  %v7263_v21 = vpack.c.bf16 %v1000_v24, %v999_v58  ;;  %v5487_v30 = vunpack.i.h.bf16 %v7176_v2  ;;  %v1002_v58 = vsel %vm170_vm0, %v5971_v0, %v5482_v50  ;;  %v9335_v24 = vld [vmem:[#allocation13_spill] sm:$0xff]  ;;  %v1035_v2 = vsel %vm170_vm0, %v6997_v33, %v5486_v46 }
  0xf9   : > { %v1052_v56 = vsel %vm170_vm0, %v9335_v24, %v5552_v32  ;;  %v5497_v50 = vunpack.i.h.bf16 %v7186_v23  ;;  %v5496_v32 = vunpack.i.l.bf16 %v7186_v23  ;;  %v1053_v53 = vsel %vm170_vm0, %v9336_v25, %v5556_v9  ;;  %v5975_v9 = vld [vmem:[#allocation2 + $0x128] sm:$0xff] }
  0xfa   : > { %v1036_v54 = vsel %vm170_vm0, %v7004_v47, %v5487_v30  ;;  %v1096_v27 = vpack.c.bf16 %v1052_v56, %v1051_v17  ;;  %v5973_v30 = vld [vmem:[#allocation2 + $0x110] sm:$0xff]  ;;  %v5501_v17 = vunpack.i.l.bf16 %v7188_v44  ;;  %v5502_v56 = vunpack.i.h.bf16 %v7188_v44  ;;  %v9338_v44 = vld [vmem:[#allocation16_spill] sm:$0xff] }
  0xfb   : > { %v1004_v46 = vsel %vm170_vm0, %v5973_v30, %v5492_v52  ;;  %v1037_v23 = vsel %vm170_vm0, %v7011_v15, %v5496_v32  ;;  %v1038_v35 = vsel %vm170_vm0, %v7018_v49, %v5497_v50  ;;  %v5974_v52 = vld [vmem:[#allocation2 + $0x120] sm:$0xff]  ;;  %v9339_v32 = vld [vmem:[#allocation17_spill] sm:$0xff] }
  0xff   : > { %1588 = vmatmul.mubr.bf16.gmra.mrb[36].mxu0 %v7263_v21  ;;  %1693 = vmatmul.mubr.bf16.gmra.mrb[8].mxu1 %v1092_v26  ;;  %v1127_v26 = vpack.c.bf16 %v1036_v54, %v1035_v2  ;;  %v1131_v54 = vpack.c.bf16 %v1038_v35, %v1037_v23  ;;  %v5909_v23 = vld [vmem:[%s9056_s2] sm:$0xff]   ;;  %v5517_v35 = vunpack.i.h.bf16 %v7207_v45 }
 0x100   : > { %1700 = vmatprep.mubr.bf16.mxu1 %v7184_v55  ;;  %1595 = vmatprep.mubr.bf16.mxu0 %v1123_v42  ;;  %v7281_v55 = vpack.c.bf16 %v1002_v58, %v1001_v13  ;;  %v1003_v42 = vsel %vm170_vm0, %v5972_v34, %v5491_v19  ;;  %v9337_v13 = vld [vmem:[#allocation15_spill] sm:$0xff]  ;;  %v5560_v58 = vpop.permute.xlu1 %5559  ;;  %v5507_v19 = vunpack.i.h.bf16 %v7193_v62 }
 0x101   : > { %v1054_v0 = vsel %vm170_vm0, %v9337_v13, %v5557_v8  ;;  %v5562_v7 = vunpack.i.h.bf16 %v5560_v58  ;;  %v5561_v2 = vunpack.i.l.bf16 %v5560_v58  ;;  %v1005_v8 = vsel %vm170_vm0, %v5974_v52, %v5501_v17  ;;  %5218 = vmatprep.subr.bf16.mxu1 %v5909_v23 }
 0x102   : > { %v1100_v24 = vpack.c.bf16 %v1054_v0, %v1053_v53  ;;  %v1040_v30 = vsel %vm170_vm0, %v7040_v16, %v5507_v19  ;;  %v5512_v53 = vunpack.i.h.bf16 %v7199_v3  ;;  %v5516_v17 = vunpack.i.l.bf16 %v7207_v45  ;;  %v9341_v19 = vld [vmem:[#allocation19_spill] sm:$0xff]  ;;  %5219 = vmatpush3.bf16.msra.mxu1 %v5909_v23 }
 0x103   : > { %v1055_v50 = vsel %vm170_vm0, %v9338_v44, %v5561_v2  ;;  %v1056_v34 = vsel %vm170_vm0, %v9339_v32, %v5562_v7  ;;  %v9340_v2 = vld [vmem:[#allocation18_spill] sm:$0xff]  ;;  %v5522_v44 = vunpack.i.h.bf16 %v7209_v40 }
 0x104   : > { %v1104_v25 = vpack.c.bf16 %v1056_v34, %v1055_v50  ;;  %v5570_v45 = vpop.permute.xlu1 %5569  ;;  %v1041_v52 = vsel %vm170_vm0, %v7047_v10, %v5516_v17  ;;  %v5536_v17 = vunpack.i.l.bf16 %v7230_v1 }
 0x105   : > { %v5572_v50 = vunpack.i.h.bf16 %v5570_v45  ;;  %v5571_v32 = vunpack.i.l.bf16 %v5570_v45 }
 0x107   : > { %1596 = vmatmul.mubr.bf16.gmra.mrb[40].mxu0 %v7281_v55  ;;  %1701 = vmatmul.mubr.bf16.gmra.mrb[12].mxu1 %v1096_v27  ;;  %v5506_v27 = vunpack.i.l.bf16 %v7193_v62 }
 0x108   : > { %1708 = vmatprep.mubr.bf16.mxu1 %v7201_v38  ;;  %1603 = vmatprep.mubr.bf16.mxu0 %v1127_v26  ;;  %v7299_v38 = vpack.c.bf16 %v1004_v46, %v1003_v42  ;;  %v1006_v26 = vsel %vm170_vm0, %v5975_v9, %v5502_v56  ;;  %v5565_v42 = vpop.permute.xlu0 %5564  ;;  %v5511_v46 = vunpack.i.l.bf16 %v7199_v3  ;;  %v5977_v3 = vld [vmem:[#allocation2 + $0x140] sm:$0xff] }
 0x109   : > { %v1039_v62 = vsel %vm170_vm0, %v7028_v22, %v5506_v27  ;;  %v5567_v13 = vunpack.i.h.bf16 %v5565_v42  ;;  %v5566_v0 = vunpack.i.l.bf16 %v5565_v42  ;;  %v1008_v7 = vsel %vm170_vm0, %v5977_v3, %v5512_v53 }
 0x10a   : > { %v1135_v58 = vpack.c.bf16 %v1040_v30, %v1039_v62  ;;  %v5532_v42 = vunpack.i.h.bf16 %v7218_v41  ;;  %v5531_v62 = vunpack.i.l.bf16 %v7218_v41  ;;  %v5978_v30 = vld [vmem:[#allocation2 + $0x150] sm:$0xff] }
 0x10b   : > { %v1058_v27 = vsel %vm170_vm0, %v9341_v19, %v5567_v13 }
 0x10c   : > { %v5575_v23 = vpop.permute.xlu0 %5574  ;;  %v1043_v41 = vsel %vm170_vm0, %v7089_v28, %v5531_v62 }
 0x10d   : > { %v5577_v3 = vunpack.i.h.bf16 %v5575_v23 }
 0x10f   : > { %1604 = vmatmul.mubr.bf16.gmra.mrb[44].mxu0 %v7299_v38  ;;  %1709 = vmatmul.mubr.bf16.gmra.mrb[16].mxu1 %v1100_v24  ;;  %v5976_v24 = vld [vmem:[#allocation2 + $0x138] sm:$0xff] }
 0x110   : > { %1716 = vmatprep.mubr.bf16.mxu1 %v7221_v43  ;;  %1611 = vmatprep.mubr.bf16.mxu0 %v1131_v54  ;;  %v7317_v43 = vpack.c.bf16 %v1006_v26, %v1005_v8  ;;  %v1007_v56 = vsel %vm170_vm0, %v5976_v24, %v5511_v46  ;;  %v1057_v54 = vsel %vm170_vm0, %v9340_v2, %v5566_v0  ;;  %v9343_v0 = vld [vmem:[#allocation21_spill] sm:$0xff] }
 0x111   : > { %v1042_v8 = vsel %vm170_vm0, %v7054_v36, %v5517_v35  ;;  %v7338_v9 = vpack.c.bf16 %v1008_v7, %v1007_v56  ;;  %v1108_v26 = vpack.c.bf16 %v1058_v27, %v1057_v54  ;;  %v1044_v35 = vsel %vm170_vm0, %v7094_v57, %v5532_v42  ;;  %v5980_v54 = vld [vmem:[#allocation2 + $0x168] sm:$0xff]  ;;  %v5981_v27 = vld [vmem:[#allocation2 + $0x170] sm:$0xff] }
 0x112   : > { %v1139_v34 = vpack.c.bf16 %v1042_v8, %v1041_v52  ;;  %v5537_v56 = vunpack.i.h.bf16 %v7230_v1  ;;  %v5576_v7 = vunpack.i.l.bf16 %v5575_v23  ;;  %v1143_v2 = vpack.c.bf16 %v1044_v35, %v1043_v41  ;;  %v9344_v52 = vld [vmem:[#allocation22_spill] sm:$0xff] }
 0x113   : > { %v1011_v19 = vsel %vm170_vm0, %v5980_v54, %v5536_v17  ;;  %v1085_v42 = vpack.c.bf16 %v6848_v61, %v6841_v51  ;;  %v1094_v51 = vpack.c.bf16 %v6882_v31, %v6875_v20  ;;  %v9348_v61 = vld [vmem:[#allocation27_spill] sm:$0xff]  ;;  %v1098_v41 = vpack.c.bf16 %v6902_v6, %v6895_v29 }
 0x114   : > { %v1012_v45 = vsel %vm170_vm0, %v5981_v27, %v5537_v56  ;;  %v1061_v8 = vsel %vm170_vm0, %v9344_v52, %v5576_v7  ;;  %v1102_v31 = vpack.c.bf16 %v6916_v63, %v6909_v11  ;;  %v1106_v6 = vpack.c.bf16 %v6936_v60, %v6929_v48  ;;  %v9352_v63 = vld [vmem:[#allocation40_spill] sm:$0xff] }
 0x115   : > { %v1114_v60 = vpack.c.bf16 %v6970_v59, %v6963_v12  ;;  %v5982_v59 = vld [vmem:[#allocation2 + $0x180] sm:$0xff] }
 0x117   : > { %1612 = vmatmul.mubr.bf16.gmra.mrb[48].mxu0 %v7317_v43  ;;  %1717 = vmatmul.mubr.bf16.gmra.mrb[20].mxu1 %v1104_v25  ;;  %v5979_v25 = vld [vmem:[#allocation2 + $0x158] sm:$0xff] }
 0x118   : > { %1724 = vmatprep.mubr.bf16.mxu1 %v7245_v14  ;;  %1619 = vmatprep.mubr.bf16.mxu0 %v1135_v58  ;;  %v5521_v14 = vunpack.i.l.bf16 %v7209_v40  ;;  %v1010_v53 = vsel %vm170_vm0, %v5979_v25, %v5522_v44  ;;  %v9342_v40 = vld [vmem:[#allocation20_spill] sm:$0xff]  ;;  %v1060_v58 = vsel %vm170_vm0, %v9343_v0, %v5572_v50  ;;  %v1137_v44 = vpack.c.bf16 %v1012_v45, %v1011_v19  ;;  %v5585_v25 = vpop.permute.xlu0 %5584 }
 0x119   : > { %v1059_v13 = vsel %vm170_vm0, %v9342_v40, %v5571_v32  ;;  %v5586_v0 = vunpack.i.l.bf16 %v5585_v25  ;;  %v9354_v19 = vld [vmem:[#allocation32_spill] sm:$0xff] }
 0x11a   : > { %v1009_v46 = vsel %vm170_vm0, %v5978_v30, %v5521_v14  ;;  %v1112_v24 = vpack.c.bf16 %v1060_v58, %v1059_v13  ;;  %v9345_v14 = vld [vmem:[#allocation23_spill] sm:$0xff]  ;;  %v9347_v30 = vld [vmem:[#allocation26_spill] sm:$0xff]  ;;  %v5587_v13 = vunpack.i.h.bf16 %v5585_v25  ;;  %v9349_v58 = vld [vmem:[#allocation28_spill] sm:$0xff] }
 0x11b   : > { %v1062_v1 = vsel %vm170_vm0, %v9345_v14, %v5577_v3  ;;  %v1118_v14 = vpack.c.bf16 %v6984_v39, %v6977_v37 }
 0x11c   : > { %v1116_v50 = vpack.c.bf16 %v1062_v1, %v1061_v8  ;;  %v1066_v23 = vsel %vm170_vm0, %v9349_v58, %v5587_v13  ;;  %v5595_v3 = vpop.permute.xlu0 %5594  ;;  %v9360_v58 = vld [vmem:[#allocation42_spill] sm:$0xff] }
 0x11d   : > { %v5597_v7 = vunpack.i.h.bf16 %v5595_v3  ;;  %v5596_v11 = vunpack.i.l.bf16 %v5595_v3 }
 0x11f   : > { %1620 = vmatmul.mubr.bf16.gmra.mrb[52].mxu0 %v7338_v9  ;;  %1725 = vmatmul.mubr.bf16.gmra.mrb[24].mxu1 %v1108_v26  ;;  %v5580_v26 = vpop.permute.xlu1 %5579  ;;  %v1070_v27 = vsel %vm170_vm0, %v9354_v19, %v5597_v7  ;;  %v9365_v7 = vld [vmem:[#allocation36_spill] sm:$0xff] }
 0x120   : > { %1732 = vmatprep.mubr.bf16.mxu1 %v7263_v21  ;;  %1627 = vmatprep.mubr.bf16.mxu0 %v1139_v34  ;;  %v1133_v21 = vpack.c.bf16 %v1010_v53, %v1009_v46  ;;  %v5582_v32 = vunpack.i.h.bf16 %v5580_v26  ;;  %v5581_v34 = vunpack.i.l.bf16 %v5580_v26  ;;  %v1090_v53 = vpack.c.bf16 %v6868_v5, %v6861_v4  ;;  %v5605_v52 = vpop.permute.xlu0 %5604  ;;  %v9355_v26 = vld [vmem:[#allocation33_spill] sm:$0xff] }
 0x121   : > { %v5606_v1 = vunpack.i.l.bf16 %v5605_v52 }
 0x122   : > { %v1064_v46 = vsel %vm170_vm0, %v9347_v30, %v5582_v32  ;;  %v9356_v32 = vld [vmem:[#allocation34_spill] sm:$0xff] }
 0x123   : > { %v5590_v4 = vpop.permute.xlu1 %5589 }
 0x124   : > { %v5592_v35 = vunpack.i.h.bf16 %v5590_v4  ;;  %v5591_v20 = vunpack.i.l.bf16 %v5590_v4  ;;  %v5615_v39 = vpop.permute.xlu0 %5614 }
 0x125   : > { %v5617_v13 = vunpack.i.h.bf16 %v5615_v39 }
 0x127   : > { %1628 = vmatmul.mubr.bf16.gmra.mrb[56].mxu0 %v1133_v21  ;;  %1733 = vmatmul.mubr.bf16.gmra.mrb[28].mxu1 %v1112_v24  ;;  %v9351_v24 = vld [vmem:[#allocation30_spill] sm:$0xff]  ;;  %v5600_v45 = vpop.permute.xlu1 %5599 }
 0x128   : > { %1740 = vmatprep.mubr.bf16.mxu1 %v7281_v55  ;;  %1635 = vmatprep.mubr.bf16.mxu0 %v1143_v2  ;;  %v9346_v55 = vld [vmem:[#allocation25_spill] sm:$0xff]  ;;  %v1068_v56 = vsel %vm170_vm0, %v9351_v24, %v5592_v35  ;;  %v1110_v2 = vpack.c.bf16 %v9352_v63, %v6943_v18  ;;  %v5602_v8 = vunpack.i.h.bf16 %v5600_v45  ;;  %v5601_v18 = vunpack.i.l.bf16 %v5600_v45 }
 0x129   : > { %v1063_v62 = vsel %vm170_vm0, %v9346_v55, %v5581_v34  ;;  %v5983_v55 = vld [vmem:[#allocation2 + $0x188] sm:$0xff] }
 0x12a   : > { %v1120_v40 = vpack.c.bf16 %v1064_v46, %v1063_v62  ;;  %v1072_v34 = vsel %vm170_vm0, %v9356_v32, %v5602_v8  ;;  %v9362_v24 = vld [vmem:[#allocation45_spill] sm:$0xff] }
 0x12b   : > { %v5610_v12 = vpop.permute.xlu1 %5609 }
 0x12c   : > { %v5612_v30 = vunpack.i.h.bf16 %v5610_v12  ;;  %v5611_v46 = vunpack.i.l.bf16 %v5610_v12 }
 0x12f   : > { %1636 = vmatmul.mubr.bf16.gmra.mrb[60].mxu0 %v1137_v44  ;;  %1741 = vmatmul.mubr.bf16.gmra.mrb[32].mxu1 %v1116_v50  ;;  %v1071_v50 = vsel %vm170_vm0, %v9355_v26, %v5601_v18 }
 0x130   : > { %1748 = vmatprep.mubr.bf16.mxu1 %v7299_v38  ;;  %5186 = vmatprep.mubr.msk.bf16.mxu0 %vm170_vm0, %v1085_v42  ;;  %v1065_v38 = vsel %vm170_vm0, %v9348_v61, %v5586_v0  ;;  %v1077_v42 = vsel %vm170_vm0, %v5982_v59, %v5606_v1  ;;  %v1136_v62 = vpack.c.bf16 %v1072_v34, %v1071_v50  ;;  %v5616_v0 = vunpack.i.l.bf16 %v5615_v39 }
 0x131   : > { %v1124_v5 = vpack.c.bf16 %v1066_v23, %v1065_v38  ;;  %v1080_v23 = vsel %vm170_vm0, %v9360_v58, %v5617_v13 }
 0x137   : > { %1749 = vmatmul.mubr.bf16.gmra.mrb[36].mxu1 %v1120_v40  ;;  %5187 = vmatmul.mubr.msk.bf16.vlgmr.msra.gmra.mrb[64].mxu0 %vm170_vm0, %v1090_v53  ;;  %v1126_v53 = vpack.c.bf16 %v7018_v49, %v7011_v15  ;;  %v5910_v40 = vld [vmem:[%s9056_s2 + $0x8] sm:$0xff]   ;;  %v5620_v15 = vpop.permute.xlu1 %5619 }
 0x138   : > { %1756 = vmatprep.mubr.bf16.mxu1 %v7317_v43  ;;  %5190 = vmatprep.mubr.msk.bf16.mxu0 %vm170_vm0, %v1094_v51  ;;  %v9350_v43 = vld [vmem:[#allocation29_spill] sm:$0xff]  ;;  %v9358_v51 = vld [vmem:[#allocation39_spill] sm:$0xff]  ;;  %v5621_v35 = vunpack.i.l.bf16 %v5620_v15 }
 0x139   : > { %v1067_v17 = vsel %vm170_vm0, %v9350_v43, %v5591_v20  ;;  %5220 = vmatprep.subr.bf16.mxu1 %v5910_v40  ;;  %v1074_v61 = vsel %vm170_vm0, %v9358_v51, %v5612_v30  ;;  %v9359_v49 = vld [vmem:[#allocation41_spill] sm:$0xff]  ;;  %v9361_v43 = vld [vmem:[#allocation44_spill] sm:$0xff] }
 0x13a   : > { %v1128_v29 = vpack.c.bf16 %v1068_v56, %v1067_v17  ;;  %v1079_v38 = vsel %vm170_vm0, %v9359_v49, %v5616_v0  ;;  %5221 = vmatpush3.bf16.msra.mxu1 %v5910_v40  ;;  %v1075_v17 = vsel %vm170_vm0, %v9361_v43, %v5621_v35 }
 0x13b   : > { %v1145_v20 = vpack.c.bf16 %v1080_v23, %v1079_v38 }
 0x13f   : > { %1757 = vmatmul.mubr.bf16.gmra.mrb[40].mxu1 %v1124_v5  ;;  %5191 = vmatmul.mubr.msk.bf16.gmra.mrb[68].mxu0 %vm170_vm0, %v1098_v41  ;;  %v1130_v5 = vpack.c.bf16 %v7040_v16, %v7028_v22  ;;  %v5622_v41 = vunpack.i.h.bf16 %v5620_v15  ;;  %v1138_v22 = vpack.c.bf16 %v7094_v57, %v7089_v28  ;;  %v9363_v16 = vld [vmem:[#allocation43_spill] sm:$0xff] }
 0x140   : > { %1764 = vmatprep.mubr.bf16.mxu1 %v7338_v9  ;;  %5194 = vmatprep.mubr.msk.bf16.mxu0 %vm170_vm0, %v1102_v31  ;;  %v9353_v9 = vld [vmem:[#allocation31_spill] sm:$0xff]  ;;  %v1134_v31 = vpack.c.bf16 %v7054_v36, %v7047_v10  ;;  %v972_v10 = vrot.slane %v9359_v49, 2  ;;  %v973_v36 = vrot.slane %v9360_v58, 2 }
 0x141   : > { %v1069_v54 = vsel %vm170_vm0, %v9353_v9, %v5596_v11  ;;  %v1076_v56 = vsel %vm170_vm0, %v9362_v24, %v5622_v41 }
 0x142   : > { %v1132_v48 = vpack.c.bf16 %v1070_v27, %v1069_v54  ;;  %v1144_v3 = vpack.c.bf16 %v1076_v56, %v1075_v17  ;;  %v974_v63 = vsel %vm602_vm3, %v972_v10, %v973_v36 }
 0x147   : > { %1765 = vmatmul.mubr.bf16.gmra.mrb[44].mxu1 %v1128_v29  ;;  %5195 = vmatmul.mubr.msk.bf16.gmra.mrb[72].mxu0 %vm170_vm0, %v1106_v6  ;;  %v975_v29 = vrot.slane %v9363_v16, 2  ;;  %v9364_v6 = vld [vmem:[#allocation37_spill] sm:$0xff] }
 0x148   : > { %1772 = vmatprep.mubr.bf16.mxu1 %v1133_v21  ;;  %5198 = vmatprep.mubr.msk.bf16.mxu0 %vm170_vm0, %v1110_v2  ;;  %v5607_v21 = vunpack.i.h.bf16 %v5605_v52  ;;  %v9366_v11 = vpack.c.bf16 %v9364_v6, %v9365_v7 }
 0x149   : > { %v976_v2 = vsel %vm602_vm3, %v973_v36, %v975_v29 }
 0x14a   : > { %v1078_v37 = vsel %vm170_vm0, %v5983_v55, %v5607_v21  ;;  %v1146_v9 = vpack.c.bf16 %v976_v2, %v974_v63 }
 0x14b   : > { %v1141_v25 = vpack.c.bf16 %v1078_v37, %v1077_v42 }
 0x14f   : > { %1773 = vmatmul.mubr.bf16.gmra.mrb[48].mxu1 %v1132_v48  ;;  %5199 = vmatmul.mubr.msk.bf16.gmra.mrb[76].mxu0 %vm170_vm0, %v1114_v60 }
 0x150   : > { %1780 = vmatprep.mubr.bf16.mxu1 %v1137_v44  ;;  %5202 = vmatprep.mubr.msk.bf16.mxu0 %vm170_vm0, %v1118_v14  ;;  %v1122_v44 = vpack.c.bf16 %v7004_v47, %v6997_v33  ;;  %v9357_v33 = vld [vmem:[#allocation38_spill] sm:$0xff] }
 0x151   : > { %v1073_v47 = vsel %vm170_vm0, %v9357_v33, %v5611_v46 }
 0x152   : > { %v1140_v4 = vpack.c.bf16 %v1074_v61, %v1073_v47 }
 0x157   : > { %1781 = vmatmul.mubr.bf16.gmra.mrb[52].mxu1 %v1136_v62  ;;  %5203 = vmatmul.mubr.msk.bf16.gmra.mrb[80].mxu0 %vm170_vm0, %v1122_v44 }
 0x158   : > { %1788 = vmatprep.mubr.bf16.mxu1 %v1141_v25  ;;  %5206 = vmatprep.mubr.msk.bf16.mxu0 %vm170_vm0, %v1126_v53 }
 0x15f   : > { %1789 = vmatmul.mubr.bf16.gmra.mrb[56].mxu1 %v1140_v4  ;;  %5207 = vmatmul.mubr.msk.bf16.gmra.mrb[84].mxu0 %vm170_vm0, %v1130_v5 }
 0x160   : > { %1796 = vmatprep.mubr.bf16.mxu1 %v1145_v20  ;;  %5210 = vmatprep.mubr.msk.bf16.mxu0 %vm170_vm0, %v1134_v31 }
 0x167   : > { %1797 = vmatmul.mubr.bf16.gmra.mrb[60].mxu1 %v1144_v3  ;;  %5211 = vmatmul.mubr.msk.bf16.gmra.mrb[88].mxu0 %vm170_vm0, %v1138_v22 }
 0x168   : > { %5214 = vmatprep.mubr.msk.bf16.mxu0 %vm170_vm0, %v9366_v11 }
 0x16f   : > { %5215 = vmatmul.mubr.msk.bf16.gmra.mrb[92].mxu0 %vm170_vm0, %v1146_v9 }
 0x18a   : > { %v4670_v28 = vpop.f32.mrb[0].mxu0 }
 0x18b   : > { %v4671_v57 = vpop.f32.mrb[1].mxu0 }
 0x18c   : > { %v4672_v54 = vadd.f32 %v4671_v57, %v4670_v28  ;;  %v4673_v19 = vpop.f32.mrb[2].mxu0 }
 0x18d   : > { %v4674_v27 = vpop.f32.mrb[3].mxu0 }
 0x18e   : > { %v4675_v45 = vadd.f32 %v4674_v27, %v4673_v19 }
 0x192   : > { %v4676_v52 = vpop.f32.mrb[4].mxu0 }
 0x193   : > { %v4677_v48 = vpop.f32.mrb[5].mxu0 }
 0x194   : > { %v4678_v60 = vadd.f32 %v4677_v48, %v4676_v52  ;;  %v4679_v8 = vpop.f32.mrb[6].mxu0 }
 0x195   : > { %v4680_v18 = vpop.f32.mrb[7].mxu0 }
 0x196   : > { %v4681_v14 = vadd.f32 %v4680_v18, %v4679_v8 }
 0x19a   : > { %v4682_v21 = vpop.f32.mrb[8].mxu0 }
 0x19b   : > { %v4683_v1 = vpop.f32.mrb[9].mxu0 }
 0x19c   : > { %v7456_v26 = vadd.f32 %v4683_v1, %v4682_v21  ;;  %v4685_v50 = vpop.f32.mrb[10].mxu0 }
 0x19d   : > { %v4686_v32 = vpop.f32.mrb[11].mxu0 }
 0x19e   : > { %v7458_v34 = vadd.f32 %v4686_v32, %v4685_v50 }
 0x1a2   : > { %v4688_v12 = vpop.f32.mrb[12].mxu0 }
 0x1a3   : > { %v4689_v59 = vpop.f32.mrb[13].mxu0 }
 0x1a4   : > { %v7460_v42 = vadd.f32 %v4689_v59, %v4688_v12  ;;  %v4691_v55 = vpop.f32.mrb[14].mxu0 }
 0x1a5   : > { %v4692_v37 = vpop.f32.mrb[15].mxu0 }
 0x1a6   : > { %v7462_v39 = vadd.f32 %v4692_v37, %v4691_v55 }
 0x1aa   : > { %v4694_v62 = vpop.f32.mrb[16].mxu0 }
 0x1ab   : > { %v4695_v44 = vpop.f32.mrb[17].mxu0 }
 0x1ac   : > { %v7464_v30 = vadd.f32 %v4695_v44, %v4694_v62  ;;  %v4697_v46 = vpop.f32.mrb[18].mxu0 }
 0x1ad   : > { %v4698_v25 = vpop.f32.mrb[19].mxu0 }
 0x1ae   : > { %v7466_v53 = vadd.f32 %v4698_v25, %v4697_v46 }
 0x1b2   : > { %v4700_v40 = vpop.f32.mrb[20].mxu0 }
 0x1b3   : > { %v4701_v13 = vpop.f32.mrb[21].mxu0 }
 0x1b4   : > { %v7468_v0 = vadd.f32 %v4701_v13, %v4700_v40  ;;  %v4703_v33 = vpop.f32.mrb[22].mxu0 }
 0x1b5   : > { %v4704_v47 = vpop.f32.mrb[23].mxu0 }
 0x1b6   : > { %v7470_v51 = vadd.f32 %v4704_v47, %v4703_v33 }
 0x1ba   : > { %v4706_v61 = vpop.f32.mrb[24].mxu0 }
 0x1bb   : > { %v4707_v15 = vpop.f32.mrb[25].mxu0 }
 0x1bc   : > { %v7472_v49 = vadd.f32 %v4707_v15, %v4706_v61  ;;  %v4709_v38 = vpop.f32.mrb[26].mxu0 }
 0x1bd   : > { %v4710_v58 = vpop.f32.mrb[27].mxu0 }
 0x1be   : > { %v7474_v23 = vadd.f32 %v4710_v58, %v4709_v38 }
 0x1c2   : > { %v4712_v4 = vpop.f32.mrb[28].mxu0  ;;  %v4782_v5 = vpop.f32.mrb[0].mxu1 }
 0x1c3   : > { %v4713_v41 = vpop.f32.mrb[29].mxu0  ;;  %v4783_v35 = vpop.f32.mrb[1].mxu1 }
 0x1c4   : > { %v7476_v20 = vadd.f32 %v4713_v41, %v4712_v4  ;;  %v4784_v31 = vadd.f32 %v4783_v35, %v4782_v5  ;;  %v4715_v43 = vpop.f32.mrb[30].mxu0  ;;  %v4785_v17 = vpop.f32.mrb[2].mxu1 }
 0x1c5   : > { %v4716_v24 = vpop.f32.mrb[31].mxu0  ;;  %v4786_v56 = vpop.f32.mrb[3].mxu1 }
 0x1c6   : > { %v7478_v3 = vadd.f32 %v4716_v24, %v4715_v43  ;;  %v4787_v22 = vadd.f32 %v4786_v56, %v4785_v17  ;;  %v7480_v16 = vadd.f32 %v4784_v31, %v4672_v54 }
 0x1c8   : > { %v7482_v29 = vadd.f32 %v4787_v22, %v4675_v45 }
 0x1ca   : > { %v4718_v10 = vpop.f32.mrb[32].mxu0  ;;  %v4788_v36 = vpop.f32.mrb[4].mxu1 }
 0x1cb   : > { %v4719_v6 = vpop.f32.mrb[33].mxu0  ;;  %v4789_v7 = vpop.f32.mrb[5].mxu1 }
 0x1cc   : > { %v7484_v11 = vadd.f32 %v4719_v6, %v4718_v10  ;;  %v4790_v63 = vadd.f32 %v4789_v7, %v4788_v36  ;;  %v4721_v2 = vpop.f32.mrb[34].mxu0  ;;  %v4791_v9 = vpop.f32.mrb[6].mxu1 }
 0x1cd   : > { %v4722_v28 = vpop.f32.mrb[35].mxu0  ;;  %v4792_v57 = vpop.f32.mrb[7].mxu1 }
 0x1ce   : > { %v7486_v19 = vadd.f32 %v4722_v28, %v4721_v2  ;;  %v4793_v27 = vadd.f32 %v4792_v57, %v4791_v9  ;;  %v7488_v52 = vadd.f32 %v4790_v63, %v4678_v60 }
 0x1d0   : > { %v7490_v54 = vadd.f32 %v4793_v27, %v4681_v14 }
 0x1d2   : > { %v4724_v45 = vpop.f32.mrb[36].mxu0  ;;  %v4794_v48 = vpop.f32.mrb[8].mxu1 }
 0x1d3   : > { %v4725_v8 = vpop.f32.mrb[37].mxu0  ;;  %v4795_v18 = vpop.f32.mrb[9].mxu1 }
 0x1d4   : > { %v7492_v21 = vadd.f32 %v4725_v8, %v4724_v45  ;;  %v4796_v1 = vadd.f32 %v4795_v18, %v4794_v48  ;;  %v4727_v50 = vpop.f32.mrb[38].mxu0  ;;  %v4797_v32 = vpop.f32.mrb[10].mxu1 }
 0x1d5   : > { %v4728_v12 = vpop.f32.mrb[39].mxu0  ;;  %v4798_v59 = vpop.f32.mrb[11].mxu1 }
 0x1d6   : > { %v7494_v55 = vadd.f32 %v4728_v12, %v4727_v50  ;;  %v4799_v37 = vadd.f32 %v4798_v59, %v4797_v32  ;;  %v7497_v62 = vadd.f32 %v4796_v1, %v7456_v26 }
 0x1d8   : > { %v7500_v60 = vadd.f32 %v4799_v37, %v7458_v34 }
 0x1da   : > { %v4730_v14 = vpop.f32.mrb[40].mxu0  ;;  %v4800_v44 = vpop.f32.mrb[12].mxu1 }
 0x1db   : > { %v4731_v46 = vpop.f32.mrb[41].mxu0  ;;  %v4801_v25 = vpop.f32.mrb[13].mxu1 }
 0x1dc   : > { %v7502_v40 = vadd.f32 %v4731_v46, %v4730_v14  ;;  %v4802_v13 = vadd.f32 %v4801_v25, %v4800_v44  ;;  %v4733_v33 = vpop.f32.mrb[42].mxu0  ;;  %v4803_v47 = vpop.f32.mrb[14].mxu1 }
 0x1dd   : > { %v4734_v61 = vpop.f32.mrb[43].mxu0  ;;  %v4804_v15 = vpop.f32.mrb[15].mxu1 }
 0x1de   : > { %v7504_v38 = vadd.f32 %v4734_v61, %v4733_v33  ;;  %v4805_v58 = vadd.f32 %v4804_v15, %v4803_v47  ;;  %v7507_v26 = vadd.f32 %v4802_v13, %v7460_v42 }
 0x1e0   : > { %v7510_v34 = vadd.f32 %v4805_v58, %v7462_v39 }
 0x1e2   : > { %v4736_v4 = vpop.f32.mrb[44].mxu0  ;;  %v4806_v5 = vpop.f32.mrb[16].mxu1 }
 0x1e3   : > { %v4737_v41 = vpop.f32.mrb[45].mxu0  ;;  %v4807_v35 = vpop.f32.mrb[17].mxu1 }
 0x1e4   : > { %v7512_v31 = vadd.f32 %v4737_v41, %v4736_v4  ;;  %v4808_v43 = vadd.f32 %v4807_v35, %v4806_v5  ;;  %v4739_v17 = vpop.f32.mrb[46].mxu0  ;;  %v4809_v24 = vpop.f32.mrb[18].mxu1 }
 0x1e5   : > { %v4740_v56 = vpop.f32.mrb[47].mxu0  ;;  %v4810_v22 = vpop.f32.mrb[19].mxu1 }
 0x1e6   : > { %v7514_v10 = vadd.f32 %v4740_v56, %v4739_v17  ;;  %v4811_v36 = vadd.f32 %v4810_v22, %v4809_v24  ;;  %v7517_v42 = vadd.f32 %v4808_v43, %v7464_v30 }
 0x1e8   : > { %v7520_v39 = vadd.f32 %v4811_v36, %v7466_v53 }
 0x1ea   : > { %v4742_v6 = vpop.f32.mrb[48].mxu0  ;;  %v4812_v7 = vpop.f32.mrb[20].mxu1 }
 0x1eb   : > { %v4743_v63 = vpop.f32.mrb[49].mxu0  ;;  %v4813_v2 = vpop.f32.mrb[21].mxu1 }
 0x1ec   : > { %v7522_v9 = vadd.f32 %v4743_v63, %v4742_v6  ;;  %v4814_v28 = vadd.f32 %v4813_v2, %v4812_v7  ;;  %v4745_v57 = vpop.f32.mrb[50].mxu0  ;;  %v4815_v27 = vpop.f32.mrb[22].mxu1 }
 0x1ed   : > { %v4746_v45 = vpop.f32.mrb[51].mxu0  ;;  %v4816_v48 = vpop.f32.mrb[23].mxu1 }
 0x1ee   : > { %v7524_v8 = vadd.f32 %v4746_v45, %v4745_v57  ;;  %v4817_v18 = vadd.f32 %v4816_v48, %v4815_v27  ;;  %v7527_v30 = vadd.f32 %v4814_v28, %v7468_v0 }
 0x1f0   : > { %v7530_v53 = vadd.f32 %v4817_v18, %v7470_v51 }
 0x1f2   : > { %v4748_v1 = vpop.f32.mrb[52].mxu0  ;;  %v4818_v50 = vpop.f32.mrb[24].mxu1 }
 0x1f3   : > { %v4749_v32 = vpop.f32.mrb[53].mxu0  ;;  %v4819_v12 = vpop.f32.mrb[25].mxu1 }
 0x1f4   : > { %v7532_v59 = vadd.f32 %v4749_v32, %v4748_v1  ;;  %v4820_v37 = vadd.f32 %v4819_v12, %v4818_v50  ;;  %v4751_v14 = vpop.f32.mrb[54].mxu0  ;;  %v4821_v44 = vpop.f32.mrb[26].mxu1 }
 0x1f5   : > { %v4752_v46 = vpop.f32.mrb[55].mxu0  ;;  %v4822_v25 = vpop.f32.mrb[27].mxu1 }
 0x1f6   : > { %v7534_v13 = vadd.f32 %v4752_v46, %v4751_v14  ;;  %v4823_v33 = vadd.f32 %v4822_v25, %v4821_v44  ;;  %v7537_v0 = vadd.f32 %v4820_v37, %v7472_v49 }
 0x1f8   : > { %v7540_v51 = vadd.f32 %v4823_v33, %v7474_v23 }
 0x1fa   : > { %v4754_v47 = vpop.f32.mrb[56].mxu0  ;;  %v4824_v61 = vpop.f32.mrb[28].mxu1 }
 0x1fb   : > { %v4755_v15 = vpop.f32.mrb[57].mxu0  ;;  %v4825_v58 = vpop.f32.mrb[29].mxu1 }
 0x1fc   : > { %v7542_v4 = vadd.f32 %v4755_v15, %v4754_v47  ;;  %v4826_v5 = vadd.f32 %v4825_v58, %v4824_v61  ;;  %v4757_v41 = vpop.f32.mrb[58].mxu0  ;;  %v4827_v35 = vpop.f32.mrb[30].mxu1 }
 0x1fd   : > { %v4758_v43 = vpop.f32.mrb[59].mxu0  ;;  %v4828_v17 = vpop.f32.mrb[31].mxu1 }
 0x1fe   : > { %v7544_v24 = vadd.f32 %v4758_v43, %v4757_v41  ;;  %v4829_v56 = vadd.f32 %v4828_v17, %v4827_v35  ;;  %v7547_v49 = vadd.f32 %v4826_v5, %v7476_v20 }
 0x200   : > { %v7550_v23 = vadd.f32 %v4829_v56, %v7478_v3 }
 0x202   : > { %v4760_v22 = vpop.f32.mrb[60].mxu0  ;;  %v4830_v36 = vpop.f32.mrb[32].mxu1 }
 0x203   : > { %v4761_v6 = vpop.f32.mrb[61].mxu0  ;;  %v4831_v7 = vpop.f32.mrb[33].mxu1 }
 0x204   : > { %v7552_v63 = vadd.f32 %v4761_v6, %v4760_v22  ;;  %v4832_v2 = vadd.f32 %v4831_v7, %v4830_v36  ;;  %v4763_v28 = vpop.f32.mrb[62].mxu0  ;;  %v4833_v57 = vpop.f32.mrb[34].mxu1 }
 0x205   : > { %v4764_v27 = vpop.f32.mrb[63].mxu0  ;;  %v4834_v45 = vpop.f32.mrb[35].mxu1 }
 0x206   : > { %v7554_v48 = vadd.f32 %v4764_v27, %v4763_v28  ;;  %v4835_v18 = vadd.f32 %v4834_v45, %v4833_v57  ;;  %v7557_v20 = vadd.f32 %v4832_v2, %v7484_v11 }
 0x208   : > { %v7560_v3 = vadd.f32 %v4835_v18, %v7486_v19 }
 0x20a   : > { %v4836_v1 = vpop.f32.mrb[36].mxu1  ;;  %v5188_v50 = vpop.f32.mrb[64].mxu0 }
 0x20b   : > { %v1848_v32 = vadd.f32 %v5188_v50, %v7488_v52  ;;  %v4837_v12 = vpop.f32.mrb[37].mxu1  ;;  %v1839_v37 = vpop.f32.mrb[65].mxu0 }
 0x20c   : > { %v4838_v14 = vadd.f32 %v4837_v12, %v4836_v1  ;;  %v1840_v44 = vadd.f32 %v1839_v37, %v7480_v16  ;;  %v4839_v46 = vpop.f32.mrb[38].mxu1  ;;  %v5189_v25 = vpop.f32.mrb[66].mxu0 }
 0x20d   : > { %v1851_v33 = vadd.f32 %v5189_v25, %v7490_v54  ;;  %v4840_v47 = vpop.f32.mrb[39].mxu1  ;;  %v1842_v61 = vpop.f32.mrb[67].mxu0  ;;  %v1968_v58 = vmax.f32 %v1848_v32, 0.0 }
 0x20e   : > { %v4841_v11 = vadd.f32 %v4840_v47, %v4839_v46  ;;  %v1843_v15 = vadd.f32 %v1842_v61, %v7482_v29  ;;  %v7567_v19 = vadd.f32 %v4838_v14, %v7492_v21  ;;  %v1966_v52 = vmax.f32 %v1840_v44, 0.0 }
 0x20f   : > { %v1969_v5 = vmax.f32 %v1851_v33, 0.0 }
 0x210   : > { %v1967_v41 = vmax.f32 %v1843_v15, 0.0  ;;  %v7570_v35 = vadd.f32 %v4841_v11, %v7494_v55 }
 0x211   : > { %v1999_v16 = vpack.c.bf16 %v1969_v5, %v1968_v58 }
 0x212   : > { %v1998_v43 = vpack.c.bf16 %v1967_v41, %v1966_v52  ;;  %v4842_v17 = vpop.f32.mrb[40].mxu1  ;;  %v5192_v54 = vpop.f32.mrb[68].mxu0 }
 0x213   : > { %v1864_v56 = vadd.f32 %v5192_v54, %v7507_v26  ;;  %v4843_v22 = vpop.f32.mrb[41].mxu1  ;;  %v1855_v36 = vpop.f32.mrb[69].mxu0 }
 0x214   : > { %v4844_v29 = vadd.f32 %v4843_v22, %v4842_v17  ;;  %v1856_v21 = vadd.f32 %v1855_v36, %v7497_v62  ;;  %v4845_v6 = vpop.f32.mrb[42].mxu1  ;;  %v5193_v7 = vpop.f32.mrb[70].mxu0  ;;  %5222 = vmatprep.mubr.msk.bf16.mxu1 %vm2030_vm4, %v1998_v43 }
 0x215   : > { %v1867_v2 = vadd.f32 %v5193_v7, %v7510_v34  ;;  %v4846_v55 = vpop.f32.mrb[43].mxu1  ;;  %v1858_v28 = vpop.f32.mrb[71].mxu0  ;;  %5223 = vmatmul.mubr.msk.bf16.vlgmr.msra.gmra.mrb[64].mxu1 %vm2030_vm4, %v1999_v16  ;;  %v1972_v45 = vmax.f32 %v1864_v56, 0.0 }
 0x216   : > { %v4847_v57 = vadd.f32 %v4846_v55, %v4845_v6  ;;  %v1859_v27 = vadd.f32 %v1858_v28, %v7500_v60  ;;  %v7579_v26 = vadd.f32 %v4844_v29, %v7502_v40  ;;  %v1970_v1 = vmax.f32 %v1856_v21, 0.0 }
 0x217   : > { %v1973_v18 = vmax.f32 %v1867_v2, 0.0 }
 0x218   : > { %v1971_v62 = vmax.f32 %v1859_v27, 0.0  ;;  %v7582_v50 = vadd.f32 %v4847_v57, %v7504_v38 }
 0x219   : > { %v2001_v32 = vpack.c.bf16 %v1973_v18, %v1972_v45 }
 0x21a   : > { %v2000_v12 = vpack.c.bf16 %v1971_v62, %v1970_v1  ;;  %v4848_v34 = vpop.f32.mrb[44].mxu1  ;;  %v5196_v37 = vpop.f32.mrb[72].mxu0 }
 0x21b   : > { %v1880_v14 = vadd.f32 %v5196_v37, %v7527_v30  ;;  %v4849_v44 = vpop.f32.mrb[45].mxu1  ;;  %v1871_v46 = vpop.f32.mrb[73].mxu0 }
 0x21c   : > { %v4850_v25 = vadd.f32 %v4849_v44, %v4848_v34  ;;  %v1872_v60 = vadd.f32 %v1871_v46, %v7517_v42  ;;  %v4851_v40 = vpop.f32.mrb[46].mxu1  ;;  %v5197_v33 = vpop.f32.mrb[74].mxu0  ;;  %5226 = vmatprep.mubr.msk.bf16.mxu1 %vm2030_vm4, %v2000_v12 }
 0x21d   : > { %v1883_v47 = vadd.f32 %v5197_v33, %v7530_v53  ;;  %v4852_v61 = vpop.f32.mrb[47].mxu1  ;;  %v1874_v38 = vpop.f32.mrb[75].mxu0  ;;  %5227 = vmatmul.mubr.msk.bf16.gmra.mrb[68].mxu1 %vm2030_vm4, %v2001_v32  ;;  %v1976_v58 = vmax.f32 %v1880_v14, 0.0 }
 0x21e   : > { %v4853_v11 = vadd.f32 %v4852_v61, %v4851_v40  ;;  %v1875_v15 = vadd.f32 %v1874_v38, %v7520_v39  ;;  %v1767_v30 = vadd.f32 %v4850_v25, %v7512_v31  ;;  %v1974_v52 = vmax.f32 %v1872_v60, 0.0 }
 0x21f   : > { %v1977_v5 = vmax.f32 %v1883_v47, 0.0 }
 0x220   : > { %v1975_v41 = vmax.f32 %v1875_v15, 0.0  ;;  %v1770_v42 = vadd.f32 %v4853_v11, %v7514_v10 }
 0x221   : > { %v2003_v16 = vpack.c.bf16 %v1977_v5, %v1976_v58 }
 0x222   : > { %v2002_v43 = vpack.c.bf16 %v1975_v41, %v1974_v52  ;;  %v4854_v17 = vpop.f32.mrb[48].mxu1  ;;  %v5200_v54 = vpop.f32.mrb[76].mxu0 }
 0x223   : > { %v1896_v53 = vadd.f32 %v5200_v54, %v7547_v49  ;;  %v4855_v56 = vpop.f32.mrb[49].mxu1  ;;  %v1887_v22 = vpop.f32.mrb[77].mxu0 }
 0x224   : > { %v4856_v36 = vadd.f32 %v4855_v56, %v4854_v17  ;;  %v1888_v29 = vadd.f32 %v1887_v22, %v7537_v0  ;;  %v4857_v39 = vpop.f32.mrb[50].mxu1  ;;  %v5201_v21 = vpop.f32.mrb[78].mxu0  ;;  %5230 = vmatprep.mubr.msk.bf16.mxu1 %vm2030_vm4, %v2002_v43 }
 0x225   : > { %v1899_v31 = vadd.f32 %v5201_v21, %v7550_v23  ;;  %v4858_v6 = vpop.f32.mrb[51].mxu1  ;;  %v1890_v7 = vpop.f32.mrb[79].mxu0  ;;  %5231 = vmatmul.mubr.msk.bf16.gmra.mrb[72].mxu1 %vm2030_vm4, %v2003_v16  ;;  %v1980_v55 = vmax.f32 %v1896_v53, 0.0 }
 0x226   : > { %v4859_v10 = vadd.f32 %v4858_v6, %v4857_v39  ;;  %v1891_v2 = vadd.f32 %v1890_v7, %v7540_v51  ;;  %v1775_v49 = vadd.f32 %v4856_v36, %v7522_v9  ;;  %v1978_v57 = vmax.f32 %v1888_v29, 0.0 }
 0x227   : > { %v1981_v28 = vmax.f32 %v1899_v31, 0.0 }
 0x228   : > { %v1979_v27 = vmax.f32 %v1891_v2, 0.0  ;;  %v7600_v0 = vadd.f32 %v4859_v10, %v7524_v8 }
 0x229   : > { %v2005_v45 = vpack.c.bf16 %v1981_v28, %v1980_v55 }
 0x22a   : > { %v2004_v18 = vpack.c.bf16 %v1979_v27, %v1978_v57  ;;  %v4860_v1 = vpop.f32.mrb[52].mxu1  ;;  %v5204_v23 = vpop.f32.mrb[80].mxu0 }
 0x22b   : > { %v1912_v62 = vadd.f32 %v5204_v23, %v7567_v19  ;;  %v4861_v32 = vpop.f32.mrb[53].mxu1  ;;  %v1903_v12 = vpop.f32.mrb[81].mxu0 }
 0x22c   : > { %v4862_v34 = vadd.f32 %v4861_v32, %v4860_v1  ;;  %v1904_v51 = vadd.f32 %v1903_v12, %v7557_v20  ;;  %v4863_v37 = vpop.f32.mrb[54].mxu1  ;;  %v5205_v9 = vpop.f32.mrb[82].mxu0  ;;  %5234 = vmatprep.mubr.msk.bf16.mxu1 %vm2030_vm4, %v2004_v18 }
 0x22d   : > { %v1915_v14 = vadd.f32 %v5205_v9, %v7570_v35  ;;  %v4864_v44 = vpop.f32.mrb[55].mxu1  ;;  %v1906_v8 = vpop.f32.mrb[83].mxu0  ;;  %5235 = vmatmul.mubr.msk.bf16.gmra.mrb[76].mxu1 %vm2030_vm4, %v2005_v45  ;;  %v1984_v60 = vmax.f32 %v1912_v62, 0.0 }
 0x22e   : > { %v4865_v46 = vadd.f32 %v4864_v44, %v4863_v37  ;;  %v1907_v25 = vadd.f32 %v1906_v8, %v7560_v3  ;;  %v1783_v19 = vadd.f32 %v4862_v34, %v7532_v59  ;;  %v1982_v33 = vmax.f32 %v1904_v51, 0.0 }
 0x22f   : > { %v1985_v40 = vmax.f32 %v1915_v14, 0.0 }
 0x230   : > { %v1983_v47 = vmax.f32 %v1907_v25, 0.0  ;;  %v1786_v20 = vadd.f32 %v4865_v46, %v7534_v13 }
 0x231   : > { %v2007_v61 = vpack.c.bf16 %v1985_v40, %v1984_v60  ;;  %v2336_v40 = vld [vmem:[#allocation2] sm:$0xff] }
 0x232   : > { %v2006_v38 = vpack.c.bf16 %v1983_v47, %v1982_v33  ;;  %v4866_v11 = vpop.f32.mrb[56].mxu1  ;;  %v5208_v15 = vpop.f32.mrb[84].mxu0  ;;  %v2337_v33 = vld [vmem:[#allocation2 + $0x8] sm:$0xff]  ;;  %v2338_v47 = vld [vmem:[#allocation2 + $0x10] sm:$0x3] }
 0x233   : > { %v1928_v35 = vadd.f32 %v5208_v15, %v1767_v30  ;;  %v4867_v58 = vpop.f32.mrb[57].mxu1  ;;  %v1919_v5 = vpop.f32.mrb[85].mxu0 }
 0x234   : > { %v4868_v52 = vadd.f32 %v4867_v58, %v4866_v11  ;;  %v1920_v41 = vadd.f32 %v1919_v5, %v7579_v26  ;;  %v4869_v16 = vpop.f32.mrb[58].mxu1  ;;  %v5209_v3 = vpop.f32.mrb[86].mxu0  ;;  %5238 = vmatprep.mubr.msk.bf16.mxu1 %vm2030_vm4, %v2006_v38  ;;  %v2441_v38 = vrot.slane %v2338_v47, 1  ;;  %v5911_v58 = vld [vmem:[%s9055_s1 + $0x160] sm:$0xff]  }
 0x235   : > { %v1931_v59 = vadd.f32 %v5209_v3, %v1770_v42  ;;  %v4870_v43 = vpop.f32.mrb[59].mxu1  ;;  %v1922_v17 = vpop.f32.mrb[87].mxu0  ;;  %5239 = vmatmul.mubr.msk.bf16.gmra.mrb[80].mxu1 %vm2030_vm4, %v2007_v61  ;;  %v1988_v30 = vmax.f32 %v1928_v35, 0.0  ;;  %v2439_v61 = vrot.slane %v2337_v33, 1  ;;  %4916 = vmatprep.subr.bf16.mxu0 %v5911_v58  ;;  %v5912_v5 = vld [vmem:[%s9055_s1 + $0x120] sm:$0xff]   ;;  %v5916_v3 = vld [vmem:[%s9055_s1 + $0x130] sm:$0xff]  }
 0x236   : > { %v4871_v13 = vadd.f32 %v4870_v43, %v4869_v16  ;;  %v1923_v54 = vadd.f32 %v1922_v17, %v7582_v50  ;;  %v1791_v53 = vadd.f32 %v4868_v52, %v7542_v4  ;;  %v1986_v22 = vmax.f32 %v1920_v41, 0.0  ;;  %4917 = vmatpush3.bf16.msra.mxu0 %v5912_v5  ;;  %v5913_v52 = vld [vmem:[%s9055_s1 + $0x168] sm:$0xff]   ;;  %v5915_v16 = vld [vmem:[%s9055_s1 + $0x170] sm:$0xff]   ;;  %v5918_v43 = vld [vmem:[%s9055_s1 + $0x138] sm:$0xff]  }
 0x237   : > { %v1989_v56 = vmax.f32 %v1931_v59, 0.0  ;;  %v2442_v15 = vsel %vm425_vm2, %v2439_v61, %v2441_v38  ;;  %4918 = vmatprep.subr.bf16.mxu0 %v5913_v52  ;;  %v5914_v41 = vld [vmem:[%s9055_s1 + $0x128] sm:$0xff]   ;;  %v5917_v59 = vld [vmem:[%s9055_s1 + $0x178] sm:$0xff]   ;;  %v5919_v17 = vld [vmem:[%s9055_s1 + $0x180] sm:$0xff]  }
 0x238   : > { %v1987_v36 = vmax.f32 %v1923_v54, 0.0  ;;  %v1794_v26 = vadd.f32 %v4871_v13, %v7544_v24  ;;  %v5920_v13 = vld [vmem:[%s9055_s1 + $0x140] sm:$0xff]   ;;  %v5921_v54 = vld [vmem:[%s9055_s1 + $0x188] sm:$0xff]   ;;  %v5992_v52 = vld [vmem:[%s6229_s9 + $0x50] sm:$0xff] }
 0x239   : > { %v2009_v29 = vpack.c.bf16 %v1989_v56, %v1988_v30  ;;  %v5923_v30 = vld [vmem:[%s9055_s1 + $0x190] sm:$0xff]   ;;  %v5930_v58 = vld [vmem:[%s9055_s1 + $0x1e8] sm:$0xff]  }
 0x23a   : > { %v2008_v39 = vpack.c.bf16 %v1987_v36, %v1986_v22  ;;  %v4872_v21 = vpop.f32.mrb[60].mxu1  ;;  %v5212_v31 = vpop.f32.mrb[88].mxu0  ;;  %4919 = vmatpush3.bf16.msra.mxu0 %v5914_v41  ;;  %v5924_v56 = vld [vmem:[%s9055_s1 + $0x150] sm:$0xff]   ;;  %v5925_v22 = vld [vmem:[%s9055_s1 + $0x198] sm:$0xff]   ;;  %v5931_v5 = vld [vmem:[%s9055_s1 + $0x1a8] sm:$0xff]  }
 0x23b   : > { %v1944_v42 = vadd.f32 %v5212_v31, %v1783_v19  ;;  %v4873_v6 = vpop.f32.mrb[61].mxu1  ;;  %v1935_v7 = vpop.f32.mrb[89].mxu0  ;;  %4920 = vmatprep.subr.bf16.mxu0 %v5915_v16  ;;  %v5926_v36 = vld [vmem:[%s9055_s1 + $0x158] sm:$0xff]   ;;  %v5985_v31 = vld [vmem:[%s6229_s9] sm:$0xff] }
 0x23c   : > { %v4874_v10 = vadd.f32 %v4873_v6, %v4872_v21  ;;  %v1936_v2 = vadd.f32 %v1935_v7, %v1775_v49  ;;  %v4875_v55 = vpop.f32.mrb[62].mxu1  ;;  %v5213_v28 = vpop.f32.mrb[90].mxu0  ;;  %5242 = vmatprep.mubr.msk.bf16.mxu1 %vm2030_vm4, %v2008_v39 }
 0x23d   : > { %v1947_v4 = vadd.f32 %v5213_v28, %v1786_v20  ;;  %v4876_v50 = vpop.f32.mrb[63].mxu1  ;;  %v1938_v57 = vpop.f32.mrb[91].mxu0  ;;  %5243 = vmatmul.mubr.msk.bf16.gmra.mrb[84].mxu1 %vm2030_vm4, %v2009_v29  ;;  %v1992_v18 = vmax.f32 %v1944_v42, 0.0  ;;  %v2438_v20 = vrot.slane %v2336_v40, 1  ;;  %v5984_v29 = vld [vmem:[%s6229_s9 + $0x10] sm:$0xff] }
 0x23e   : > { %v4877_v27 = vadd.f32 %v4876_v50, %v4875_v55  ;;  %v1939_v24 = vadd.f32 %v1938_v57, %v7600_v0  ;;  %v1799_v45 = vadd.f32 %v4874_v10, %v7552_v63  ;;  %v1990_v23 = vmax.f32 %v1936_v2, 0.0  ;;  %4921 = vmatpush3.bf16.msra.mxu0 %v5916_v3  ;;  %v5986_v10 = vld [vmem:[%s6229_s9 + $0x18] sm:$0xff]  ;;  %v5932_v3 = vld [vmem:[%s9055_s1 + $0x1f0] sm:$0xff]  }
 0x23f   : > { %v1993_v1 = vmax.f32 %v1947_v4, 0.0  ;;  %v2440_v11 = vsel %vm425_vm2, %v2438_v20, %v2439_v61  ;;  %4922 = vmatprep.subr.bf16.mxu0 %v5917_v59  ;;  %v5987_v4 = vld [vmem:[%s6229_s9 + $0x8] sm:$0xff]  ;;  %v5993_v59 = vld [vmem:[%s6229_s9 + $0x40] sm:$0xff] }
 0x240   : > { %v1991_v62 = vmax.f32 %v1939_v24, 0.0  ;;  %v1802_v49 = vadd.f32 %v4877_v27, %v7554_v48  ;;  %v5628_v35 = vpack.i.bf16 %v2442_v15, %v2440_v11  ;;  %v5927_v27 = vld [vmem:[%s9055_s1 + $0x1e0] sm:$0xff]  }
 0x241   : > { %v2011_v32 = vpack.c.bf16 %v1993_v1, %v1992_v18  ;;  %5028 = vmatprep.subr.bf16.mxu1 %v5927_v27  ;;  %v5928_v18 = vld [vmem:[%s9055_s1 + $0x1a0] sm:$0xff]   ;;  %v5988_v1 = vld [vmem:[%s6229_s9 + $0x30] sm:$0xff] }
 0x242   : > { %v2010_v12 = vpack.c.bf16 %v1991_v62, %v1990_v23  ;;  %v5216_v34 = vpop.f32.mrb[92].mxu0  ;;  %5629 = vrot.lane.b32.xlu1 %v5628_v35, %s6084_s17  ;;  %4923 = vmatpush3.bf16.msra.mxu0 %v5918_v43 }
 0x243   : > { %v1960_v51 = vadd.f32 %v5216_v34, %v1799_v45  ;;  %v1951_v37 = vpop.f32.mrb[93].mxu0  ;;  %4924 = vmatprep.subr.bf16.mxu0 %v5919_v17  ;;  %5029 = vmatpush3.bf16.msra.mxu1 %v5928_v18  ;;  %v7711_v34 = vld [vmem:[%s9055_s1 + $0x220] sm:$0xff]  }
 0x244   : > { %v1952_v9 = vadd.f32 %v1951_v37, %v1791_v53  ;;  %v5217_v14 = vpop.f32.mrb[94].mxu0  ;;  %5246 = vmatprep.mubr.msk.bf16.mxu1 %vm2030_vm4, %v2010_v12  ;;  %v5922_v53 = vld [vmem:[%s9055_s1 + $0x148] sm:$0xff]   ;;  %v5990_v37 = vld [vmem:[%s6229_s9 + $0x38] sm:$0xff]  ;;  %5030 = vmatprep.subr.bf16.mxu1 %v5930_v58 }
 0x245   : > { %v1963_v44 = vadd.f32 %v5217_v14, %v1802_v49  ;;  %v1954_v8 = vpop.f32.mrb[95].mxu0  ;;  %5247 = vmatmul.mubr.msk.bf16.gmra.mrb[88].mxu1 %vm2030_vm4, %v2011_v32  ;;  %v1996_v0 = vmax.f32 %v1960_v51, 0.0  ;;  %v5989_v49 = vld [vmem:[%s6229_s9 + $0x20] sm:$0xff] }
 0x246   : > { %v1955_v63 = vadd.f32 %v1954_v8, %v1794_v26  ;;  %v1994_v25 = vmax.f32 %v1952_v9, 0.0  ;;  %4925 = vmatpush3.bf16.msra.mxu0 %v5920_v13  ;;  %v5991_v8 = vld [vmem:[%s6229_s9 + $0x28] sm:$0xff] }
 0x247   : > { %v1997_v46 = vmax.f32 %v1963_v44, 0.0  ;;  %4926 = vmatprep.subr.bf16.mxu0 %v5921_v54  ;;  %5031 = vmatpush3.bf16.msra.mxu1 %v5931_v5 }
 0x248   : > { %v1995_v19 = vmax.f32 %v1955_v63, 0.0  ;;  %5032 = vmatprep.subr.bf16.mxu1 %v5932_v3  ;;  %v5998_v3 = vld [vmem:[%s6229_s9 + $0x78] sm:$0xff] }
 0x249   : > { %v2013_v60 = vpack.c.bf16 %v1997_v46, %v1996_v0 }
 0x24a   : > { %v2012_v48 = vpack.c.bf16 %v1995_v19, %v1994_v25  ;;  %4927 = vmatpush3.bf16.msra.mxu0 %v5922_v53 }
 0x24b   : > { %4928 = vmatprep.subr.bf16.mxu0 %v5923_v30 }
 0x24c   : > { %5250 = vmatprep.mubr.msk.bf16.mxu1 %vm2030_vm4, %v2012_v48 }
 0x24d   : > { %5251 = vmatmul.mubr.msk.bf16.gmra.mrb[92].mxu1 %vm2030_vm4, %v2013_v60 }
 0x24e   : > { %4929 = vmatpush3.bf16.msra.mxu0 %v5924_v56  ;;  %v5994_v56 = vld [vmem:[%s6229_s9 + $0x58] sm:$0xff] }
 0x24f   : > { %4930 = vmatprep.subr.bf16.mxu0 %v5925_v22 }
 0x252   : > { %4931 = vmatpush3.bf16.msra.mxu0 %v5926_v36 }
 0x253   : > { %5254 = vmatprep.subr.bf16.mxu0 %v7711_v34 }
 0x2e8   : > { %v5224_v26 = vpop.f32.mrb[64].mxu1 }
 0x2e9   : > { %v7677_v39 = vadd.f32 %v5984_v29, %v5224_v26  ;;  %v2113_v21 = vpop.f32.mrb[65].mxu1 }
 0x2ea   : > { %v7680_v42 = vadd.f32 %v5985_v31, %v2113_v21  ;;  %v5225_v6 = vpop.f32.mrb[66].mxu1  ;;  %v5995_v31 = vld [vmem:[%s6229_s9 + $0x48] sm:$0xff] }
 0x2eb   : > { %9367 = vst [vmem:[#allocation35_spill] sm:$0xff] %v7677_v39  ;;  %v2274_v7 = vmax.f32 %v7677_v39, 0.0  ;;  %v7684_v2 = vadd.f32 %v5986_v10, %v5225_v6  ;;  %v2116_v55 = vpop.f32.mrb[67].mxu1  ;;  %v6013_v39 = vld [vmem:[%s6229_s9 + $0xe0] sm:$0xff] }
 0x2ec   : > { %9368 = vst [vmem:[#allocation24_spill] sm:$0xff] %v7680_v42  ;;  %v2272_v28 = vmax.f32 %v7680_v42, 0.0  ;;  %v7688_v50 = vadd.f32 %v5987_v4, %v2116_v55  ;;  %v5933_v55 = vld [vmem:[%s9055_s1 + $0x1b0] sm:$0xff]  }
 0x2ed   : > { %9369 = vst [vmem:[#allocation6_spill] sm:$0xff] %v7684_v2  ;;  %2306 = vst.msk [vmem:[#allocation2 + $0x31] sm:$0xff] %vm170_vm0, %v2274_v7  ;;  %v2275_v57 = vmax.f32 %v7684_v2, 0.0  ;;  %5033 = vmatpush3.bf16.msra.mxu1 %v5933_v55 }
 0x2ee   : > { %9370 = vst [vmem:[#allocation7_spill] sm:$0xff] %v7688_v50  ;;  %2304 = vst.msk [vmem:[#allocation2 + $0x19] sm:$0xff] %vm170_vm0, %v2272_v28  ;;  %v2273_v24 = vmax.f32 %v7688_v50, 0.0 }
 0x2ef   : > { %2307 = vst.msk [vmem:[#allocation2 + $0x39] sm:$0xff] %vm170_vm0, %v2275_v57  ;;  %v5934_v57 = vld [vmem:[%s9055_s1 + $0x1f8] sm:$0xff]  }
 0x2f0   : > { %2305 = vst.msk [vmem:[#allocation2 + $0x21] sm:$0xff] %vm170_vm0, %v2273_v24  ;;  %v5228_v45 = vpop.f32.mrb[68].mxu1  ;;  %5034 = vmatprep.subr.bf16.mxu1 %v5934_v57 }
 0x2f1   : > { %v7703_v23 = vadd.f32 %v5988_v1, %v5228_v45  ;;  %v2129_v62 = vpop.f32.mrb[69].mxu1 }
 0x2f2   : > { %v7706_v32 = vadd.f32 %v5989_v49, %v2129_v62  ;;  %v5229_v12 = vpop.f32.mrb[70].mxu1 }
 0x2f3   : > { %9371 = vst [vmem:[#allocation8_spill] sm:$0xff] %v7703_v23  ;;  %v2278_v51 = vmax.f32 %v7703_v23, 0.0  ;;  %v7715_v9 = vadd.f32 %v5990_v37, %v5229_v12  ;;  %v2132_v14 = vpop.f32.mrb[71].mxu1  ;;  %v6009_v23 = vld [vmem:[%s6229_s9 + $0xc0] sm:$0xff] }
 0x2f4   : > { %9372 = vst [vmem:[#allocation9_spill] sm:$0xff] %v7706_v32  ;;  %v2276_v44 = vmax.f32 %v7706_v32, 0.0  ;;  %v7719_v63 = vadd.f32 %v5991_v8, %v2132_v14  ;;  %v7738_v47 = vld [vmem:[#allocation2 + $0x30] sm:$0xff] }
 0x2f5   : > { %9373 = vst [vmem:[#allocation10_spill] sm:$0xff] %v7715_v9  ;;  %2310 = vst.msk [vmem:[#allocation2 + $0x61] sm:$0xff] %vm170_vm0, %v2278_v51  ;;  %v2279_v0 = vmax.f32 %v7715_v9, 0.0  ;;  %v7724_v46 = vld [vmem:[#allocation2 + $0x18] sm:$0xff]  ;;  %v2448_v53 = vrot.slane %v7738_v47, 1 }
 0x2f6   : > { %9374 = vst [vmem:[#allocation11_spill] sm:$0xff] %v7719_v63  ;;  %2308 = vst.msk [vmem:[#allocation2 + $0x49] sm:$0xff] %vm170_vm0, %v2276_v44  ;;  %v2277_v25 = vmax.f32 %v7719_v63, 0.0  ;;  %v7728_v19 = vld [vmem:[#allocation2 + $0x38] sm:$0xff]  ;;  %v7730_v60 = vld [vmem:[#allocation2 + $0x40] sm:$0x3] }
 0x2f7   : > { %2311 = vst.msk [vmem:[#allocation2 + $0x69] sm:$0xff] %vm170_vm0, %v2279_v0  ;;  %v7733_v48 = vld [vmem:[#allocation2 + $0x20] sm:$0xff]  ;;  %v7735_v40 = vld [vmem:[#allocation2 + $0x28] sm:$0x3]  ;;  %v2443_v33 = vrot.slane %v7724_v46, 1  ;;  %v2449_v20 = vrot.slane %v7728_v19, 1  ;;  %v5633_v29 = vpack.i.bf16 %v7728_v19, %v7738_v47 }
 0x2f8   : > { %2309 = vst.msk [vmem:[#allocation2 + $0x51] sm:$0xff] %vm170_vm0, %v2277_v25  ;;  %v5232_v61 = vpop.f32.mrb[72].mxu1  ;;  %v5623_v38 = vpack.i.bf16 %v7733_v48, %v7724_v46  ;;  %v2444_v11 = vrot.slane %v7733_v48, 1  ;;  %v2446_v15 = vrot.slane %v7735_v40, 1  ;;  %v2451_v35 = vrot.slane %v7730_v60, 1  ;;  %v5935_v25 = vld [vmem:[%s9055_s1 + $0x1b8] sm:$0xff]  }
 0x2f9   : > { %v7754_v41 = vadd.f32 %v5992_v52, %v5232_v61  ;;  %v2145_v16 = vpop.f32.mrb[73].mxu1  ;;  %v7783_v7 = vsel %vm425_vm2, %v2448_v53, %v2449_v20  ;;  %5035 = vmatpush3.bf16.msra.mxu1 %v5935_v25 }
 0x2fa   : > { %v7760_v43 = vadd.f32 %v5993_v59, %v2145_v16  ;;  %5624 = vrot.lane.b32.xlu0 %v5623_v38, %s6084_s17  ;;  %v5233_v17 = vpop.f32.mrb[74].mxu1  ;;  %v7764_v13 = vsel %vm425_vm2, %v2443_v33, %v2444_v11  ;;  %v7767_v54 = vsel %vm425_vm2, %v2444_v11, %v2446_v15  ;;  %v7786_v10 = vsel %vm425_vm2, %v2449_v20, %v2451_v35  ;;  %v5996_v33 = vld [vmem:[%s6229_s9 + $0x70] sm:$0xff]  ;;  %v5936_v38 = vld [vmem:[%s9055_s1 + $0x200] sm:$0xff]  }
 0x2fb   : > { %9375 = vst [vmem:[#allocation12_spill] sm:$0xff] %v7754_v41  ;;  %v2282_v30 = vmax.f32 %v7754_v41, 0.0  ;;  %v7772_v22 = vadd.f32 %v5994_v56, %v5233_v17  ;;  %v2148_v36 = vpop.f32.mrb[75].mxu1  ;;  %v5638_v26 = vpack.i.bf16 %v7767_v54, %v7764_v13  ;;  %9379 = vst [vmem:[#allocation16_spill] sm:$0xff] %v7786_v10  ;;  %v5648_v18 = vpack.i.bf16 %v7786_v10, %v7783_v7  ;;  %v5997_v11 = vld [vmem:[%s6229_s9 + $0x60] sm:$0xff] }
 0x2fc   : > { %9376 = vst [vmem:[#allocation13_spill] sm:$0xff] %v7760_v43  ;;  %v2280_v21 = vmax.f32 %v7760_v43, 0.0  ;;  %v7780_v6 = vadd.f32 %v5995_v31, %v2148_v36  ;;  %v7814_v12 = vld [vmem:[#allocation2 + $0x60] sm:$0xff]  ;;  %v5999_v36 = vld [vmem:[%s6229_s9 + $0x68] sm:$0xff]  ;;  %5036 = vmatprep.subr.bf16.mxu1 %v5936_v38 }
 0x2fd   : > { %9377 = vst [vmem:[#allocation14_spill] sm:$0xff] %v7772_v22  ;;  %2314 = vst.msk [vmem:[#allocation2 + $0x91] sm:$0xff] %vm170_vm0, %v2282_v30  ;;  %v2283_v28 = vmax.f32 %v7772_v22, 0.0  ;;  %5639 = vrot.lane.b32.xlu1 %v5638_v26, %s6084_s17  ;;  %v7794_v4 = vld [vmem:[#allocation2 + $0x48] sm:$0xff]  ;;  %v2458_v52 = vrot.slane %v7814_v12, 1  ;;  %v5937_v31 = vld [vmem:[%s9055_s1 + $0x1c0] sm:$0xff]  }
 0x2fe   : > { %9378 = vst [vmem:[#allocation15_spill] sm:$0xff] %v7780_v6  ;;  %2312 = vst.msk [vmem:[#allocation2 + $0x79] sm:$0xff] %vm170_vm0, %v2280_v21  ;;  %v2281_v27 = vmax.f32 %v7780_v6, 0.0  ;;  %5634 = vrot.lane.b32.xlu0 %v5633_v29, %s6084_s17  ;;  %v7802_v24 = vld [vmem:[#allocation2 + $0x68] sm:$0xff]  ;;  %v7804_v45 = vld [vmem:[#allocation2 + $0x70] sm:$0x3]  ;;  %5037 = vmatpush3.bf16.msra.mxu1 %v5937_v31 }
 0x2ff   : > { %2315 = vst.msk [vmem:[#allocation2 + $0x99] sm:$0xff] %vm170_vm0, %v2283_v28  ;;  %v7809_v1 = vld [vmem:[#allocation2 + $0x50] sm:$0xff]  ;;  %v7811_v62 = vld [vmem:[#allocation2 + $0x58] sm:$0x3]  ;;  %v2453_v49 = vrot.slane %v7794_v4, 1  ;;  %v2459_v51 = vrot.slane %v7802_v24, 1  ;;  %v5653_v30 = vpack.i.bf16 %v7802_v24, %v7814_v12 }
 0x300   : > { %2313 = vst.msk [vmem:[#allocation2 + $0x81] sm:$0xff] %vm170_vm0, %v2281_v27  ;;  %v5236_v37 = vpop.f32.mrb[76].mxu1  ;;  %v5643_v14 = vpack.i.bf16 %v7809_v1, %v7794_v4  ;;  %v2454_v44 = vrot.slane %v7809_v1, 1  ;;  %v2456_v8 = vrot.slane %v7811_v62, 1  ;;  %v2461_v0 = vrot.slane %v7804_v45, 1 }
 0x301   : > { %v7827_v20 = vadd.f32 %v5996_v33, %v5236_v37  ;;  %5649 = vrot.lane.b32.xlu1 %v5648_v18, %s6084_s17  ;;  %v2161_v61 = vpop.f32.mrb[77].mxu1  ;;  %v7857_v29 = vsel %vm425_vm2, %v2458_v52, %v2459_v51  ;;  %v6000_v52 = vld [vmem:[%s6229_s9 + $0x90] sm:$0xff]  ;;  %v2625_v22 = vrot.slane %v7728_v19, 2  ;;  %v2632_v2 = vrot.slane %v7811_v62, 2 }
 0x302   : > { %v7834_v15 = vadd.f32 %v5997_v11, %v2161_v61  ;;  %5644 = vrot.lane.b32.xlu0 %v5643_v14, %s6084_s17  ;;  %v5237_v35 = vpop.f32.mrb[78].mxu1  ;;  %v7838_v58 = vsel %vm425_vm2, %v2453_v49, %v2454_v44  ;;  %v7841_v5 = vsel %vm425_vm2, %v2454_v44, %v2456_v8  ;;  %9386 = vst [vmem:[#allocation23_spill] sm:$0xff] %v7857_v29 }
 0x303   : > { %9380 = vst [vmem:[#allocation17_spill] sm:$0xff] %v7827_v20  ;;  %9382 = vst [vmem:[#allocation19_spill] sm:$0xff] %v7838_v58  ;;  %v2286_v16 = vmax.f32 %v7827_v20, 0.0  ;;  %v7846_v59 = vadd.f32 %v5998_v3, %v5237_v35  ;;  %v2164_v17 = vpop.f32.mrb[79].mxu1  ;;  %v5658_v53 = vpack.i.bf16 %v7841_v5, %v7838_v58  ;;  %v7860_v21 = vsel %vm425_vm2, %v2459_v51, %v2461_v0  ;;  %v5938_v0 = vld [vmem:[%s9055_s1 + $0x208] sm:$0xff]  }
 0x304   : > { %9381 = vst [vmem:[#allocation18_spill] sm:$0xff] %v7834_v15  ;;  %9383 = vst [vmem:[#allocation20_spill] sm:$0xff] %v7841_v5  ;;  %v2284_v56 = vmax.f32 %v7834_v15, 0.0  ;;  %v7854_v26 = vadd.f32 %v5999_v36, %v2164_v17  ;;  %v7873_v27 = vld [vmem:[#allocation2 + $0x90] sm:$0xff]  ;;  %v5668_v51 = vpack.i.bf16 %v7860_v21, %v7857_v29  ;;  %v5939_v35 = vld [vmem:[%s9055_s1 + $0x1c8] sm:$0xff]   ;;  %5038 = vmatprep.subr.bf16.mxu1 %v5938_v0 }
 0x305   : > { %9384 = vst [vmem:[#allocation21_spill] sm:$0xff] %v7846_v59  ;;  %9387 = vst [vmem:[#allocation25_spill] sm:$0xff] %v7860_v21  ;;  %v2287_v55 = vmax.f32 %v7846_v59, 0.0  ;;  %5659 = vrot.lane.b32.xlu1 %v5658_v53, %s6084_s17  ;;  %v7868_v28 = vld [vmem:[#allocation2 + $0x78] sm:$0xff]  ;;  %v5940_v17 = vld [vmem:[%s9055_s1 + $0x210] sm:$0xff]   ;;  %5039 = vmatpush3.bf16.msra.mxu1 %v5939_v35  ;;  %v2622_v59 = vrot.slane %v7735_v40, 2 }
 0x306   : > { %9385 = vst [vmem:[#allocation22_spill] sm:$0xff] %v7854_v26  ;;  %2318 = vst.msk [vmem:[#allocation2 + $0xc1] sm:$0xff] %vm170_vm0, %v2286_v16  ;;  %v2285_v57 = vmax.f32 %v7854_v26, 0.0  ;;  %5654 = vrot.lane.b32.xlu0 %v5653_v30, %s6084_s17  ;;  %v7875_v18 = vld [vmem:[#allocation2 + $0x98] sm:$0xff]  ;;  %v7877_v49 = vld [vmem:[#allocation2 + $0xa0] sm:$0x3]  ;;  %5040 = vmatprep.subr.bf16.mxu1 %v5940_v17 }
 0x307   : > { %9388 = vst [vmem:[#allocation26_spill] sm:$0xff] %v7868_v28  ;;  %2316 = vst.msk [vmem:[#allocation2 + $0xa9] sm:$0xff] %vm170_vm0, %v2284_v56  ;;  %v7882_v37 = vld [vmem:[#allocation2 + $0x80] sm:$0xff]  ;;  %v7884_v14 = vld [vmem:[#allocation2 + $0x88] sm:$0x3]  ;;  %v2463_v44 = vrot.slane %v7868_v28, 1 }
 0x308   : > { %9389 = vst [vmem:[#allocation27_spill] sm:$0xff] %v7873_v27  ;;  %9390 = vst [vmem:[#allocation28_spill] sm:$0xff] %v7875_v18  ;;  %v2469_v8 = vrot.slane %v7875_v18, 1  ;;  %v5240_v25 = vpop.f32.mrb[80].mxu1  ;;  %v5663_v33 = vpack.i.bf16 %v7882_v37, %v7868_v28  ;;  %v2464_v61 = vrot.slane %v7882_v37, 1  ;;  %v2466_v38 = vrot.slane %v7884_v14, 1 }
 0x309   : > { %2319 = vst.msk [vmem:[#allocation2 + $0xc9] sm:$0xff] %vm170_vm0, %v2287_v55  ;;  %9391 = vst [vmem:[#allocation29_spill] sm:$0xff] %v7882_v37  ;;  %v2471_v11 = vrot.slane %v7877_v49, 1  ;;  %v7901_v16 = vadd.f32 %v6000_v52, %v5240_v25  ;;  %5669 = vrot.lane.b32.xlu1 %v5668_v51, %s6084_s17  ;;  %v2177_v3 = vpop.f32.mrb[81].mxu1  ;;  %v6001_v53 = vld [vmem:[%s6229_s9 + $0x80] sm:$0xff]  ;;  %v2468_v55 = vrot.slane %v7873_v27, 1 }
 0x30a   : > { %2317 = vst.msk [vmem:[#allocation2 + $0xb1] sm:$0xff] %vm170_vm0, %v2285_v57  ;;  %v7908_v30 = vadd.f32 %v6001_v53, %v2177_v3  ;;  %5664 = vrot.lane.b32.xlu0 %v5663_v33, %s6084_s17  ;;  %v5241_v56 = vpop.f32.mrb[82].mxu1  ;;  %v7912_v36 = vsel %vm425_vm2, %v2463_v44, %v2464_v61  ;;  %v7915_v31 = vsel %vm425_vm2, %v2464_v61, %v2466_v38  ;;  %v6002_v51 = vld [vmem:[%s6229_s9 + $0x98] sm:$0xff]  ;;  %v6003_v53 = vld [vmem:[%s6229_s9 + $0x88] sm:$0xff]  ;;  %v2619_v26 = vrot.slane %v7724_v46, 2  ;;  %v6005_v15 = vld [vmem:[%s6229_s9 + $0xa0] sm:$0xff] }
 0x30b   : > { %9392 = vst [vmem:[#allocation30_spill] sm:$0xff] %v7901_v16  ;;  %9394 = vst [vmem:[#allocation31_spill] sm:$0xff] %v7912_v36  ;;  %v2290_v57 = vmax.f32 %v7901_v16, 0.0  ;;  %v7920_v25 = vadd.f32 %v6002_v51, %v5241_v56  ;;  %v2180_v52 = vpop.f32.mrb[83].mxu1  ;;  %v5678_v3 = vpack.i.bf16 %v7915_v31, %v7912_v36  ;;  %v5673_v33 = vpack.i.bf16 %v7875_v18, %v7873_v27  ;;  %v5941_v56 = vld [vmem:[%s9055_s1 + $0x1d0] sm:$0xff]   ;;  %v6006_v40 = vld [vmem:[%s6229_s9 + $0xb8] sm:$0xff] }
 0x30c   : > { %9393 = vst [vmem:[#allocation40_spill] sm:$0xff] %v7908_v30  ;;  %9395 = vst [vmem:[#allocation32_spill] sm:$0xff] %v7915_v31  ;;  %v2288_v44 = vmax.f32 %v7908_v30, 0.0  ;;  %v7928_v61 = vadd.f32 %v6003_v53, %v2180_v52  ;;  %v7931_v38 = vsel %vm425_vm2, %v2468_v55, %v2469_v8  ;;  %v7934_v16 = vsel %vm425_vm2, %v2469_v8, %v2471_v11  ;;  %v5942_v53 = vld [vmem:[%s9055_s1 + $0x218] sm:$0xff]  }
 0x30d   : > { %9396 = vst [vmem:[#allocation33_spill] sm:$0xff] %v7920_v25  ;;  %9398 = vst [vmem:[#allocation38_spill] sm:$0xff] %v7931_v38  ;;  %v2291_v0 = vmax.f32 %v7920_v25, 0.0  ;;  %5679 = vrot.lane.b32.xlu1 %v5678_v3, %s6084_s17  ;;  %v5688_v8 = vpack.i.bf16 %v7934_v16, %v7931_v38  ;;  %5041 = vmatpush3.bf16.msra.mxu1 %v5941_v56  ;;  %v2620_v56 = vrot.slane %v7733_v48, 2  ;;  %v6015_v38 = vld [vmem:[%s6229_s9 + $0xe8] sm:$0xff] }
 0x30e   : > { %9397 = vst [vmem:[#allocation34_spill] sm:$0xff] %v7928_v61  ;;  %9399 = vst [vmem:[#allocation39_spill] sm:$0xff] %v7934_v16  ;;  %v7942_v51 = vld [vmem:[#allocation2 + $0xa8] sm:$0xff]  ;;  %v2289_v55 = vmax.f32 %v7928_v61, 0.0  ;;  %5674 = vrot.lane.b32.xlu0 %v5673_v33, %s6084_s17  ;;  %5042 = vmatprep.subr.bf16.mxu1 %v5942_v53 }
 0x30f   : > { %2322 = vst.msk [vmem:[#allocation2 + $0xf1] sm:$0xff] %vm170_vm0, %v2290_v57  ;;  %9400 = vst [vmem:[#allocation41_spill] sm:$0xff] %v7942_v51  ;;  %v2624_v57 = vrot.slane %v7738_v47, 2  ;;  %v2473_v3 = vrot.slane %v7942_v51, 1  ;;  %v8012_v53 = vsel %vm602_vm3, %v2620_v56, %v2622_v59 }
 0x310   : > { %2320 = vst.msk [vmem:[#allocation2 + $0xd9] sm:$0xff] %vm170_vm0, %v2288_v44  ;;  %2323 = vst.msk [vmem:[#allocation2 + $0xf9] sm:$0xff] %vm170_vm0, %v2291_v0  ;;  %v5244_v17 = vpop.f32.mrb[84].mxu1  ;;  %v5943_v0 = vld [vmem:[%s9055_s1 + $0x1d8] sm:$0xff]   ;;  %v7971_v30 = vld [vmem:[#allocation2 + $0xc8] sm:$0xff] }
 0x311   : > { %v7950_v11 = vld [vmem:[#allocation2 + $0xb0] sm:$0xff]  ;;  %v7952_v35 = vld [vmem:[#allocation2 + $0xb8] sm:$0x3]  ;;  %2321 = vst.msk [vmem:[#allocation2 + $0xe1] sm:$0xff] %vm170_vm0, %v2289_v55  ;;  %5689 = vrot.lane.b32.xlu1 %v5688_v8, %s6084_s17  ;;  %v2193_v25 = vpop.f32.mrb[85].mxu1  ;;  %9403 = vst [vmem:[#allocation45_spill] sm:$0xff] %v7971_v30  ;;  %5043 = vmatpush3.bf16.msra.mxu1 %v5943_v0  ;;  %v8025_v59 = vsel %vm602_vm3, %v2624_v57, %v2625_v22 }
 0x312   : > { %9401 = vst [vmem:[#allocation42_spill] sm:$0xff] %v7950_v11  ;;  %v5683_v52 = vpack.i.bf16 %v7950_v11, %v7942_v51  ;;  %v2474_v33 = vrot.slane %v7950_v11, 1  ;;  %v2476_v44 = vrot.slane %v7952_v35, 1  ;;  %v6004_v55 = vld [vmem:[%s6229_s9 + $0xb0] sm:$0xff]  ;;  %v7977_v20 = vadd.f32 %v6005_v15, %v2193_v25 }
 0x313   : > { %v7968_v61 = vadd.f32 %v6004_v55, %v5244_v17  ;;  %v5245_v17 = vpop.f32.mrb[86].mxu1  ;;  %v7986_v6 = vld [vmem:[#allocation2 + $0xd0] sm:$0x3]  ;;  %v2650_v58 = vrot.slane %v7950_v11, 2 }
 0x314   : > { %9404 = vst [vmem:[#allocation43_spill] sm:$0xff] %v7977_v20  ;;  %5684 = vrot.lane.b32.xlu0 %v5683_v52, %s6084_s17  ;;  %v7981_v55 = vsel %vm425_vm2, %v2473_v3, %v2474_v33  ;;  %v7984_v8 = vsel %vm425_vm2, %v2474_v33, %v2476_v44  ;;  %v7991_v41 = vadd.f32 %v6006_v40, %v5245_v17  ;;  %v2196_v15 = vpop.f32.mrb[87].mxu1  ;;  %v7995_v52 = vld [vmem:[#allocation2 + $0xc0] sm:$0xff]  ;;  %v2627_v3 = vrot.slane %v7730_v60, 2  ;;  %v6007_v44 = vld [vmem:[%s6229_s9 + $0xa8] sm:$0xff]  ;;  %v6008_v57 = vld [vmem:[%s6229_s9 + $0xd0] sm:$0xff] }
 0x315   : > { %9402 = vst [vmem:[#allocation44_spill] sm:$0xff] %v7968_v61  ;;  %9405 = vst [vmem:[#allocation37_spill] sm:$0xff] %v7981_v55  ;;  %v2294_v43 = vmax.f32 %v7968_v61, 0.0  ;;  %v5698_v25 = vpack.i.bf16 %v7984_v8, %v7981_v55  ;;  %v2292_v33 = vmax.f32 %v7977_v20, 0.0  ;;  %v8000_v63 = vadd.f32 %v6007_v44, %v2196_v15 }
 0x316   : > { %9406 = vst [vmem:[#allocation36_spill] sm:$0xff] %v7984_v8  ;;  %9407 = vst [vmem:[#allocation46_spill] sm:$0xff] %v7991_v41  ;;  %v5693_v61 = vpack.i.bf16 %v7971_v30, %v7995_v52  ;;  %v2479_v17 = vrot.slane %v7971_v30, 1  ;;  %v2295_v40 = vmax.f32 %v7991_v41, 0.0  ;;  %v8009_v60 = vsel %vm602_vm3, %v2619_v26, %v2620_v56  ;;  %v6014_v8 = vld [vmem:[%s6229_s9 + $0xf8] sm:$0xff] }
 0x317   : > { %9408 = vst [vmem:[#allocation47_spill] sm:$0xff] %v7995_v52  ;;  %9409 = vst [vmem:[#allocation48_spill] sm:$0xff] %v8000_v63  ;;  %5699 = vrot.lane.b32.xlu1 %v5698_v25, %s6084_s17  ;;  %v2481_v15 = vrot.slane %v7986_v6, 1  ;;  %v2293_v44 = vmax.f32 %v8000_v63, 0.0  ;;  %v8020_v0 = vld [vmem:[#allocation2 + $0xd8] sm:$0xff]  ;;  %v8038_v63 = vsel %vm602_vm3, %v2625_v22, %v2627_v3  ;;  %v2630_v3 = vrot.slane %v7809_v1, 2 }
 0x318   : > { %2326 = vst.msk [vmem:[#allocation2 + $0x121] sm:$0xff] %vm170_vm0, %v2294_v43  ;;  %2324 = vst.msk [vmem:[#allocation2 + $0x109] sm:$0xff] %vm170_vm0, %v2292_v33  ;;  %5694 = vrot.lane.b32.xlu0 %v5693_v61, %s6084_s17  ;;  %v2478_v43 = vrot.slane %v7995_v52, 1  ;;  %v8022_v26 = vld [vmem:[#allocation2 + $0xe0] sm:$0xff]  ;;  %v8027_v56 = vld [vmem:[#allocation2 + $0xe8] sm:$0x3]  ;;  %v5703_v61 = vpack.i.bf16 %v8012_v53, %v8009_v60 }
 0x319   : > { %2327 = vst.msk [vmem:[#allocation2 + $0x129] sm:$0xff] %vm170_vm0, %v2295_v40  ;;  %9410 = vst [vmem:[#allocation49_spill] sm:$0xff] %v8022_v26  ;;  %v5248_v25 = vpop.f32.mrb[88].mxu1  ;;  %v5708_v33 = vpack.i.bf16 %v8022_v26, %v8020_v0  ;;  %v2484_v9 = vrot.slane %v8022_v26, 1  ;;  %v2486_v32 = vrot.slane %v8027_v56, 1 }
 0x31a   : > { %2325 = vst.msk [vmem:[#allocation2 + $0x111] sm:$0xff] %vm170_vm0, %v2293_v44  ;;  %v8035_v40 = vsel %vm425_vm2, %v2478_v43, %v2479_v17  ;;  %v8041_v41 = vadd.f32 %v6008_v57, %v5248_v25  ;;  %v2209_v20 = vpop.f32.mrb[89].mxu1  ;;  %v8044_v44 = vsel %vm425_vm2, %v2479_v17, %v2481_v15  ;;  %v6010_v25 = vld [vmem:[%s6229_s9 + $0xd8] sm:$0xff]  ;;  %v2483_v57 = vrot.slane %v8020_v0, 1 }
 0x31b   : > { %9411 = vst [vmem:[#allocation50_spill] sm:$0xff] %v8035_v40  ;;  %9413 = vst [vmem:[#allocation52_spill] sm:$0xff] %v8044_v44  ;;  %v8049_v50 = vadd.f32 %v6009_v23, %v2209_v20  ;;  %5709 = vrot.lane.b32.xlu1 %v5708_v33, %s6084_s17  ;;  %v5249_v22 = vpop.f32.mrb[90].mxu1  ;;  %v6011_v20 = vld [vmem:[%s6229_s9 + $0xc8] sm:$0xff]  ;;  %v5718_v33 = vpack.i.bf16 %v8038_v63, %v8025_v59  ;;  %v8076_v62 = vsel %vm425_vm2, %v2484_v9, %v2486_v32 }
 0x31c   : > { %9412 = vst [vmem:[#allocation51_spill] sm:$0xff] %v8041_v41  ;;  %5704 = vrot.lane.b32.xlu0 %v5703_v61, %s6084_s17  ;;  %v2298_v43 = vmax.f32 %v8041_v41, 0.0  ;;  %v8056_v17 = vadd.f32 %v6010_v25, %v5249_v22  ;;  %v2212_v15 = vpop.f32.mrb[91].mxu1  ;;  %v5713_v61 = vpack.i.bf16 %v8044_v44, %v8035_v40  ;;  %v8070_v25 = vld [vmem:[#allocation2 + $0xf8] sm:$0xff]  ;;  %v8073_v41 = vsel %vm425_vm2, %v2483_v57, %v2484_v9  ;;  %v8086_v57 = vld [vmem:[#allocation2 + $0xf0] sm:$0xff] }
 0x31d   : > { %9414 = vst [vmem:[#allocation53_spill] sm:$0xff] %v8049_v50  ;;  %v2296_v23 = vmax.f32 %v8049_v50, 0.0  ;;  %v8062_v42 = vadd.f32 %v6011_v20, %v2212_v15  ;;  %9417 = vst [vmem:[#allocation56_spill] sm:$0xff] %v8073_v41  ;;  %v2629_v15 = vrot.slane %v7794_v4, 2  ;;  %v8092_v9 = vsel %vm602_vm3, %v2630_v3, %v2632_v2 }
 0x31e   : > { %9415 = vst [vmem:[#allocation54_spill] sm:$0xff] %v8056_v17  ;;  %2330 = vst.msk [vmem:[#allocation2 + $0x151] sm:$0xff] %vm170_vm0, %v2298_v43  ;;  %v2299_v22 = vmax.f32 %v8056_v17, 0.0  ;;  %v8083_v43 = vld [vmem:[#allocation2 + $0x100] sm:$0x3]  ;;  %v2489_v17 = vrot.slane %v8070_v25, 1 }
 0x31f   : > { %9416 = vst [vmem:[#allocation55_spill] sm:$0xff] %v8062_v42  ;;  %9418 = vst [vmem:[#allocation57_spill] sm:$0xff] %v8076_v62  ;;  %v2297_v20 = vmax.f32 %v8062_v42, 0.0  ;;  %5719 = vrot.lane.b32.xlu1 %v5718_v33, %s6084_s17  ;;  %v8089_v32 = vsel %vm602_vm3, %v2629_v15, %v2630_v3  ;;  %v2637_v42 = vrot.slane %v7804_v45, 2  ;;  %v5723_v33 = vpack.i.bf16 %v8070_v25, %v8086_v57  ;;  %v6012_v15 = vld [vmem:[%s6229_s9 + $0xf0] sm:$0xff]  ;;  %s6019_s9 = scalar_lea.vmem %s9003_s19, 4096 }
 0x320   : > { %2328 = vst.msk [vmem:[#allocation2 + $0x139] sm:$0xff] %vm170_vm0, %v2296_v23  ;;  %5714 = vrot.lane.b32.xlu0 %v5713_v61, %s6084_s17  ;;  %2331 = vst.msk [vmem:[#allocation2 + $0x159] sm:$0xff] %vm170_vm0, %v2299_v22  ;;  %v2635_v23 = vrot.slane %v7802_v24, 2  ;;  %v5252_v61 = vpop.f32.mrb[92].mxu1  ;;  %v5728_v22 = vpack.i.bf16 %v8076_v62, %v8073_v41  ;;  %v2491_v45 = vrot.slane %v8083_v43, 1  ;;  %p6020_p11 = scmp.ne.s32.totalorder %s9003_s19, %s6019_s9 }
 0x321   : > { %2329 = vst.msk [vmem:[#allocation2 + $0x141] sm:$0xff] %vm170_vm0, %v2297_v20  ;;  %v8103_v50 = vadd.f32 %v6012_v15, %v5252_v61  ;;  %v2225_v2 = vpop.f32.mrb[93].mxu1  ;;  %v8105_v3 = vld [vmem:[#allocation2 + $0x110] sm:$0xff]  ;;  %v2634_v20 = vrot.slane %v7814_v12, 2  ;;  %v5733_v61 = vpack.i.bf16 %v8092_v9, %v8089_v32  ;;  %v2488_v15 = vrot.slane %v8086_v57, 1 }
 0x322   : > { %v8110_v44 = vadd.f32 %v6013_v39, %v2225_v2  ;;  %v5253_v62 = vpop.f32.mrb[94].mxu1  ;;  %v8117_v41 = vld [vmem:[#allocation2 + $0x118] sm:$0x3]  ;;  %v8123_v39 = vld [vmem:[#allocation2 + $0x108] sm:$0xff]  ;;  %p6021_p12 = pnand %p6020_p11, %p6146_p5 }
 0x323   : > { %9419 = vst [vmem:[#allocation58_spill] sm:$0xff] %v8103_v50  ;;  %5729 = vrot.lane.b32.xlu1 %v5728_v22, %s6084_s17  ;;  %v2302_v40 = vmax.f32 %v8103_v50, 0.0  ;;  %v8121_v55 = vadd.f32 %v6014_v8, %v5253_v62  ;;  %v2228_v16 = vpop.f32.mrb[95].mxu1  ;;  %v8129_v22 = vsel %vm602_vm3, %v2635_v23, %v2637_v42  ;;  %v5738_v50 = vpack.i.bf16 %v8105_v3, %v8123_v39 }
 0x324   : > { %9420 = vst [vmem:[#allocation59_spill] sm:$0xff] %v8110_v44  ;;  %5724 = vrot.lane.b32.xlu0 %v5723_v33, %s6084_s17  ;;  %v8126_v33 = vsel %vm602_vm3, %v2634_v20, %v2635_v23  ;;  %v2300_v2 = vmax.f32 %v8110_v44, 0.0  ;;  %v8133_v31 = vadd.f32 %v6015_v38, %v2228_v16  ;;  %v8138_v8 = vsel %vm425_vm2, %v2488_v15, %v2489_v17  ;;  %p6022_p13 = pneg %p6021_p12 }
 0x325   : > { %9421 = vst [vmem:[#allocation60_spill] sm:$0xff] %v8121_v55  ;;  %9423 = vst [vmem:[#allocation62_spill] sm:$0xff] %v8138_v8  ;;  %v2303_v62 = vmax.f32 %v8121_v55, 0.0  ;;  %v8143_v20 = vsel %vm425_vm2, %v2489_v17, %v2491_v45  ;;  %v2494_v42 = vrot.slane %v8105_v3, 1  ;;  %v2496_v23 = vrot.slane %v8117_v41, 1  ;;  %v8158_v45 = vld [vmem:[#allocation2 + $0x128] sm:$0xff] }
 0x326   : > { %9422 = vst [vmem:[#allocation61_spill] sm:$0xff] %v8133_v31  ;;  %2334 = vst.msk [vmem:[#allocation2 + $0x181] sm:$0xff] %vm170_vm0, %v2302_v40  ;;  %v2301_v16 = vmax.f32 %v8133_v31, 0.0  ;;  %v2493_v38 = vrot.slane %v8123_v39, 1  ;;  %v5743_v40 = vpack.i.bf16 %v8143_v20, %v8138_v8  ;;  %v5748_v17 = vpack.i.bf16 %v8129_v22, %v8126_v33 }
 0x327   : > { %9424 = vst [vmem:[#allocation63_spill] sm:$0xff] %v8143_v20  ;;  %2332 = vst.msk [vmem:[#allocation2 + $0x169] sm:$0xff] %vm170_vm0, %v2300_v2  ;;  %5739 = vrot.lane.b32.xlu1 %v5738_v50, %s6084_s17  ;;  %v2640_v50 = vrot.slane %v7882_v37, 2  ;;  %v2642_v2 = vrot.slane %v7884_v14, 2  ;;  %v2639_v31 = vrot.slane %v7868_v28, 2  ;;  %v2647_v14 = vrot.slane %v7877_v49, 2 }
 0x328   : > { %5734 = vrot.lane.b32.xlu0 %v5733_v61, %s6084_s17  ;;  %2335 = vst.msk [vmem:[#allocation2 + $0x189] sm:$0xff] %vm170_vm0, %v2303_v62  ;;  %2333 = vst.msk [vmem:[#allocation2 + $0x171] sm:$0xff] %vm170_vm0, %v2301_v16  ;;  %v8161_v15 = vsel %vm425_vm2, %v2493_v38, %v2494_v42  ;;  %v8164_v61 = vsel %vm425_vm2, %v2494_v42, %v2496_v23  ;;  %v8170_v62 = vld [vmem:[#allocation2 + $0x130] sm:$0x3]  ;;  %v8172_v16 = vld [vmem:[#allocation2 + $0x120] sm:$0xff]  ;;  %v2645_v23 = vrot.slane %v7875_v18, 2 }
 0x329   : > { %9425 = vst [vmem:[#allocation64_spill] sm:$0xff] %v8158_v45  ;;  %9426 = vst [vmem:[#allocation65_spill] sm:$0xff] %v8161_v15  ;;  %v5753_v38 = vpack.i.bf16 %v8158_v45, %v8172_v16  ;;  %v5758_v42 = vpack.i.bf16 %v8164_v61, %v8161_v15  ;;  %v8187_v55 = vld [vmem:[#allocation2 + $0x140] sm:$0xff]  ;;  %v2499_v44 = vrot.slane %v8158_v45, 1  ;;  %v2501_v20 = vrot.slane %v8170_v62, 1  ;;  %v8196_v49 = vld [vmem:[#allocation2 + $0x138] sm:$0xff] }
 0x32a   : > { %9427 = vst [vmem:[#allocation66_spill] sm:$0xff] %v8164_v61  ;;  %9428 = vst [vmem:[#allocation67_spill] sm:$0xff] %v8172_v16  ;;  %v2644_v61 = vrot.slane %v7873_v27, 2  ;;  %v8194_v15 = vld [vmem:[#allocation2 + $0x148] sm:$0x3]  ;;  %v2504_v21 = vrot.slane %v8187_v55, 1 }
 0x32b   : > { %5749 = vrot.lane.b32.xlu1 %v5748_v17, %s6084_s17  ;;  %v8185_v17 = vsel %vm602_vm3, %v2640_v50, %v2642_v2  ;;  %9429 = vst [vmem:[#allocation68_spill] sm:$0xff] %v8187_v55  ;;  %9430 = vst [vmem:[#allocation69_spill] sm:$0xff] %v8196_v49  ;;  %v5768_v2 = vpack.i.bf16 %v8187_v55, %v8196_v49  ;;  %v8213_v36 = vsel %vm425_vm2, %v2499_v44, %v2501_v20  ;;  %v8232_v5 = vld [vmem:[#allocation2 + $0x158] sm:$0xff] }
 0x32c   : > { %5744 = vrot.lane.b32.xlu0 %v5743_v40, %s6084_s17  ;;  %v8182_v40 = vsel %vm602_vm3, %v2639_v31, %v2640_v50  ;;  %v2498_v31 = vrot.slane %v8172_v16, 1  ;;  %v8204_v8 = vsel %vm602_vm3, %v2644_v61, %v2645_v23  ;;  %9434 = vst [vmem:[#allocation73_spill] sm:$0xff] %v8213_v36  ;;  %v2506_v29 = vrot.slane %v8194_v15, 1  ;;  %9437 = vst [vmem:[#allocation76_spill] sm:$0xff] %v8232_v5 }
 0x32d   : > { %v5763_v50 = vpack.i.bf16 %v8185_v17, %v8182_v40  ;;  %9431 = vst [vmem:[#allocation70_spill] sm:$0xff] %v8204_v8  ;;  %v2503_v61 = vrot.slane %v8196_v49, 1  ;;  %v2652_v37 = vrot.slane %v7952_v35, 2 }
 0x32f   : > { %5759 = vrot.lane.b32.xlu1 %v5758_v42, %s6084_s17  ;;  %v8210_v42 = vsel %vm425_vm2, %v2498_v31, %v2499_v44  ;;  %v8217_v18 = vld [vmem:[#allocation2 + $0x188] sm:$0xff]  ;;  %v8219_v27 = vld [vmem:[#allocation2 + $0x190] sm:$0x3] }
 0x330   : > { %5754 = vrot.lane.b32.xlu0 %v5753_v38, %s6084_s17  ;;  %v8207_v38 = vsel %vm602_vm3, %v2645_v23, %v2647_v14  ;;  %9433 = vst [vmem:[#allocation72_spill] sm:$0xff] %v8210_v42  ;;  %9435 = vst [vmem:[#allocation74_spill] sm:$0xff] %v8217_v18  ;;  %v8224_v23 = vld [vmem:[#allocation2 + $0x180] sm:$0xff]  ;;  %v5773_v44 = vpack.i.bf16 %v8213_v36, %v8210_v42  ;;  %v2863_v14 = vrot.slane %v8217_v18, 2  ;;  %v2865_v31 = vrot.slane %v8219_v27, 2 }
 0x331   : > { %9432 = vst [vmem:[#allocation71_spill] sm:$0xff] %v8207_v38  ;;  %9436 = vst [vmem:[#allocation75_spill] sm:$0xff] %v8224_v23  ;;  %v5778_v20 = vpack.i.bf16 %v8207_v38, %v8204_v8  ;;  %v8244_v36 = vld [vmem:[#allocation2 + $0x160] sm:$0x3]  ;;  %v2862_v42 = vrot.slane %v8224_v23, 2  ;;  %v8247_v38 = vld [vmem:[#allocation2 + $0x150] sm:$0xff] }
 0x332   : > { %9440 = vst [vmem:[#allocation79_spill] sm:$0xff] %v8247_v38  ;;  %v2655_v8 = vrot.slane %v7971_v30, 2  ;;  %v8268_v30 = vld [vmem:[#allocation2 + $0x170] sm:$0xff]  ;;  %v2511_v28 = vrot.slane %v8244_v36, 1 }
 0x333   : > { %5769 = vrot.lane.b32.xlu1 %v5768_v2, %s6084_s17  ;;  %v8238_v2 = vsel %vm425_vm2, %v2504_v21, %v2506_v29  ;;  %v2657_v29 = vrot.slane %v7986_v6, 2  ;;  %9444 = vst [vmem:[#allocation83_spill] sm:$0xff] %v8268_v30  ;;  %v2509_v6 = vrot.slane %v8232_v5, 1 }
 0x334   : > { %5764 = vrot.lane.b32.xlu0 %v5763_v50, %s6084_s17  ;;  %v8235_v50 = vsel %vm425_vm2, %v2503_v61, %v2504_v21  ;;  %9439 = vst [vmem:[#allocation78_spill] sm:$0xff] %v8238_v2  ;;  %v2649_v61 = vrot.slane %v7942_v51, 2  ;;  %v5783_v21 = vpack.i.bf16 %v8232_v5, %v8247_v38  ;;  %v8266_v51 = vsel %vm602_vm3, %v2650_v58, %v2652_v37 }
 0x335   : > { %9438 = vst [vmem:[#allocation77_spill] sm:$0xff] %v8235_v50  ;;  %v5788_v35 = vpack.i.bf16 %v8238_v2, %v8235_v50  ;;  %9443 = vst [vmem:[#allocation82_spill] sm:$0xff] %v8266_v51 }
 0x336   : > { %v8263_v11 = vsel %vm602_vm3, %v2649_v61, %v2650_v58  ;;  %v2508_v61 = vrot.slane %v8247_v38, 1  ;;  %v2514_v58 = vrot.slane %v8268_v30, 1 }
 0x337   : > { %5779 = vrot.lane.b32.xlu1 %v5778_v20, %s6084_s17  ;;  %v8260_v20 = vsel %vm602_vm3, %v2863_v14, %v2865_v31  ;;  %v8277_v31 = vld [vmem:[#allocation2 + $0x168] sm:$0xff]  ;;  %v5793_v37 = vpack.i.bf16 %v8266_v51, %v8263_v11  ;;  %v2662_v51 = vrot.slane %v8027_v56, 2  ;;  %v2664_v56 = vrot.slane %v8086_v57, 2 }
 0x338   : > { %5774 = vrot.lane.b32.xlu0 %v5773_v44, %s6084_s17  ;;  %v8257_v44 = vsel %vm602_vm3, %v2862_v42, %v2863_v14  ;;  %9442 = vst [vmem:[#allocation81_spill] sm:$0xff] %v8260_v20  ;;  %v2654_v42 = vrot.slane %v7995_v52, 2  ;;  %v8275_v14 = vld [vmem:[#allocation2 + $0x178] sm:$0x3]  ;;  %9445 = vst [vmem:[#allocation84_spill] sm:$0xff] %v8277_v31  ;;  %v5798_v2 = vpack.i.bf16 %v8268_v30, %v8277_v31 }
 0x339   : > { %9441 = vst [vmem:[#allocation80_spill] sm:$0xff] %v8257_v44  ;;  %v8293_v50 = vsel %vm425_vm2, %v2508_v61, %v2509_v6  ;;  %v8296_v52 = vsel %vm425_vm2, %v2509_v6, %v2511_v28  ;;  %v2516_v10 = vrot.slane %v8275_v14, 1  ;;  %v2667_v61 = vrot.slane %v8083_v43, 2 }
 0x33a   : > { %9446 = vst [vmem:[#allocation85_spill] sm:$0xff] %v8293_v50  ;;  %9447 = vst [vmem:[#allocation86_spill] sm:$0xff] %v8296_v52  ;;  %v5803_v28 = vpack.i.bf16 %v8296_v52, %v8293_v50 }
 0x33b   : > { %5789 = vrot.lane.b32.xlu1 %v5788_v35, %s6084_s17  ;;  %v8290_v35 = vsel %vm602_vm3, %v2655_v8, %v2657_v29  ;;  %v2665_v29 = vrot.slane %v8070_v25, 2 }
 0x33c   : > { %5784 = vrot.lane.b32.xlu0 %v5783_v21, %s6084_s17  ;;  %v8287_v21 = vsel %vm602_vm3, %v2654_v42, %v2655_v8  ;;  %v2660_v42 = vrot.slane %v8022_v26, 2  ;;  %v2513_v8 = vrot.slane %v8277_v31, 1  ;;  %v8316_v26 = vsel %vm425_vm2, %v2514_v58, %v2516_v10 }
 0x33d   : > { %v5808_v6 = vpack.i.bf16 %v8290_v35, %v8287_v21  ;;  %9449 = vst [vmem:[#allocation88_spill] sm:$0xff] %v8316_v26  ;;  %v8328_v50 = vsel %vm602_vm3, %v2664_v56, %v2665_v29  ;;  %v2670_v10 = vrot.slane %v8105_v3, 2 }
 0x33e   : > { %v8325_v52 = vsel %vm602_vm3, %v2660_v42, %v2662_v51  ;;  %v2677_v51 = vrot.slane %v8170_v62, 2  ;;  %v2680_v62 = vrot.slane %v8187_v55, 2  ;;  %v2690_v55 = vrot.slane %v8268_v30, 2 }
 0x33f   : > { %5799 = vrot.lane.b32.xlu1 %v5798_v2, %s6084_s17  ;;  %v8313_v2 = vsel %vm425_vm2, %v2513_v8, %v2514_v58  ;;  %v8331_v8 = vsel %vm602_vm3, %v2665_v29, %v2667_v61  ;;  %v2672_v58 = vrot.slane %v8117_v41, 2  ;;  %v2674_v41 = vrot.slane %v8172_v16, 2 }
 0x340   : > { %5794 = vrot.lane.b32.xlu0 %v5793_v37, %s6084_s17  ;;  %v2659_v37 = vrot.slane %v8020_v0, 2  ;;  %9448 = vst [vmem:[#allocation87_spill] sm:$0xff] %v8313_v2  ;;  %v5828_v61 = vpack.i.bf16 %v8331_v8, %v8328_v50  ;;  %v2687_v16 = vrot.slane %v8244_v36, 2 }
 0x342   : > { %v8322_v43 = vsel %vm602_vm3, %v2659_v37, %v2660_v42  ;;  %v2675_v37 = vrot.slane %v8158_v45, 2  ;;  %v2669_v42 = vrot.slane %v8123_v39, 2  ;;  %v2685_v45 = vrot.slane %v8232_v5, 2  ;;  %v8387_v5 = vld [vmem:[#allocation2 + $0x1a8] sm:$0x3] }
 0x343   : > { %5809 = vrot.lane.b32.xlu1 %v5808_v6, %s6084_s17  ;;  %v5818_v6 = vpack.i.bf16 %v8316_v26, %v8313_v2  ;;  %v5823_v29 = vpack.i.bf16 %v8325_v52, %v8322_v43  ;;  %v8353_v26 = vsel %vm602_vm3, %v2670_v10, %v2672_v58  ;;  %v2682_v2 = vrot.slane %v8194_v15, 2  ;;  %9452 = vst [vmem:[#allocation91_spill] sm:$0xff] %v8387_v5 }
 0x344   : > { %5804 = vrot.lane.b32.xlu0 %v5803_v28, %s6084_s17  ;;  %v5813_v28 = vpack.i.bf16 %v8217_v18, %v8224_v23  ;;  %v8350_v56 = vsel %vm602_vm3, %v2669_v42, %v2670_v10  ;;  %v2679_v10 = vrot.slane %v8196_v49, 2  ;;  %v2684_v58 = vrot.slane %v8247_v38, 2 }
 0x345   : > { %v5833_v42 = vpack.i.bf16 %v8353_v26, %v8350_v56  ;;  %v8390_v38 = vsel %vm602_vm3, %v2685_v45, %v2687_v16 }
 0x346   : > { %v8374_v15 = vsel %vm602_vm3, %v2679_v10, %v2680_v62  ;;  %v8380_v36 = vsel %vm602_vm3, %v2684_v58, %v2685_v45  ;;  %v2828_v10 = vrot.slane %v8219_v27, 1  ;;  %v2689_v58 = vrot.slane %v8277_v31, 2 }
 0x347   : > { %5819 = vrot.lane.b32.xlu1 %v5818_v6, %s6084_s17  ;;  %v8360_v6 = vsel %vm602_vm3, %v2675_v37, %v2677_v51  ;;  %v8377_v51 = vsel %vm602_vm3, %v2680_v62, %v2682_v2  ;;  %v2692_v2 = vrot.slane %v8275_v14, 2  ;;  %v2825_v62 = vrot.slane %v8224_v23, 1 }
 0x348   : > { %5814 = vrot.lane.b32.xlu0 %v5813_v28, %s6084_s17  ;;  %v8357_v28 = vsel %vm602_vm3, %v2674_v41, %v2675_v37  ;;  %v8383_v41 = vld [vmem:[#allocation2 + $0x198] sm:$0xff]  ;;  %v2969_v45 = vrot.slane %v8387_v5, 1  ;;  %v5843_v27 = vpack.i.bf16 %v8377_v51, %v8374_v15  ;;  %v5848_v16 = vpack.i.bf16 %v8390_v38, %v8380_v36 }
 0x349   : > { %v5838_v37 = vpack.i.bf16 %v8360_v6, %v8357_v28  ;;  %9450 = vst [vmem:[#allocation89_spill] sm:$0xff] %v8383_v41 }
 0x34b   : > { %5829 = vrot.lane.b32.xlu1 %v5828_v61, %s6084_s17  ;;  %v8385_v61 = vld [vmem:[#allocation2 + $0x1a0] sm:$0xff] }
 0x34c   : > { %5824 = vrot.lane.b32.xlu0 %v5823_v29, %s6084_s17  ;;  %v2826_v29 = vrot.slane %v8217_v18, 1  ;;  %9451 = vst [vmem:[#allocation90_spill] sm:$0xff] %v8385_v61  ;;  %v2966_v18 = vrot.slane %v8383_v41, 1  ;;  %v2967_v49 = vrot.slane %v8385_v61, 1  ;;  %v8416_v41 = vsel %vm602_vm3, %v2690_v55, %v2692_v2  ;;  %v5630_v2 = vpop.permute.xlu1 %5629 }
 0x34d   : > { %9456 = vst [vmem:[#allocation95_spill] sm:$0xff] %v8416_v41 }
 0x34e   : > { %v8407_v14 = vsel %vm425_vm2, %v2825_v62, %v2826_v29  ;;  %v2968_v5 = vsel %vm425_vm2, %v2966_v18, %v2967_v49  ;;  %v2970_v61 = vsel %vm425_vm2, %v2967_v49, %v2969_v45  ;;  %v6016_v18 = vld [vmem:[#allocation2 + $0x10] sm:$0x3]  ;;  %v5631_v45 = vunpack.i.l.bf16 %v5630_v2 }
 0x34f   : > { %5839 = vrot.lane.b32.xlu1 %v5838_v37, %s6084_s17  ;;  %9453 = vst [vmem:[#allocation92_spill] sm:$0xff] %v8407_v14  ;;  %v8413_v37 = vsel %vm602_vm3, %v2689_v58, %v2690_v55  ;;  %v5863_v55 = vpack.i.bf16 %v2970_v61, %v2968_v5  ;;  %v2617_v49 = vrot.slane %v6016_v18, 2  ;;  %v5632_v58 = vunpack.i.h.bf16 %v5630_v2 }
 0x350   : > { %5834 = vrot.lane.b32.xlu0 %v5833_v42, %s6084_s17  ;;  %v8410_v42 = vsel %vm425_vm2, %v2826_v29, %v2828_v10  ;;  %9455 = vst [vmem:[#allocation94_spill] sm:$0xff] %v8413_v37  ;;  %v5858_v29 = vpack.i.bf16 %v8416_v41, %v8413_v37  ;;  %v5868_v10 = vpack.i.bf16 %v8260_v20, %v8257_v44 }
 0x351   : > { %9454 = vst [vmem:[#allocation93_spill] sm:$0xff] %v8410_v42  ;;  %v5853_v62 = vpack.i.bf16 %v8410_v42, %v8407_v14  ;;  %v6018_v42 = vld [vmem:[#allocation2 + $0x8] sm:$0xff] }
 0x352   : > { %v2615_v14 = vrot.slane %v6018_v42, 2 }
 0x353   : > { %5849 = vrot.lane.b32.xlu1 %v5848_v16, %s6084_s17 }
 0x354   : > { %5844 = vrot.lane.b32.xlu0 %v5843_v27, %s6084_s17  ;;  %v6017_v27 = vld [vmem:[#allocation2] sm:$0xff] }
 0x355   : > { %v2614_v16 = vrot.slane %v6017_v27, 2  ;;  %v2992_v5 = vsel %vm170_vm0, %v6017_v27, %v5631_v45 }
 0x357   : > { %5859 = vrot.lane.b32.xlu1 %v5858_v29, %s6084_s17  ;;  %v2616_v29 = vsel %vm602_vm3, %v2614_v16, %v2615_v14 }
 0x358   : > { %5854 = vrot.lane.b32.xlu0 %v5853_v62, %s6084_s17  ;;  %v2993_v62 = vsel %vm170_vm0, %v6018_v42, %v5632_v58  ;;  %v5944_v42 = vld [vmem:[%s9055_s1 + $0x228] sm:$0xff]  }
 0x359   : > { %v3092_v20 = vpack.c.bf16 %v2993_v62, %v2992_v5 }
 0x35b   : > { %5869 = vrot.lane.b32.xlu1 %v5868_v10, %s6084_s17  ;;  %v2618_v10 = vsel %vm602_vm3, %v2615_v14, %v2617_v49 }
 0x35c   : > { %5864 = vrot.lane.b32.xlu0 %v5863_v55, %s6084_s17  ;;  %s6085_s17 = smov [#allocation3]  }
 0x35d   : > { %s6023_s26 = sshll.u32 %s6085_s17, 4  ;;  %s6024_s26 = int_to_ptr.vmem [resolvable:$false] %s6023_s26 }
 0x35e   : > { %s6025_s27 = scalar_lea.vmem %s6024_s26, 8192  ;;  %p6026_p0 = scmp.lt.s32.totalorder %s9003_s19, %s6024_s26 }
 0x35f   : > { %p6027_p1 = scmp.lt.s32.totalorder %s6025_s27, %s6019_s9 }
 0x361   : > { %p6028_p2 = por %p6027_p1, %p6026_p0 }
 0x363   : > { %p6029_p3 = pnand %p6028_p2, %p6022_p13 }
 0x36c   : > { %v5625_v61 = vpop.permute.xlu0 %5624 }
 0x36d   : > { %v5627_v44 = vunpack.i.h.bf16 %v5625_v61  ;;  %v5626_v55 = vunpack.i.l.bf16 %v5625_v61 }
 0x36f   : > { %v5640_v18 = vpop.permute.xlu1 %5639  ;;  %v3024_v23 = vsel %vm170_vm0, %v2616_v29, %v5626_v55  ;;  %v3025_v2 = vsel %vm170_vm0, %v2618_v10, %v5627_v44 }
 0x370   : > { %v5635_v30 = vpop.permute.xlu0 %5634  ;;  %v3093_v31 = vpack.c.bf16 %v3025_v2, %v3024_v23  ;;  %v5642_v58 = vunpack.i.h.bf16 %v5640_v18  ;;  %v5641_v45 = vunpack.i.l.bf16 %v5640_v18 }
 0x371   : > { %v5637_v41 = vunpack.i.h.bf16 %v5635_v30  ;;  %v5636_v37 = vunpack.i.l.bf16 %v5635_v30 }
 0x372   : > { %3527 = vmatprep.mubr.bf16.mxu0 %v3093_v31  ;;  %v2995_v31 = vsel %vm170_vm0, %v7733_v48, %v5642_v58 }
 0x373   : > { %3528 = vmatmul.mubr.bf16.vlgmr.msra.gmra.mrb[96].mxu0 %v3092_v20  ;;  %v5650_v14 = vpop.permute.xlu1 %5649  ;;  %v3026_v49 = vsel %vm170_vm0, %v8009_v60, %v5636_v37  ;;  %v3027_v27 = vsel %vm170_vm0, %v8012_v53, %v5637_v41  ;;  %v5945_v20 = vld [vmem:[%s9055_s1 + $0x230] sm:$0xff]  }
 0x374   : > { %5255 = vmatpush3.bf16.msra.mxu0 %v7711_v34  ;;  %v5652_v23 = vunpack.i.h.bf16 %v5650_v14  ;;  %v5651_v44 = vunpack.i.l.bf16 %v5650_v14  ;;  %v5645_v30 = vpop.permute.xlu0 %5644  ;;  %v3098_v16 = vpack.c.bf16 %v3027_v27, %v3026_v49  ;;  %v2994_v34 = vsel %vm170_vm0, %v7724_v46, %v5641_v45  ;;  %v5946_v46 = vld [vmem:[%s9055_s1 + $0x238] sm:$0xff]  }
 0x375   : > { %v5647_v62 = vunpack.i.h.bf16 %v5645_v30  ;;  %v5646_v5 = vunpack.i.l.bf16 %v5645_v30  ;;  %5256 = vmatprep.subr.bf16.mxu0 %v5944_v42 }
 0x376   : > { %3535 = vmatprep.mubr.bf16.mxu0 %v3098_v16  ;;  %v2996_v60 = vsel %vm170_vm0, %v7738_v47, %v5651_v44  ;;  %v2997_v53 = vsel %vm170_vm0, %v7728_v19, %v5652_v23  ;;  %v3097_v47 = vpack.c.bf16 %v2995_v31, %v2994_v34 }
 0x377   : > { %v5660_v41 = vpop.permute.xlu1 %5659  ;;  %v3095_v37 = vpack.c.bf16 %v2997_v53, %v2996_v60  ;;  %v3028_v61 = vsel %vm170_vm0, %v8025_v59, %v5646_v5  ;;  %v3029_v29 = vsel %vm170_vm0, %v8038_v63, %v5647_v62 }
 0x378   : > { %v5655_v10 = vpop.permute.xlu0 %5654  ;;  %5257 = vmatpush3.bf16.msra.mxu0 %v5944_v42  ;;  %v3102_v19 = vpack.c.bf16 %v3029_v29, %v3028_v61  ;;  %v5662_v49 = vunpack.i.h.bf16 %v5660_v41  ;;  %v5661_v27 = vunpack.i.l.bf16 %v5660_v41 }
 0x379   : > { %3688 = vmatprep.mubr.bf16.mxu1 %v3095_v37  ;;  %5258 = vmatprep.subr.bf16.mxu0 %v5945_v20  ;;  %v5657_v55 = vunpack.i.h.bf16 %v5655_v10  ;;  %v5656_v48 = vunpack.i.l.bf16 %v5655_v10 }
 0x37a   : > { %v2998_v5 = vsel %vm170_vm0, %v7794_v4, %v5661_v27 }
 0x37b   : > { %3536 = vmatmul.mubr.bf16.gmra.mrb[100].mxu0 %v3097_v47  ;;  %v5670_v18 = vpop.permute.xlu1 %5669  ;;  %v3030_v42 = vsel %vm170_vm0, %v8089_v32, %v5656_v48  ;;  %v3031_v45 = vsel %vm170_vm0, %v8092_v9, %v5657_v55 }
 0x37c   : > { %3543 = vmatprep.mubr.bf16.mxu0 %v3102_v19  ;;  %v5665_v2 = vpop.permute.xlu0 %5664  ;;  %5259 = vmatpush3.bf16.msra.mxu0 %v5945_v20  ;;  %v3106_v23 = vpack.c.bf16 %v3031_v45, %v3030_v42  ;;  %v2999_v20 = vsel %vm170_vm0, %v7809_v1, %v5662_v49  ;;  %v5671_v61 = vunpack.i.l.bf16 %v5670_v18 }
 0x37d   : > { %5260 = vmatprep.subr.bf16.mxu0 %v5946_v46  ;;  %v5667_v44 = vunpack.i.h.bf16 %v5665_v2  ;;  %v5666_v30 = vunpack.i.l.bf16 %v5665_v2  ;;  %v3100_v41 = vpack.c.bf16 %v2999_v20, %v2998_v5 }
 0x37e   : > { %v3000_v55 = vsel %vm170_vm0, %v7814_v12, %v5671_v61 }
 0x37f   : > { %v5680_v58 = vpop.permute.xlu1 %5679  ;;  %v3032_v53 = vsel %vm170_vm0, %v8126_v33, %v5666_v30  ;;  %v3033_v34 = vsel %vm170_vm0, %v8129_v22, %v5667_v44 }
 0x380   : > { %v5675_v14 = vpop.permute.xlu0 %5674  ;;  %5261 = vmatpush3.bf16.msra.mxu0 %v5946_v46  ;;  %v3110_v29 = vpack.c.bf16 %v3033_v34, %v3032_v53  ;;  %v5681_v30 = vunpack.i.l.bf16 %v5680_v58 }
 0x381   : > { %v5677_v10 = vunpack.i.h.bf16 %v5675_v14  ;;  %v5676_v47 = vunpack.i.l.bf16 %v5675_v14 }
 0x383   : > { %3544 = vmatmul.mubr.bf16.gmra.mrb[104].mxu0 %v3095_v37  ;;  %v8468_v16 = vpop.permute.xlu1 %5689  ;;  %v5672_v37 = vunpack.i.h.bf16 %v5670_v18  ;;  %v3034_v42 = vsel %vm170_vm0, %v8182_v40, %v5676_v47  ;;  %v3035_v45 = vsel %vm170_vm0, %v8185_v17, %v5677_v10  ;;  %v9459_v10 = vld [vmem:[#allocation29_spill] sm:$0xff] }
 0x384   : > { %3551 = vmatprep.mubr.bf16.mxu0 %v3106_v23 }
 0x385   : > { %v3001_v48 = vsel %vm170_vm0, %v7802_v24, %v5672_v37  ;;  %v5682_v24 = vunpack.i.h.bf16 %v5680_v58  ;;  %v9457_v37 = vld [vmem:[#allocation16_spill] sm:$0xff] }
 0x386   : > { %v5685_v62 = vpop.permute.xlu0 %5684  ;;  %v3104_v44 = vpack.c.bf16 %v3001_v48, %v3000_v55 }
 0x387   : > { %v5687_v5 = vunpack.i.h.bf16 %v5685_v62  ;;  %v5686_v20 = vunpack.i.l.bf16 %v5685_v62  ;;  %v3003_v47 = vsel %vm170_vm0, %v9459_v10, %v5682_v24  ;;  %v9460_v62 = vld [vmem:[#allocation70_spill] sm:$0xff] }
 0x389   : > { %v8474_v60 = vpop.permute.xlu1 %5699 }
 0x38a   : > { %v8480_v31 = vpop.permute.xlu0 %5694 }
 0x38b   : > { %3552 = vmatmul.mubr.bf16.gmra.mrb[108].mxu0 %v3100_v41 }
 0x38c   : > { %3559 = vmatprep.mubr.bf16.mxu0 %v3110_v29  ;;  %v9458_v29 = vld [vmem:[#allocation26_spill] sm:$0xff] }
 0x38d   : > { %v8482_v1 = vpop.permute.xlu1 %5709  ;;  %v3002_v58 = vsel %vm170_vm0, %v9458_v29, %v5681_v30  ;;  %v9462_v30 = vld [vmem:[#allocation19_spill] sm:$0xff] }
 0x38e   : > { %v5705_v4 = vpop.permute.xlu0 %5704 }
 0x38f   : > { %v5707_v46 = vunpack.i.h.bf16 %v5705_v4  ;;  %v5706_v19 = vunpack.i.l.bf16 %v5705_v4  ;;  %v9461_v4 = vld [vmem:[#allocation71_spill] sm:$0xff] }
 0x391   : > { %v3057_v2 = vsel %vm170_vm0, %v7767_v54, %v5707_v46  ;;  %v3056_v18 = vsel %vm170_vm0, %v7764_v13, %v5706_v19  ;;  %v5720_v27 = vpop.permute.xlu1 %5719  ;;  %v3114_v54 = vpack.c.bf16 %v3035_v45, %v3034_v42  ;;  %v3037_v46 = vsel %vm170_vm0, %v9461_v4, %v5687_v5  ;;  %v9463_v5 = vld [vmem:[#allocation20_spill] sm:$0xff] }
 0x392   : > { %v3094_v14 = vpack.c.bf16 %v3057_v2, %v3056_v18  ;;  %v8496_v49 = vpop.permute.xlu0 %5714  ;;  %v5722_v12 = vunpack.i.h.bf16 %v5720_v27  ;;  %v5721_v23 = vunpack.i.l.bf16 %v5720_v27  ;;  %v3108_v18 = vpack.c.bf16 %v3003_v47, %v3002_v58 }
 0x393   : > { %3560 = vmatmul.mubr.bf16.gmra.mrb[112].mxu0 %v3104_v44  ;;  %v5692_v42 = vunpack.i.h.bf16 %v8468_v16  ;;  %v5691_v45 = vunpack.i.l.bf16 %v8468_v16  ;;  %v5697_v27 = vunpack.i.h.bf16 %v8480_v31 }
 0x394   : > { %3689 = vmatmul.mubr.bf16.vlgmr.msra.gmra.mrb[96].mxu1 %v3094_v14  ;;  %3567 = vmatprep.mubr.bf16.mxu0 %v3114_v54  ;;  %v3058_v34 = vsel %vm170_vm0, %v7783_v7, %v5721_v23  ;;  %v3059_v61 = vsel %vm170_vm0, %v9457_v37, %v5722_v12  ;;  %v5696_v12 = vunpack.i.l.bf16 %v8480_v31  ;;  %v9465_v37 = vld [vmem:[#allocation28_spill] sm:$0xff] }
 0x395   : > { %3696 = vmatprep.mubr.bf16.mxu1 %v3100_v41  ;;  %v8500_v53 = vpop.permute.xlu1 %5729  ;;  %v3036_v41 = vsel %vm170_vm0, %v9460_v62, %v5686_v20  ;;  %v3099_v48 = vpack.c.bf16 %v3059_v61, %v3058_v34  ;;  %v9464_v34 = vld [vmem:[#allocation27_spill] sm:$0xff]  ;;  %v3005_v61 = vsel %vm170_vm0, %v9465_v37, %v5692_v42  ;;  %v5712_v42 = vunpack.i.h.bf16 %v8482_v1 }
 0x396   : > { %v8498_v13 = vpop.permute.xlu0 %5724  ;;  %v3118_v14 = vpack.c.bf16 %v3037_v46, %v3036_v41  ;;  %v3004_v16 = vsel %vm170_vm0, %v9464_v34, %v5691_v45  ;;  %v3038_v31 = vsel %vm170_vm0, %v8263_v11, %v5696_v12  ;;  %v5711_v45 = vunpack.i.l.bf16 %v8482_v1 }
 0x398   : > { %v3040_v1 = vsel %vm170_vm0, %v8287_v21, %v5711_v45 }
 0x399   : > { %v8514_v55 = vpop.permute.xlu1 %5739 }
 0x39a   : > { %v5735_v19 = vpop.permute.xlu0 %5734 }
 0x39b   : > { %v5737_v7 = vunpack.i.h.bf16 %v5735_v19  ;;  %v5736_v2 = vunpack.i.l.bf16 %v5735_v19  ;;  %3568 = vmatmul.mubr.bf16.gmra.mrb[116].mxu0 %v3108_v18  ;;  %v3112_v19 = vpack.c.bf16 %v3005_v61, %v3004_v16 }
 0x39c   : > { %3697 = vmatmul.mubr.bf16.gmra.mrb[100].mxu1 %v3099_v48  ;;  %3575 = vmatprep.mubr.bf16.mxu0 %v3118_v14  ;;  %v5702_v48 = vunpack.i.h.bf16 %v8474_v60 }
 0x39d   : > { %3704 = vmatprep.mubr.bf16.mxu1 %v3104_v44  ;;  %v5750_v24 = vpop.permute.xlu1 %5749  ;;  %v3060_v54 = vsel %vm170_vm0, %v9462_v30, %v5736_v2  ;;  %v3061_v20 = vsel %vm170_vm0, %v9463_v5, %v5737_v7  ;;  %v9466_v44 = vld [vmem:[#allocation82_spill] sm:$0xff]  ;;  %v5701_v7 = vunpack.i.l.bf16 %v8474_v60  ;;  %v9468_v30 = vld [vmem:[#allocation25_spill] sm:$0xff] }
 0x39e   : > { %v8520_v23 = vpop.permute.xlu0 %5744  ;;  %v3039_v29 = vsel %vm170_vm0, %v9466_v44, %v5697_v27  ;;  %v3103_v47 = vpack.c.bf16 %v3061_v20, %v3060_v54  ;;  %v5752_v41 = vunpack.i.h.bf16 %v5750_v24  ;;  %v5751_v46 = vunpack.i.l.bf16 %v5750_v24  ;;  %v9467_v27 = vld [vmem:[#allocation23_spill] sm:$0xff]  ;;  %v9469_v5 = vld [vmem:[#allocation41_spill] sm:$0xff]  ;;  %v9470_v20 = vld [vmem:[#allocation42_spill] sm:$0xff] }
 0x39f   : > { %v3122_v2 = vpack.c.bf16 %v3039_v29, %v3038_v31  ;;  %v3006_v60 = vsel %vm170_vm0, %v9469_v5, %v5701_v7  ;;  %v3007_v34 = vsel %vm170_vm0, %v9470_v20, %v5702_v48  ;;  %v5727_v48 = vunpack.i.h.bf16 %v8498_v13 }
 0x3a0   : > { %v3062_v12 = vsel %vm170_vm0, %v9467_v27, %v5751_v46  ;;  %v3063_v24 = vsel %vm170_vm0, %v9468_v30, %v5752_v41  ;;  %v3116_v29 = vpack.c.bf16 %v3007_v34, %v3006_v60  ;;  %v5716_v41 = vunpack.i.l.bf16 %v8496_v49  ;;  %v9472_v27 = vld [vmem:[#allocation32_spill] sm:$0xff]  ;;  %v9473_v30 = vld [vmem:[#allocation47_spill] sm:$0xff] }
 0x3a1   : > { %v8536_v10 = vpop.permute.xlu1 %5759  ;;  %v3107_v37 = vpack.c.bf16 %v3063_v24, %v3062_v12  ;;  %v5726_v7 = vunpack.i.l.bf16 %v8498_v13  ;;  %v9474_v24 = vld [vmem:[#allocation45_spill] sm:$0xff] }
 0x3a2   : > { %v8534_v58 = vpop.permute.xlu0 %5754 }
 0x3a3   : > { %3576 = vmatmul.mubr.bf16.gmra.mrb[120].mxu0 %v3112_v19  ;;  %v3042_v13 = vsel %vm170_vm0, %v8322_v43, %v5726_v7 }
 0x3a4   : > { %3705 = vmatmul.mubr.bf16.gmra.mrb[104].mxu1 %v3103_v47  ;;  %3583 = vmatprep.mubr.bf16.mxu0 %v3122_v2  ;;  %v5717_v47 = vunpack.i.h.bf16 %v8496_v49  ;;  %v3008_v49 = vsel %vm170_vm0, %v9473_v30, %v5716_v41  ;;  %v5741_v41 = vunpack.i.l.bf16 %v8514_v55 }
 0x3a5   : > { %3712 = vmatprep.mubr.bf16.mxu1 %v3108_v18  ;;  %v8546_v54 = vpop.permute.xlu1 %5769  ;;  %v3041_v18 = vsel %vm170_vm0, %v8290_v35, %v5712_v42  ;;  %v9471_v42 = vld [vmem:[#allocation31_spill] sm:$0xff] }
 0x3a6   : > { %v5765_v14 = vpop.permute.xlu0 %5764  ;;  %v3126_v46 = vpack.c.bf16 %v3041_v18, %v3040_v1  ;;  %v3009_v5 = vsel %vm170_vm0, %v9474_v24, %v5717_v47  ;;  %v5732_v18 = vunpack.i.h.bf16 %v8500_v53  ;;  %v5742_v47 = vunpack.i.h.bf16 %v8514_v55 }
 0x3a7   : > { %v5767_v61 = vunpack.i.h.bf16 %v5765_v14  ;;  %v5766_v31 = vunpack.i.l.bf16 %v5765_v14  ;;  %v3120_v1 = vpack.c.bf16 %v3009_v5, %v3008_v49 }
 0x3a8   : > { %v3045_v55 = vsel %vm170_vm0, %v8331_v8, %v5742_v47 }
 0x3a9   : > { %v5780_v2 = vpop.permute.xlu1 %5779  ;;  %v3064_v45 = vsel %vm170_vm0, %v9471_v42, %v5766_v31  ;;  %v3065_v14 = vsel %vm170_vm0, %v9472_v27, %v5767_v61 }
 0x3aa   : > { %v8556_v16 = vpop.permute.xlu0 %5774  ;;  %v3111_v60 = vpack.c.bf16 %v3065_v14, %v3064_v45  ;;  %v5782_v20 = vunpack.i.h.bf16 %v5780_v2  ;;  %v5781_v34 = vunpack.i.l.bf16 %v5780_v2  ;;  %v9476_v2 = vld [vmem:[#allocation39_spill] sm:$0xff]  ;;  %v9477_v45 = vld [vmem:[#allocation49_spill] sm:$0xff]  ;;  %v3044_v14 = vsel %vm170_vm0, %v8328_v50, %v5741_v41 }
 0x3ab   : > { %3584 = vmatmul.mubr.bf16.gmra.mrb[124].mxu0 %v3116_v29  ;;  %v3011_v27 = vsel %vm170_vm0, %v9477_v45, %v5732_v18  ;;  %v9478_v18 = vld [vmem:[#allocation37_spill] sm:$0xff]  ;;  %v5762_v45 = vunpack.i.h.bf16 %v8536_v10 }
 0x3ac   : > { %3713 = vmatmul.mubr.bf16.gmra.mrb[108].mxu1 %v3107_v37  ;;  %3591 = vmatprep.mubr.bf16.mxu0 %v3126_v46  ;;  %v5731_v37 = vunpack.i.l.bf16 %v8500_v53  ;;  %v3067_v42 = vsel %vm170_vm0, %v9476_v2, %v5782_v20  ;;  %v5757_v20 = vunpack.i.h.bf16 %v8534_v58 }
 0x3ad   : > { %3720 = vmatprep.mubr.bf16.mxu1 %v3112_v19  ;;  %v3043_v19 = vsel %vm170_vm0, %v8325_v52, %v5727_v48  ;;  %v8578_v61 = vpop.permute.xlu1 %5789  ;;  %v9475_v48 = vld [vmem:[#allocation38_spill] sm:$0xff] }
 0x3ae   : > { %v8566_v12 = vpop.permute.xlu0 %5784  ;;  %v3130_v31 = vpack.c.bf16 %v3043_v19, %v3042_v13  ;;  %v3066_v7 = vsel %vm170_vm0, %v9475_v48, %v5781_v34  ;;  %v3010_v53 = vsel %vm170_vm0, %v8020_v0, %v5731_v37  ;;  %v5747_v13 = vunpack.i.h.bf16 %v8520_v23 }
 0x3af   : > { %v3115_v30 = vpack.c.bf16 %v3067_v42, %v3066_v7  ;;  %v3124_v5 = vpack.c.bf16 %v3011_v27, %v3010_v53  ;;  %v5746_v19 = vunpack.i.l.bf16 %v8520_v23  ;;  %v5756_v34 = vunpack.i.l.bf16 %v8534_v58 }
 0x3b0   : > { %v3047_v58 = vsel %vm170_vm0, %v8353_v26, %v5757_v20  ;;  %v5761_v27 = vunpack.i.l.bf16 %v8536_v10  ;;  %v3015_v10 = vsel %vm170_vm0, %v8105_v3, %v5762_v45  ;;  %v5787_v3 = vunpack.i.h.bf16 %v8566_v12 }
 0x3b1   : > { %v3012_v23 = vsel %vm170_vm0, %v8086_v57, %v5746_v19  ;;  %v3046_v48 = vsel %vm170_vm0, %v8350_v56, %v5756_v34 }
 0x3b2   : > { %v5795_v46 = vpop.permute.xlu0 %5794  ;;  %v3138_v57 = vpack.c.bf16 %v3047_v58, %v3046_v48  ;;  %v3014_v19 = vsel %vm170_vm0, %v8123_v39, %v5761_v27  ;;  %v9483_v48 = vld [vmem:[#allocation57_spill] sm:$0xff] }
 0x3b3   : > { %3592 = vmatmul.mubr.bf16.gmra.mrb[128].mxu0 %v3120_v1  ;;  %v5797_v49 = vunpack.i.h.bf16 %v5795_v46  ;;  %v5796_v24 = vunpack.i.l.bf16 %v5795_v46  ;;  %v3013_v46 = vsel %vm170_vm0, %v8070_v25, %v5747_v13  ;;  %v5772_v25 = vunpack.i.h.bf16 %v8546_v54 }
 0x3b4   : > { %3721 = vmatmul.mubr.bf16.gmra.mrb[112].mxu1 %v3111_v60  ;;  %3599 = vmatprep.mubr.bf16.mxu0 %v3130_v31  ;;  %v3134_v60 = vpack.c.bf16 %v3045_v55, %v3044_v14  ;;  %v9479_v31 = vld [vmem:[#allocation36_spill] sm:$0xff]  ;;  %v3128_v53 = vpack.c.bf16 %v3013_v46, %v3012_v23  ;;  %v5771_v14 = vunpack.i.l.bf16 %v8546_v54  ;;  %v9480_v55 = vld [vmem:[#allocation50_spill] sm:$0xff] }
 0x3b5   : > { %3728 = vmatprep.mubr.bf16.mxu1 %v3116_v29  ;;  %v8594_v29 = vpop.permute.xlu1 %5799  ;;  %v3068_v37 = vsel %vm170_vm0, %v9478_v18, %v5796_v24  ;;  %v3069_v47 = vsel %vm170_vm0, %v9479_v31, %v5797_v49  ;;  %v9481_v49 = vld [vmem:[#allocation52_spill] sm:$0xff]  ;;  %v3049_v54 = vsel %vm170_vm0, %v8360_v6, %v5772_v25  ;;  %v5777_v31 = vunpack.i.h.bf16 %v8556_v16 }
 0x3b6   : > { %v8598_v0 = vpop.permute.xlu0 %5804  ;;  %v3119_v7 = vpack.c.bf16 %v3069_v47, %v3068_v37  ;;  %v3132_v37 = vpack.c.bf16 %v3015_v10, %v3014_v19  ;;  %v5776_v47 = vunpack.i.l.bf16 %v8556_v16  ;;  %v9482_v23 = vld [vmem:[#allocation56_spill] sm:$0xff]  ;;  %v5801_v19 = vunpack.i.l.bf16 %v8594_v29  ;;  %v9486_v10 = vld [vmem:[#allocation62_spill] sm:$0xff] }
 0x3b7   : > { %v9485_v16 = vld [vmem:[#allocation64_spill] sm:$0xff] }
 0x3b8   : > { %v3017_v45 = vsel %vm170_vm0, %v9485_v16, %v5777_v31  ;;  %v9489_v31 = vld [vmem:[#allocation68_spill] sm:$0xff] }
 0x3b9   : > { %v5810_v41 = vpop.permute.xlu1 %5809 }
 0x3ba   : > { %v5812_v2 = vunpack.i.h.bf16 %v5810_v41  ;;  %v5811_v42 = vunpack.i.l.bf16 %v5810_v41  ;;  %v5786_v41 = vunpack.i.l.bf16 %v8566_v12  ;;  %v3051_v12 = vsel %vm170_vm0, %v8377_v51, %v5787_v3 }
 0x3bb   : > { %3600 = vmatmul.mubr.bf16.gmra.mrb[132].mxu0 %v3124_v5 }
 0x3bc   : > { %3729 = vmatmul.mubr.bf16.gmra.mrb[116].mxu1 %v3115_v30  ;;  %3607 = vmatprep.mubr.bf16.mxu0 %v3134_v60  ;;  %v3070_v30 = vsel %vm170_vm0, %v9480_v55, %v5811_v42  ;;  %v3071_v24 = vsel %vm170_vm0, %v9481_v49, %v5812_v2  ;;  %v3048_v60 = vsel %vm170_vm0, %v8357_v28, %v5771_v14  ;;  %v9484_v2 = vld [vmem:[#allocation67_spill] sm:$0xff]  ;;  %v5791_v49 = vunpack.i.l.bf16 %v8578_v61 }
 0x3bd   : > { %3736 = vmatprep.mubr.bf16.mxu1 %v3120_v1  ;;  %v8614_v1 = vpop.permute.xlu0 %5814  ;;  %v3123_v20 = vpack.c.bf16 %v3071_v24, %v3070_v30  ;;  %v3142_v39 = vpack.c.bf16 %v3049_v54, %v3048_v60  ;;  %v3016_v42 = vsel %vm170_vm0, %v9484_v2, %v5776_v47  ;;  %v3050_v27 = vsel %vm170_vm0, %v8374_v15, %v5786_v41  ;;  %v9487_v54 = vld [vmem:[#allocation63_spill] sm:$0xff] }
 0x3be   : > { %v3136_v55 = vpack.c.bf16 %v3017_v45, %v3016_v42  ;;  %v5792_v30 = vunpack.i.h.bf16 %v8578_v61  ;;  %v3146_v24 = vpack.c.bf16 %v3051_v12, %v3050_v27  ;;  %v5816_v2 = vunpack.i.l.bf16 %v8614_v1  ;;  %v9490_v42 = vld [vmem:[#allocation65_spill] sm:$0xff]  ;;  %v9491_v45 = vld [vmem:[#allocation66_spill] sm:$0xff] }
 0x3c0   : > { %v3019_v47 = vsel %vm170_vm0, %v9489_v31, %v5792_v30 }
 0x3c1   : > { %v5825_v13 = vpop.permute.xlu0 %5824 }
 0x3c2   : > { %v5827_v34 = vunpack.i.h.bf16 %v5825_v13  ;;  %v5826_v18 = vunpack.i.l.bf16 %v5825_v13  ;;  %v5802_v13 = vunpack.i.h.bf16 %v8594_v29  ;;  %v3052_v29 = vsel %vm170_vm0, %v8380_v36, %v5801_v19 }
 0x3c3   : > { %3608 = vmatmul.mubr.bf16.gmra.mrb[136].mxu0 %v3128_v53 }
 0x3c4   : > { %3737 = vmatmul.mubr.bf16.gmra.mrb[120].mxu1 %v3119_v7  ;;  %3615 = vmatprep.mubr.bf16.mxu0 %v3138_v57  ;;  %v3072_v46 = vsel %vm170_vm0, %v9482_v23, %v5826_v18  ;;  %v3073_v58 = vsel %vm170_vm0, %v9483_v48, %v5827_v34  ;;  %v5947_v57 = vld [vmem:[%s9056_s2 + $0x10] sm:$0xff]   ;;  %v9488_v18 = vld [vmem:[#allocation69_spill] sm:$0xff]  ;;  %v5806_v48 = vunpack.i.l.bf16 %v8598_v0 }
 0x3c5   : > { %3744 = vmatprep.mubr.bf16.mxu1 %v3124_v5  ;;  %v8632_v5 = vpop.permute.xlu1 %5819  ;;  %5294 = vmatprep.subr.bf16.mxu1 %v5947_v57  ;;  %v5835_v34 = vpop.permute.xlu0 %5834  ;;  %v3018_v61 = vsel %vm170_vm0, %v9488_v18, %v5791_v49  ;;  %v9497_v18 = vld [vmem:[#allocation73_spill] sm:$0xff] }
 0x3c6   : > { %5295 = vmatpush3.bf16.msra.mxu1 %v5947_v57  ;;  %v5837_v3 = vunpack.i.h.bf16 %v5835_v34  ;;  %v5836_v41 = vunpack.i.l.bf16 %v5835_v34  ;;  %v3140_v23 = vpack.c.bf16 %v3019_v47, %v3018_v61  ;;  %v9498_v47 = vld [vmem:[#allocation84_spill] sm:$0xff] }
 0x3c8   : > { %v3076_v16 = vsel %vm170_vm0, %v9490_v42, %v5836_v41  ;;  %v3077_v27 = vsel %vm170_vm0, %v9491_v45, %v5837_v3 }
 0x3c9   : > { %v5830_v7 = vpop.permute.xlu1 %5829  ;;  %v3135_v49 = vpack.c.bf16 %v3077_v27, %v3076_v16  ;;  %v5845_v31 = vpop.permute.xlu0 %5844  ;;  %v3101_v27 = vpack.c.bf16 %v8092_v9, %v8089_v32 }
 0x3ca   : > { %v5832_v25 = vunpack.i.h.bf16 %v5830_v7  ;;  %v5831_v14 = vunpack.i.l.bf16 %v5830_v7  ;;  %v5817_v7 = vunpack.i.h.bf16 %v8614_v1  ;;  %v9495_v1 = vld [vmem:[#allocation95_spill] sm:$0xff]  ;;  %v5846_v41 = vunpack.i.l.bf16 %v5845_v31 }
 0x3cb   : > { %3616 = vmatmul.mubr.bf16.gmra.mrb[140].mxu0 %v3132_v37 }
 0x3cc   : > { %3745 = vmatmul.mubr.bf16.gmra.mrb[124].mxu1 %v3123_v20  ;;  %3623 = vmatprep.mubr.bf16.mxu0 %v3142_v39  ;;  %v3074_v60 = vsel %vm170_vm0, %v9486_v10, %v5831_v14  ;;  %v3075_v20 = vsel %vm170_vm0, %v9487_v54, %v5832_v25  ;;  %v9494_v14 = vld [vmem:[#allocation94_spill] sm:$0xff]  ;;  %v5822_v10 = vunpack.i.h.bf16 %v8632_v5 }
 0x3cd   : > { %3752 = vmatprep.mubr.bf16.mxu1 %v3128_v53  ;;  %v3127_v53 = vpack.c.bf16 %v3073_v58, %v3072_v46  ;;  %v3131_v39 = vpack.c.bf16 %v3075_v20, %v3074_v60  ;;  %v5807_v46 = vunpack.i.h.bf16 %v8598_v0  ;;  %v5840_v12 = vpop.permute.xlu1 %5839  ;;  %v9493_v0 = vld [vmem:[#allocation76_spill] sm:$0xff]  ;;  %v3054_v30 = vsel %vm170_vm0, %v9494_v14, %v5816_v2  ;;  %v5855_v16 = vpop.permute.xlu0 %5854 }
 0x3ce   : > { %v5821_v60 = vunpack.i.l.bf16 %v8632_v5  ;;  %v9496_v20 = vld [vmem:[#allocation72_spill] sm:$0xff]  ;;  %v5847_v5 = vunpack.i.h.bf16 %v5845_v31 }
 0x3cf   : > { %v3021_v25 = vsel %vm170_vm0, %v9493_v0, %v5807_v46  ;;  %v9502_v0 = vld [vmem:[#allocation85_spill] sm:$0xff] }
 0x3d1   : > { %v5850_v42 = vpop.permute.xlu1 %5849  ;;  %v5865_v32 = vpop.permute.xlu0 %5864 }
 0x3d3   : > { %3624 = vmatmul.mubr.bf16.gmra.mrb[144].mxu0 %v3136_v55 }
 0x3d4   : > { %3753 = vmatmul.mubr.bf16.gmra.mrb[128].mxu1 %v3127_v53  ;;  %3631 = vmatprep.mubr.bf16.mxu0 %v3146_v24  ;;  %v9492_v53 = vld [vmem:[#allocation79_spill] sm:$0xff]  ;;  %v5842_v24 = vunpack.i.h.bf16 %v5840_v12 }
 0x3d5   : > { %3760 = vmatprep.mubr.bf16.mxu1 %v3132_v37  ;;  %v3053_v37 = vsel %vm170_vm0, %v8390_v38, %v5802_v13  ;;  %v3020_v57 = vsel %vm170_vm0, %v9492_v53, %v5806_v48  ;;  %v5841_v13 = vunpack.i.l.bf16 %v5840_v12  ;;  %v9500_v48 = vld [vmem:[#allocation77_spill] sm:$0xff]  ;;  %v5852_v12 = vunpack.i.h.bf16 %v5850_v42  ;;  %v5860_v9 = vpop.permute.xlu1 %5859 }
 0x3d6   : > { %v3150_v58 = vpack.c.bf16 %v3053_v37, %v3052_v29  ;;  %v3144_v19 = vpack.c.bf16 %v3021_v25, %v3020_v57  ;;  %v3079_v61 = vsel %vm170_vm0, %v9497_v18, %v5842_v24  ;;  %v3022_v29 = vsel %vm170_vm0, %v9498_v47, %v5821_v60  ;;  %v9499_v37 = vld [vmem:[#allocation83_spill] sm:$0xff]  ;;  %v9507_v47 = vld [vmem:[#allocation90_spill] sm:$0xff] }
 0x3d7   : > { %v3078_v34 = vsel %vm170_vm0, %v9496_v20, %v5841_v13  ;;  %v5851_v53 = vunpack.i.l.bf16 %v5850_v42  ;;  %v5857_v57 = vunpack.i.h.bf16 %v5855_v16  ;;  %v9505_v13 = vld [vmem:[#allocation74_spill] sm:$0xff]  ;;  %v5862_v60 = vunpack.i.h.bf16 %v5860_v9 }
 0x3d8   : > { %v3139_v3 = vpack.c.bf16 %v3079_v61, %v3078_v34  ;;  %v3109_v34 = vpack.c.bf16 %v8185_v17, %v8182_v40  ;;  %v3113_v18 = vpack.c.bf16 %v9461_v4, %v9460_v62  ;;  %v9506_v61 = vld [vmem:[#allocation89_spill] sm:$0xff] }
 0x3d9   : > { %v3082_v25 = vsel %vm170_vm0, %v9502_v0, %v5851_v53  ;;  %v5870_v17 = vpop.permute.xlu1 %5869 }
 0x3da   : > { %v5872_v4 = vunpack.i.h.bf16 %v5870_v17 }
 0x3db   : > { %3632 = vmatmul.mubr.bf16.gmra.mrb[148].mxu0 %v3140_v23 }
 0x3dc   : > { %3761 = vmatmul.mubr.bf16.gmra.mrb[132].mxu1 %v3131_v39  ;;  %3639 = vmatprep.mubr.bf16.mxu0 %v3150_v58  ;;  %v3023_v39 = vsel %vm170_vm0, %v9499_v37, %v5822_v10  ;;  %v3080_v58 = vsel %vm170_vm0, %v9500_v48, %v5846_v41  ;;  %v5866_v10 = vunpack.i.l.bf16 %v5865_v32  ;;  %v9508_v37 = vld [vmem:[#allocation87_spill] sm:$0xff]  ;;  %v5871_v41 = vunpack.i.l.bf16 %v5870_v17  ;;  %v9510_v48 = vld [vmem:[#allocation92_spill] sm:$0xff] }
 0x3dd   : > { %3768 = vmatprep.mubr.bf16.mxu1 %v3136_v55  ;;  %v3055_v55 = vsel %vm170_vm0, %v9495_v1, %v5817_v7  ;;  %v3148_v46 = vpack.c.bf16 %v3023_v39, %v3022_v29  ;;  %v9501_v7 = vld [vmem:[#allocation78_spill] sm:$0xff] }
 0x3de   : > { %v3154_v54 = vpack.c.bf16 %v3055_v55, %v3054_v30  ;;  %v3081_v2 = vsel %vm170_vm0, %v9501_v7, %v5847_v5  ;;  %v9503_v30 = vld [vmem:[#allocation86_spill] sm:$0xff]  ;;  %v3090_v31 = vsel %vm170_vm0, %v9506_v61, %v5866_v10  ;;  %v9511_v7 = vld [vmem:[#allocation93_spill] sm:$0xff] }
 0x3df   : > { %v3143_v45 = vpack.c.bf16 %v3081_v2, %v3080_v58  ;;  %v3083_v55 = vsel %vm170_vm0, %v9503_v30, %v5852_v12  ;;  %v3086_v58 = vsel %vm170_vm0, %v9510_v48, %v5871_v41  ;;  %v3087_v2 = vsel %vm170_vm0, %v9511_v7, %v5872_v4 }
 0x3e0   : > { %v3155_v42 = vpack.c.bf16 %v3087_v2, %v3086_v58 }
 0x3e3   : > { %3640 = vmatmul.mubr.bf16.gmra.mrb[152].mxu0 %v3144_v19 }
 0x3e4   : > { %3769 = vmatmul.mubr.bf16.gmra.mrb[136].mxu1 %v3135_v49  ;;  %3647 = vmatprep.mubr.bf16.mxu0 %v3154_v54  ;;  %v9504_v49 = vld [vmem:[#allocation75_spill] sm:$0xff]  ;;  %v5861_v54 = vunpack.i.l.bf16 %v5860_v9 }
 0x3e5   : > { %3776 = vmatprep.mubr.bf16.mxu1 %v3140_v23  ;;  %v3096_v23 = vpack.c.bf16 %v8038_v63, %v8025_v59  ;;  %v5856_v63 = vunpack.i.l.bf16 %v5855_v16  ;;  %v3105_v59 = vpack.c.bf16 %v8129_v22, %v8126_v33  ;;  %v3147_v33 = vpack.c.bf16 %v3083_v55, %v3082_v25 }
 0x3e6   : > { %v5867_v22 = vunpack.i.h.bf16 %v5865_v32  ;;  %v3084_v39 = vsel %vm170_vm0, %v9508_v37, %v5861_v54  ;;  %v3125_v16 = vpack.c.bf16 %v8325_v52, %v8322_v43  ;;  %v3141_v52 = vpack.c.bf16 %v8377_v51, %v8374_v15  ;;  %v9514_v15 = vld [vmem:[#allocation80_spill] sm:$0xff] }
 0x3e7   : > { %v3088_v24 = vsel %vm170_vm0, %v9504_v49, %v5856_v63  ;;  %v2984_v43 = vrot.slane %v9507_v47, 2 }
 0x3e8   : > { %v3091_v29 = vsel %vm170_vm0, %v9507_v47, %v5867_v22 }
 0x3e9   : > { %v3156_v5 = vpack.c.bf16 %v3091_v29, %v3090_v31 }
 0x3eb   : > { %3648 = vmatmul.mubr.bf16.gmra.mrb[156].mxu0 %v3148_v46 }
 0x3ec   : > { %3777 = vmatmul.mubr.bf16.gmra.mrb[140].mxu1 %v3139_v3  ;;  %5262 = vmatprep.mubr.msk.bf16.mxu0 %vm170_vm0, %v3096_v23  ;;  %v9509_v3 = vld [vmem:[#allocation88_spill] sm:$0xff]  ;;  %v3121_v23 = vpack.c.bf16 %v8290_v35, %v8287_v21  ;;  %v3133_v21 = vpack.c.bf16 %v8353_v26, %v8350_v56  ;;  %v5948_v35 = vld [vmem:[%s9056_s2 + $0x18] sm:$0xff]   ;;  %v2983_v26 = vrot.slane %v9506_v61, 2 }
 0x3ed   : > { %3784 = vmatprep.mubr.bf16.mxu1 %v3144_v19  ;;  %v3089_v19 = vsel %vm170_vm0, %v9505_v13, %v5857_v57  ;;  %v3085_v40 = vsel %vm170_vm0, %v9509_v3, %v5862_v60  ;;  %5296 = vmatprep.subr.bf16.mxu1 %v5948_v35 }
 0x3ee   : > { %v3152_v20 = vpack.c.bf16 %v3089_v19, %v3088_v24  ;;  %v3151_v62 = vpack.c.bf16 %v3085_v40, %v3084_v39  ;;  %5297 = vmatpush3.bf16.msra.mxu1 %v5948_v35 }
 0x3f3   : > { %5263 = vmatmul.mubr.msk.bf16.vlgmr.msra.gmra.mrb[160].mxu0 %vm170_vm0, %v3101_v27 }
 0x3f4   : > { %3785 = vmatmul.mubr.bf16.gmra.mrb[144].mxu1 %v3143_v45  ;;  %5266 = vmatprep.mubr.msk.bf16.mxu0 %vm170_vm0, %v3105_v59 }
 0x3f5   : > { %3792 = vmatprep.mubr.bf16.mxu1 %v3148_v46  ;;  %v3117_v46 = vpack.c.bf16 %v9466_v44, %v8263_v11  ;;  %v3129_v11 = vpack.c.bf16 %v8331_v8, %v8328_v50  ;;  %v3137_v44 = vpack.c.bf16 %v8360_v6, %v8357_v28  ;;  %v3145_v50 = vpack.c.bf16 %v8390_v38, %v8380_v36  ;;  %v9512_v8 = vld [vmem:[#allocation91_spill] sm:$0xff]  ;;  %v9513_v6 = vld [vmem:[#allocation81_spill] sm:$0xff] }
 0x3f6   : > { %v2986_v56 = vrot.slane %v9512_v8, 2  ;;  %v3149_v28 = vpack.c.bf16 %v9495_v1, %v9494_v14  ;;  %v9515_v51 = vpack.c.bf16 %v9513_v6, %v9514_v15  ;;  %v2985_v38 = vsel %vm602_vm3, %v2983_v26, %v2984_v43 }
 0x3f8   : > { %v2987_v36 = vsel %vm602_vm3, %v2984_v43, %v2986_v56 }
 0x3f9   : > { %v3157_v45 = vpack.c.bf16 %v2987_v36, %v2985_v38 }
 0x3fb   : > { %5267 = vmatmul.mubr.msk.bf16.gmra.mrb[164].mxu0 %vm170_vm0, %v3109_v34 }
 0x3fc   : > { %3793 = vmatmul.mubr.bf16.gmra.mrb[148].mxu1 %v3147_v33  ;;  %5270 = vmatprep.mubr.msk.bf16.mxu0 %vm170_vm0, %v3113_v18 }
 0x3fd   : > { %3800 = vmatprep.mubr.bf16.mxu1 %v3152_v20 }
 0x403   : > { %5271 = vmatmul.mubr.msk.bf16.gmra.mrb[168].mxu0 %vm170_vm0, %v3117_v46 }
 0x404   : > { %3801 = vmatmul.mubr.bf16.gmra.mrb[152].mxu1 %v3151_v62  ;;  %5274 = vmatprep.mubr.msk.bf16.mxu0 %vm170_vm0, %v3121_v23 }
 0x405   : > { %3808 = vmatprep.mubr.bf16.mxu1 %v3156_v5 }
 0x40b   : > { %5275 = vmatmul.mubr.msk.bf16.gmra.mrb[172].mxu0 %vm170_vm0, %v3125_v16 }
 0x40c   : > { %3809 = vmatmul.mubr.bf16.gmra.mrb[156].mxu1 %v3155_v42  ;;  %5278 = vmatprep.mubr.msk.bf16.mxu0 %vm170_vm0, %v3129_v11 }
 0x413   : > { %5279 = vmatmul.mubr.msk.bf16.gmra.mrb[176].mxu0 %vm170_vm0, %v3133_v21 }
 0x414   : > { %5282 = vmatprep.mubr.msk.bf16.mxu0 %vm170_vm0, %v3137_v44 }
 0x41b   : > { %5283 = vmatmul.mubr.msk.bf16.gmra.mrb[180].mxu0 %vm170_vm0, %v3141_v52 }
 0x41c   : > { %5286 = vmatprep.mubr.msk.bf16.mxu0 %vm170_vm0, %v3145_v50 }
 0x423   : > { %5287 = vmatmul.mubr.msk.bf16.gmra.mrb[184].mxu0 %vm170_vm0, %v3149_v28 }
 0x424   : > { %5290 = vmatprep.mubr.msk.bf16.mxu0 %vm170_vm0, %v9515_v51 }
 0x42b   : > { %5291 = vmatmul.mubr.msk.bf16.gmra.mrb[188].mxu0 %vm170_vm0, %v3157_v45 }
 0x446   : > { %v4932_v27 = vpop.f32.mrb[96].mxu0 }
 0x447   : > { %v4933_v12 = vpop.f32.mrb[97].mxu0 }
 0x448   : > { %v4934_v53 = vadd.f32 %v4933_v12, %v4932_v27  ;;  %v4935_v57 = vpop.f32.mrb[98].mxu0 }
 0x449   : > { %v4936_v63 = vpop.f32.mrb[99].mxu0 }
 0x44a   : > { %v4937_v14 = vadd.f32 %v4936_v63, %v4935_v57 }
 0x44e   : > { %v4938_v1 = vpop.f32.mrb[100].mxu0 }
 0x44f   : > { %v4939_v59 = vpop.f32.mrb[101].mxu0 }
 0x450   : > { %v4940_v0 = vadd.f32 %v4939_v59, %v4938_v1  ;;  %v4941_v25 = vpop.f32.mrb[102].mxu0 }
 0x451   : > { %v4942_v30 = vpop.f32.mrb[103].mxu0 }
 0x452   : > { %v4943_v55 = vadd.f32 %v4942_v30, %v4941_v25 }
 0x456   : > { %v4944_v32 = vpop.f32.mrb[104].mxu0 }
 0x457   : > { %v4945_v9 = vpop.f32.mrb[105].mxu0 }
 0x458   : > { %v4946_v49 = vadd.f32 %v4945_v9, %v4944_v32  ;;  %v4947_v24 = vpop.f32.mrb[106].mxu0 }
 0x459   : > { %v4948_v13 = vpop.f32.mrb[107].mxu0 }
 0x45a   : > { %v4949_v19 = vadd.f32 %v4948_v13, %v4947_v24 }
 0x45e   : > { %v4950_v33 = vpop.f32.mrb[108].mxu0 }
 0x45f   : > { %v4951_v22 = vpop.f32.mrb[109].mxu0 }
 0x460   : > { %v4952_v10 = vadd.f32 %v4951_v22, %v4950_v33  ;;  %v4953_v60 = vpop.f32.mrb[110].mxu0 }
 0x461   : > { %v4954_v54 = vpop.f32.mrb[111].mxu0 }
 0x462   : > { %v4955_v20 = vadd.f32 %v4954_v54, %v4953_v60 }
 0x466   : > { %v4956_v18 = vpop.f32.mrb[112].mxu0 }
 0x467   : > { %v5044_v34 = vpop.f32.mrb[96].mxu1  ;;  %v4957_v47 = vpop.f32.mrb[113].mxu0 }
 0x468   : > { %v5045_v61 = vpop.f32.mrb[97].mxu1  ;;  %v4958_v37 = vadd.f32 %v4957_v47, %v4956_v18  ;;  %v4959_v39 = vpop.f32.mrb[114].mxu0 }
 0x469   : > { %v5046_v31 = vadd.f32 %v5045_v61, %v5044_v34  ;;  %v5047_v29 = vpop.f32.mrb[98].mxu1  ;;  %v4960_v17 = vpop.f32.mrb[115].mxu0 }
 0x46a   : > { %v5048_v3 = vpop.f32.mrb[99].mxu1  ;;  %v4961_v62 = vadd.f32 %v4960_v17, %v4959_v39 }
 0x46b   : > { %v5049_v40 = vadd.f32 %v5048_v3, %v5047_v29  ;;  %v8774_v5 = vadd.f32 %v5046_v31, %v4934_v53 }
 0x46d   : > { %v8776_v4 = vadd.f32 %v5049_v40, %v4937_v14 }
 0x46e   : > { %v4962_v46 = vpop.f32.mrb[116].mxu0 }
 0x46f   : > { %v5050_v41 = vpop.f32.mrb[100].mxu1  ;;  %v4963_v58 = vpop.f32.mrb[117].mxu0 }
 0x470   : > { %v5051_v23 = vpop.f32.mrb[101].mxu1  ;;  %v4964_v2 = vadd.f32 %v4963_v58, %v4962_v46  ;;  %v4965_v42 = vpop.f32.mrb[118].mxu0 }
 0x471   : > { %v5052_v48 = vadd.f32 %v5051_v23, %v5050_v41  ;;  %v5053_v7 = vpop.f32.mrb[102].mxu1  ;;  %v4966_v21 = vpop.f32.mrb[119].mxu0 }
 0x472   : > { %v5054_v16 = vpop.f32.mrb[103].mxu1  ;;  %v4967_v44 = vadd.f32 %v4966_v21, %v4965_v42 }
 0x473   : > { %v5055_v11 = vadd.f32 %v5054_v16, %v5053_v7  ;;  %v8778_v35 = vadd.f32 %v5052_v48, %v4940_v0 }
 0x475   : > { %v8780_v52 = vadd.f32 %v5055_v11, %v4943_v55 }
 0x476   : > { %v4968_v26 = vpop.f32.mrb[120].mxu0 }
 0x477   : > { %v5056_v50 = vpop.f32.mrb[104].mxu1  ;;  %v4969_v56 = vpop.f32.mrb[121].mxu0 }
 0x478   : > { %v5057_v43 = vpop.f32.mrb[105].mxu1  ;;  %v4970_v6 = vadd.f32 %v4969_v56, %v4968_v26  ;;  %v4971_v15 = vpop.f32.mrb[122].mxu0 }
 0x479   : > { %v5058_v8 = vadd.f32 %v5057_v43, %v5056_v50  ;;  %v5059_v28 = vpop.f32.mrb[106].mxu1  ;;  %v4972_v36 = vpop.f32.mrb[123].mxu0 }
 0x47a   : > { %v5060_v51 = vpop.f32.mrb[107].mxu1  ;;  %v4973_v27 = vadd.f32 %v4972_v36, %v4971_v15 }
 0x47b   : > { %v5061_v38 = vadd.f32 %v5060_v51, %v5059_v28  ;;  %v8782_v45 = vadd.f32 %v5058_v8, %v4946_v49 }
 0x47d   : > { %v8784_v12 = vadd.f32 %v5061_v38, %v4949_v19 }
 0x47e   : > { %v4974_v57 = vpop.f32.mrb[124].mxu0 }
 0x47f   : > { %v5062_v53 = vpop.f32.mrb[108].mxu1  ;;  %v4975_v1 = vpop.f32.mrb[125].mxu0 }
 0x480   : > { %v5063_v63 = vpop.f32.mrb[109].mxu1  ;;  %v4976_v0 = vadd.f32 %v4975_v1, %v4974_v57  ;;  %v4977_v25 = vpop.f32.mrb[126].mxu0 }
 0x481   : > { %v5064_v14 = vadd.f32 %v5063_v63, %v5062_v53  ;;  %v5065_v59 = vpop.f32.mrb[110].mxu1  ;;  %v4978_v32 = vpop.f32.mrb[127].mxu0 }
 0x482   : > { %v5066_v30 = vpop.f32.mrb[111].mxu1  ;;  %v4979_v24 = vadd.f32 %v4978_v32, %v4977_v25 }
 0x483   : > { %v5067_v55 = vadd.f32 %v5066_v30, %v5065_v59  ;;  %v8786_v9 = vadd.f32 %v5064_v14, %v4952_v10 }
 0x485   : > { %v8788_v13 = vadd.f32 %v5067_v55, %v4955_v20 }
 0x486   : > { %v4980_v33 = vpop.f32.mrb[128].mxu0 }
 0x487   : > { %v5068_v49 = vpop.f32.mrb[112].mxu1  ;;  %v4981_v60 = vpop.f32.mrb[129].mxu0 }
 0x488   : > { %v5069_v19 = vpop.f32.mrb[113].mxu1  ;;  %v4982_v34 = vadd.f32 %v4981_v60, %v4980_v33  ;;  %v4983_v18 = vpop.f32.mrb[130].mxu0 }
 0x489   : > { %v5070_v22 = vadd.f32 %v5069_v19, %v5068_v49  ;;  %v5071_v54 = vpop.f32.mrb[114].mxu1  ;;  %v4984_v47 = vpop.f32.mrb[131].mxu0 }
 0x48a   : > { %v5072_v61 = vpop.f32.mrb[115].mxu1  ;;  %v4985_v39 = vadd.f32 %v4984_v47, %v4983_v18 }
 0x48b   : > { %v5073_v31 = vadd.f32 %v5072_v61, %v5071_v54  ;;  %v8790_v29 = vadd.f32 %v5070_v22, %v4958_v37 }
 0x48d   : > { %v8792_v3 = vadd.f32 %v5073_v31, %v4961_v62 }
 0x48e   : > { %v4986_v40 = vpop.f32.mrb[132].mxu0 }
 0x48f   : > { %v5074_v10 = vpop.f32.mrb[116].mxu1  ;;  %v4987_v41 = vpop.f32.mrb[133].mxu0 }
 0x490   : > { %v5075_v20 = vpop.f32.mrb[117].mxu1  ;;  %v4988_v23 = vadd.f32 %v4987_v41, %v4986_v40  ;;  %v4989_v48 = vpop.f32.mrb[134].mxu0 }
 0x491   : > { %v5076_v17 = vadd.f32 %v5075_v20, %v5074_v10  ;;  %v5077_v46 = vpop.f32.mrb[118].mxu1  ;;  %v4990_v42 = vpop.f32.mrb[135].mxu0 }
 0x492   : > { %v5078_v58 = vpop.f32.mrb[119].mxu1  ;;  %v4991_v11 = vadd.f32 %v4990_v42, %v4989_v48 }
 0x493   : > { %v5079_v7 = vadd.f32 %v5078_v58, %v5077_v46  ;;  %v8794_v16 = vadd.f32 %v5076_v17, %v4964_v2 }
 0x495   : > { %v8796_v21 = vadd.f32 %v5079_v7, %v4967_v44 }
 0x496   : > { %v4992_v50 = vpop.f32.mrb[136].mxu0 }
 0x497   : > { %v5080_v37 = vpop.f32.mrb[120].mxu1  ;;  %v4993_v43 = vpop.f32.mrb[137].mxu0 }
 0x498   : > { %v5081_v62 = vpop.f32.mrb[121].mxu1  ;;  %v4994_v56 = vadd.f32 %v4993_v43, %v4992_v50  ;;  %v4995_v28 = vpop.f32.mrb[138].mxu0 }
 0x499   : > { %v5082_v26 = vadd.f32 %v5081_v62, %v5080_v37  ;;  %v5083_v8 = vpop.f32.mrb[122].mxu1  ;;  %v4996_v38 = vpop.f32.mrb[139].mxu0 }
 0x49a   : > { %v5084_v15 = vpop.f32.mrb[123].mxu1  ;;  %v4997_v53 = vadd.f32 %v4996_v38, %v4995_v28 }
 0x49b   : > { %v5085_v51 = vadd.f32 %v5084_v15, %v5083_v8  ;;  %v8798_v36 = vadd.f32 %v5082_v26, %v4970_v6 }
 0x49d   : > { %v8800_v57 = vadd.f32 %v5085_v51, %v4973_v27 }
 0x49e   : > { %v4998_v63 = vpop.f32.mrb[140].mxu0 }
 0x49f   : > { %v5086_v2 = vpop.f32.mrb[124].mxu1  ;;  %v4999_v1 = vpop.f32.mrb[141].mxu0 }
 0x4a0   : > { %v5087_v44 = vpop.f32.mrb[125].mxu1  ;;  %v5000_v25 = vadd.f32 %v4999_v1, %v4998_v63  ;;  %v5001_v30 = vpop.f32.mrb[142].mxu0 }
 0x4a1   : > { %v5088_v14 = vadd.f32 %v5087_v44, %v5086_v2  ;;  %v5089_v59 = vpop.f32.mrb[126].mxu1  ;;  %v5002_v49 = vpop.f32.mrb[143].mxu0 }
 0x4a2   : > { %v5090_v55 = vpop.f32.mrb[127].mxu1  ;;  %v5003_v19 = vadd.f32 %v5002_v49, %v5001_v30 }
 0x4a3   : > { %v5091_v32 = vadd.f32 %v5090_v55, %v5089_v59  ;;  %v8802_v33 = vadd.f32 %v5088_v14, %v4976_v0 }
 0x4a5   : > { %v8804_v22 = vadd.f32 %v5091_v32, %v4979_v24 }
 0x4a6   : > { %v5004_v60 = vpop.f32.mrb[144].mxu0 }
 0x4a7   : > { %v5092_v6 = vpop.f32.mrb[128].mxu1  ;;  %v5005_v18 = vpop.f32.mrb[145].mxu0 }
 0x4a8   : > { %v5093_v27 = vpop.f32.mrb[129].mxu1  ;;  %v8806_v31 = vadd.f32 %v5005_v18, %v5004_v60  ;;  %v5007_v47 = vpop.f32.mrb[146].mxu0 }
 0x4a9   : > { %v5094_v54 = vadd.f32 %v5093_v27, %v5092_v6  ;;  %v5095_v61 = vpop.f32.mrb[130].mxu1  ;;  %v5008_v20 = vpop.f32.mrb[147].mxu0 }
 0x4aa   : > { %v5096_v10 = vpop.f32.mrb[131].mxu1  ;;  %v5009_v41 = vadd.f32 %v5008_v20, %v5007_v47 }
 0x4ab   : > { %v5097_v40 = vadd.f32 %v5096_v10, %v5095_v61  ;;  %v8808_v17 = vadd.f32 %v5094_v54, %v4982_v34 }
 0x4ad   : > { %v8810_v0 = vadd.f32 %v5097_v40, %v4985_v39 }
 0x4ae   : > { %v5010_v24 = vpop.f32.mrb[148].mxu0 }
 0x4af   : > { %v5098_v46 = vpop.f32.mrb[132].mxu1  ;;  %v5011_v7 = vpop.f32.mrb[149].mxu0 }
 0x4b0   : > { %v5099_v48 = vpop.f32.mrb[133].mxu1  ;;  %v8812_v37 = vadd.f32 %v5011_v7, %v5010_v24  ;;  %v5013_v50 = vpop.f32.mrb[150].mxu0 }
 0x4b1   : > { %v5100_v58 = vadd.f32 %v5099_v48, %v5098_v46  ;;  %v5101_v42 = vpop.f32.mrb[134].mxu1  ;;  %v5014_v43 = vpop.f32.mrb[151].mxu0 }
 0x4b2   : > { %v5102_v62 = vpop.f32.mrb[135].mxu1  ;;  %v8816_v28 = vadd.f32 %v5014_v43, %v5013_v50 }
 0x4b3   : > { %v5103_v26 = vadd.f32 %v5102_v62, %v5101_v42  ;;  %v8814_v8 = vadd.f32 %v5100_v58, %v4988_v23 }
 0x4b5   : > { %v8818_v34 = vadd.f32 %v5103_v26, %v4991_v11 }
 0x4b6   : > { %v5016_v15 = vpop.f32.mrb[152].mxu0 }
 0x4b7   : > { %v5104_v39 = vpop.f32.mrb[136].mxu1  ;;  %v5017_v2 = vpop.f32.mrb[153].mxu0 }
 0x4b8   : > { %v5105_v51 = vpop.f32.mrb[137].mxu1  ;;  %v8820_v44 = vadd.f32 %v5017_v2, %v5016_v15  ;;  %v5019_v14 = vpop.f32.mrb[154].mxu0 }
 0x4b9   : > { %v5106_v38 = vadd.f32 %v5105_v51, %v5104_v39  ;;  %v5107_v63 = vpop.f32.mrb[138].mxu1  ;;  %v5020_v30 = vpop.f32.mrb[155].mxu0 }
 0x4ba   : > { %v5108_v1 = vpop.f32.mrb[139].mxu1  ;;  %v8824_v23 = vadd.f32 %v5020_v30, %v5019_v14 }
 0x4bb   : > { %v5109_v59 = vadd.f32 %v5108_v1, %v5107_v63  ;;  %v8822_v55 = vadd.f32 %v5106_v38, %v4994_v56 }
 0x4bd   : > { %v8826_v32 = vadd.f32 %v5109_v59, %v4997_v53 }
 0x4be   : > { %v5022_v49 = vpop.f32.mrb[156].mxu0 }
 0x4bf   : > { %v5110_v11 = vpop.f32.mrb[140].mxu1  ;;  %v5023_v27 = vpop.f32.mrb[157].mxu0 }
 0x4c0   : > { %v5111_v6 = vpop.f32.mrb[141].mxu1  ;;  %v8828_v18 = vadd.f32 %v5023_v27, %v5022_v49  ;;  %v5025_v61 = vpop.f32.mrb[158].mxu0 }
 0x4c1   : > { %v5112_v60 = vadd.f32 %v5111_v6, %v5110_v11  ;;  %v5113_v54 = vpop.f32.mrb[142].mxu1  ;;  %v5026_v40 = vpop.f32.mrb[159].mxu0 }
 0x4c2   : > { %v5114_v47 = vpop.f32.mrb[143].mxu1  ;;  %v8832_v56 = vadd.f32 %v5026_v40, %v5025_v61 }
 0x4c3   : > { %v5115_v10 = vadd.f32 %v5114_v47, %v5113_v54  ;;  %v8830_v20 = vadd.f32 %v5112_v60, %v5000_v25 }
 0x4c5   : > { %v8834_v46 = vadd.f32 %v5115_v10, %v5003_v19 }
 0x4c6   : > { %v5264_v48 = vpop.f32.mrb[160].mxu0 }
 0x4c7   : > { %v5116_v53 = vpop.f32.mrb[144].mxu1  ;;  %v3860_v7 = vadd.f32 %v5264_v48, %v8778_v35  ;;  %v3851_v50 = vpop.f32.mrb[161].mxu0 }
 0x4c8   : > { %v5117_v24 = vpop.f32.mrb[145].mxu1  ;;  %v3852_v62 = vadd.f32 %v3851_v50, %v8774_v5  ;;  %v5265_v43 = vpop.f32.mrb[162].mxu0 }
 0x4c9   : > { %v5118_v58 = vadd.f32 %v5117_v24, %v5116_v53  ;;  %v5119_v42 = vpop.f32.mrb[146].mxu1  ;;  %v3863_v25 = vadd.f32 %v5265_v43, %v8780_v52  ;;  %v3854_v15 = vpop.f32.mrb[163].mxu0  ;;  %v3980_v38 = vmax.f32 %v3860_v7, 0.0 }
 0x4ca   : > { %v5120_v26 = vpop.f32.mrb[147].mxu1  ;;  %v3855_v19 = vadd.f32 %v3854_v15, %v8776_v4  ;;  %v3978_v35 = vmax.f32 %v3852_v62, 0.0 }
 0x4cb   : > { %v5121_v39 = vadd.f32 %v5120_v26, %v5119_v42  ;;  %v8840_v51 = vadd.f32 %v5118_v58, %v8806_v31  ;;  %v3981_v2 = vmax.f32 %v3863_v25, 0.0 }
 0x4cc   : > { %v3979_v14 = vmax.f32 %v3855_v19, 0.0 }
 0x4cd   : > { %v8843_v63 = vadd.f32 %v5121_v39, %v5009_v41  ;;  %v4011_v1 = vpack.c.bf16 %v3981_v2, %v3980_v38 }
 0x4ce   : > { %v4010_v5 = vpack.c.bf16 %v3979_v14, %v3978_v35  ;;  %v5268_v11 = vpop.f32.mrb[164].mxu0 }
 0x4cf   : > { %v5122_v59 = vpop.f32.mrb[148].mxu1  ;;  %v3876_v52 = vadd.f32 %v5268_v11, %v8786_v9  ;;  %v3867_v60 = vpop.f32.mrb[165].mxu0 }
 0x4d0   : > { %v5123_v30 = vpop.f32.mrb[149].mxu1  ;;  %v3868_v31 = vadd.f32 %v3867_v60, %v8782_v45  ;;  %v5269_v4 = vpop.f32.mrb[166].mxu0  ;;  %5298 = vmatprep.mubr.msk.bf16.mxu1 %vm2030_vm4, %v4010_v5 }
 0x4d1   : > { %v5124_v49 = vadd.f32 %v5123_v30, %v5122_v59  ;;  %v5125_v6 = vpop.f32.mrb[150].mxu1  ;;  %v3879_v54 = vadd.f32 %v5269_v4, %v8788_v13  ;;  %v3870_v61 = vpop.f32.mrb[167].mxu0  ;;  %5299 = vmatmul.mubr.msk.bf16.vlgmr.msra.gmra.mrb[160].mxu1 %vm2030_vm4, %v4011_v1  ;;  %v3984_v9 = vmax.f32 %v3876_v52, 0.0 }
 0x4d2   : > { %v5126_v27 = vpop.f32.mrb[151].mxu1  ;;  %v3871_v10 = vadd.f32 %v3870_v61, %v8784_v12  ;;  %v3982_v45 = vmax.f32 %v3868_v31, 0.0 }
 0x4d3   : > { %v5127_v41 = vadd.f32 %v5126_v27, %v5125_v6  ;;  %v8851_v47 = vadd.f32 %v5124_v49, %v8812_v37  ;;  %v3985_v40 = vmax.f32 %v3879_v54, 0.0 }
 0x4d4   : > { %v3983_v24 = vmax.f32 %v3871_v10, 0.0 }
 0x4d5   : > { %v8855_v53 = vadd.f32 %v5127_v41, %v8816_v28  ;;  %v4013_v48 = vpack.c.bf16 %v3985_v40, %v3984_v9 }
 0x4d6   : > { %v4012_v7 = vpack.c.bf16 %v3983_v24, %v3982_v45  ;;  %v5272_v13 = vpop.f32.mrb[168].mxu0 }
 0x4d7   : > { %v5128_v58 = vpop.f32.mrb[152].mxu1  ;;  %v3892_v62 = vadd.f32 %v5272_v13, %v8794_v16  ;;  %v3883_v37 = vpop.f32.mrb[169].mxu0 }
 0x4d8   : > { %v5129_v42 = vpop.f32.mrb[153].mxu1  ;;  %v3884_v43 = vadd.f32 %v3883_v37, %v8790_v29  ;;  %v5273_v39 = vpop.f32.mrb[170].mxu0  ;;  %5302 = vmatprep.mubr.msk.bf16.mxu1 %vm2030_vm4, %v4012_v7 }
 0x4d9   : > { %v5130_v50 = vadd.f32 %v5129_v42, %v5128_v58  ;;  %v5131_v26 = vpop.f32.mrb[154].mxu1  ;;  %v3895_v25 = vadd.f32 %v5273_v39, %v8796_v21  ;;  %v3886_v15 = vpop.f32.mrb[171].mxu0  ;;  %5303 = vmatmul.mubr.msk.bf16.gmra.mrb[164].mxu1 %vm2030_vm4, %v4013_v48  ;;  %v3988_v16 = vmax.f32 %v3892_v62, 0.0 }
 0x4da   : > { %v5132_v12 = vpop.f32.mrb[155].mxu1  ;;  %v3887_v38 = vadd.f32 %v3886_v15, %v8792_v3  ;;  %v3986_v29 = vmax.f32 %v3884_v43, 0.0 }
 0x4db   : > { %v5133_v28 = vadd.f32 %v5132_v12, %v5131_v26  ;;  %v8863_v19 = vadd.f32 %v5130_v50, %v8820_v44  ;;  %v3989_v2 = vmax.f32 %v3895_v25, 0.0 }
 0x4dc   : > { %v3987_v14 = vmax.f32 %v3887_v38, 0.0 }
 0x4dd   : > { %v8867_v35 = vadd.f32 %v5133_v28, %v8824_v23  ;;  %v4015_v1 = vpack.c.bf16 %v3989_v2, %v3988_v16 }
 0x4de   : > { %v4014_v5 = vpack.c.bf16 %v3987_v14, %v3986_v29  ;;  %v5276_v21 = vpop.f32.mrb[172].mxu0 }
 0x4df   : > { %v5134_v59 = vpop.f32.mrb[156].mxu1  ;;  %v3908_v49 = vadd.f32 %v5276_v21, %v8802_v33  ;;  %v3899_v44 = vpop.f32.mrb[173].mxu0 }
 0x4e0   : > { %v5135_v30 = vpop.f32.mrb[157].mxu1  ;;  %v3900_v6 = vadd.f32 %v3899_v44, %v8798_v36  ;;  %v5277_v60 = vpop.f32.mrb[174].mxu0  ;;  %5306 = vmatprep.mubr.msk.bf16.mxu1 %vm2030_vm4, %v4014_v5 }
 0x4e1   : > { %v5136_v11 = vadd.f32 %v5135_v30, %v5134_v59  ;;  %v5137_v52 = vpop.f32.mrb[158].mxu1  ;;  %v3911_v31 = vadd.f32 %v5277_v60, %v8804_v22  ;;  %v3902_v27 = vpop.f32.mrb[175].mxu0  ;;  %5307 = vmatmul.mubr.msk.bf16.gmra.mrb[168].mxu1 %vm2030_vm4, %v4015_v1  ;;  %v3992_v54 = vmax.f32 %v3908_v49, 0.0 }
 0x4e2   : > { %v5138_v3 = vpop.f32.mrb[159].mxu1  ;;  %v3903_v41 = vadd.f32 %v3902_v27, %v8800_v57  ;;  %v3990_v10 = vmax.f32 %v3900_v6, 0.0 }
 0x4e3   : > { %v5139_v23 = vadd.f32 %v5138_v3, %v5137_v52  ;;  %v3811_v4 = vadd.f32 %v5136_v11, %v8828_v18  ;;  %v3993_v33 = vmax.f32 %v3911_v31, 0.0 }
 0x4e4   : > { %v3991_v36 = vmax.f32 %v3903_v41, 0.0 }
 0x4e5   : > { %v3814_v61 = vadd.f32 %v5139_v23, %v8832_v56  ;;  %v4017_v9 = vpack.c.bf16 %v3993_v33, %v3992_v54  ;;  %v9516_v33 = vld [vmem:[#allocation35_spill] sm:$0xff] }
 0x4e6   : > { %v4016_v40 = vpack.c.bf16 %v3991_v36, %v3990_v10  ;;  %v5280_v45 = vpop.f32.mrb[176].mxu0  ;;  %v9517_v36 = vld [vmem:[#allocation24_spill] sm:$0xff] }
 0x4e7   : > { %v3924_v24 = vadd.f32 %v5280_v45, %v8814_v8  ;;  %v3915_v48 = vpop.f32.mrb[177].mxu0  ;;  %v9518_v45 = vld [vmem:[#allocation6_spill] sm:$0xff] }
 0x4e8   : > { %v3916_v22 = vadd.f32 %v3915_v48, %v8808_v17  ;;  %v5281_v58 = vpop.f32.mrb[178].mxu0  ;;  %5310 = vmatprep.mubr.msk.bf16.mxu1 %vm2030_vm4, %v4016_v40 }
 0x4e9   : > { %v3927_v18 = vadd.f32 %v5281_v58, %v8818_v34  ;;  %v3918_v57 = vpop.f32.mrb[179].mxu0  ;;  %5311 = vmatmul.mubr.msk.bf16.gmra.mrb[172].mxu1 %vm2030_vm4, %v4017_v9  ;;  %v3996_v7 = vmax.f32 %v3924_v24, 0.0  ;;  %v9519_v58 = vld [vmem:[#allocation7_spill] sm:$0xff] }
 0x4ea   : > { %v3919_v56 = vadd.f32 %v3918_v57, %v8810_v0  ;;  %v3994_v13 = vmax.f32 %v3916_v22, 0.0 }
 0x4eb   : > { %v3997_v42 = vmax.f32 %v3927_v18, 0.0 }
 0x4ec   : > { %v3995_v50 = vmax.f32 %v3919_v56, 0.0 }
 0x4ed   : > { %v4019_v62 = vpack.c.bf16 %v3997_v42, %v3996_v7  ;;  %v9520_v42 = vld [vmem:[#allocation8_spill] sm:$0xff] }
 0x4ee   : > { %v4018_v26 = vpack.c.bf16 %v3995_v50, %v3994_v13  ;;  %v5284_v8 = vpop.f32.mrb[180].mxu0 }
 0x4ef   : > { %v3940_v37 = vadd.f32 %v5284_v8, %v8830_v20  ;;  %v3931_v17 = vpop.f32.mrb[181].mxu0 }
 0x4f0   : > { %v3932_v43 = vadd.f32 %v3931_v17, %v8822_v55  ;;  %v5285_v12 = vpop.f32.mrb[182].mxu0  ;;  %5314 = vmatprep.mubr.msk.bf16.mxu1 %vm2030_vm4, %v4018_v26  ;;  %v9522_v17 = vld [vmem:[#allocation10_spill] sm:$0xff] }
 0x4f1   : > { %v3943_v34 = vadd.f32 %v5285_v12, %v8834_v46  ;;  %v3934_v39 = vpop.f32.mrb[183].mxu0  ;;  %5315 = vmatmul.mubr.msk.bf16.gmra.mrb[176].mxu1 %vm2030_vm4, %v4019_v62  ;;  %v4000_v28 = vmax.f32 %v3940_v37, 0.0  ;;  %v9521_v62 = vld [vmem:[#allocation9_spill] sm:$0xff] }
 0x4f2   : > { %v3935_v0 = vadd.f32 %v3934_v39, %v8826_v32  ;;  %v3998_v15 = vmax.f32 %v3932_v43, 0.0  ;;  %v9523_v39 = vld [vmem:[#allocation11_spill] sm:$0xff] }
 0x4f3   : > { %v4001_v25 = vmax.f32 %v3943_v34, 0.0 }
 0x4f4   : > { %v3999_v38 = vmax.f32 %v3935_v0, 0.0 }
 0x4f5   : > { %v4021_v16 = vpack.c.bf16 %v4001_v25, %v4000_v28 }
 0x4f6   : > { %v4020_v2 = vpack.c.bf16 %v3999_v38, %v3998_v15  ;;  %v5288_v20 = vpop.f32.mrb[184].mxu0  ;;  %v9524_v38 = vld [vmem:[#allocation12_spill] sm:$0xff] }
 0x4f7   : > { %v3956_v29 = vadd.f32 %v5288_v20, %v8851_v47  ;;  %v3947_v55 = vpop.f32.mrb[185].mxu0  ;;  %v9525_v20 = vld [vmem:[#allocation13_spill] sm:$0xff] }
 0x4f8   : > { %v3948_v14 = vadd.f32 %v3947_v55, %v8840_v51  ;;  %v5289_v1 = vpop.f32.mrb[186].mxu0  ;;  %5318 = vmatprep.mubr.msk.bf16.mxu1 %vm2030_vm4, %v4020_v2 }
 0x4f9   : > { %v3959_v46 = vadd.f32 %v5289_v1, %v8855_v53  ;;  %v3950_v59 = vpop.f32.mrb[187].mxu0  ;;  %5319 = vmatmul.mubr.msk.bf16.gmra.mrb[180].mxu1 %vm2030_vm4, %v4021_v16  ;;  %v4004_v5 = vmax.f32 %v3956_v29, 0.0  ;;  %v9526_v1 = vld [vmem:[#allocation14_spill] sm:$0xff] }
 0x4fa   : > { %v3951_v32 = vadd.f32 %v3950_v59, %v8843_v63  ;;  %v4002_v21 = vmax.f32 %v3948_v14, 0.0 }
 0x4fb   : > { %v4005_v30 = vmax.f32 %v3959_v46, 0.0 }
 0x4fc   : > { %v4003_v11 = vmax.f32 %v3951_v32, 0.0 }
 0x4fd   : > { %v4023_v49 = vpack.c.bf16 %v4005_v30, %v4004_v5  ;;  %v9527_v5 = vld [vmem:[#allocation15_spill] sm:$0xff] }
 0x4fe   : > { %v4022_v52 = vpack.c.bf16 %v4003_v11, %v4002_v21  ;;  %v5292_v47 = vpop.f32.mrb[188].mxu0 }
 0x4ff   : > { %v3972_v44 = vadd.f32 %v5292_v47, %v3811_v4  ;;  %v3963_v6 = vpop.f32.mrb[189].mxu0 }
 0x500   : > { %v3964_v51 = vadd.f32 %v3963_v6, %v8863_v19  ;;  %v5293_v3 = vpop.f32.mrb[190].mxu0  ;;  %5322 = vmatprep.mubr.msk.bf16.mxu1 %vm2030_vm4, %v4022_v52  ;;  %v9528_v52 = vld [vmem:[#allocation17_spill] sm:$0xff]  ;;  %v9529_v6 = vld [vmem:[#allocation18_spill] sm:$0xff] }
 0x501   : > { %v3975_v53 = vadd.f32 %v5293_v3, %v3814_v61  ;;  %v3966_v60 = vpop.f32.mrb[191].mxu0  ;;  %5323 = vmatmul.mubr.msk.bf16.gmra.mrb[184].mxu1 %vm2030_vm4, %v4023_v49  ;;  %v4008_v23 = vmax.f32 %v3972_v44, 0.0 }
 0x502   : > { %v3967_v63 = vadd.f32 %v3966_v60, %v8867_v35  ;;  %v4006_v27 = vmax.f32 %v3964_v51, 0.0  ;;  %v9530_v60 = vld [vmem:[#allocation21_spill] sm:$0xff] }
 0x503   : > { %v4009_v31 = vmax.f32 %v3975_v53, 0.0 }
 0x504   : > { %v4007_v41 = vmax.f32 %v3967_v63, 0.0 }
 0x505   : > { %v4025_v54 = vpack.c.bf16 %v4009_v31, %v4008_v23 }
 0x506   : > { %v4024_v4 = vpack.c.bf16 %v4007_v41, %v4006_v27  ;;  %v9531_v27 = vld [vmem:[#allocation22_spill] sm:$0xff] }
 0x508   : > { %5326 = vmatprep.mubr.msk.bf16.mxu1 %vm2030_vm4, %v4024_v4 }
 0x509   : > { %5327 = vmatmul.mubr.msk.bf16.gmra.mrb[188].mxu1 %vm2030_vm4, %v4025_v54 }
 0x5a4   : > { %v5300_v19 = vpop.f32.mrb[160].mxu1 }
 0x5a5   : > { %v4254_v61 = vadd.f32 %v5300_v19, %v9516_v33  ;;  %v4125_v10 = vpop.f32.mrb[161].mxu1  ;;  %v9532_v33 = vld [vmem:[#allocation30_spill] sm:$0xff] }
 0x5a6   : > { %v4252_v9 = vadd.f32 %v4125_v10, %v9517_v36  ;;  %v5301_v35 = vpop.f32.mrb[162].mxu1  ;;  %v9533_v36 = vld [vmem:[#allocation40_spill] sm:$0xff] }
 0x5a7   : > { %v4286_v40 = vmax.f32 %v4254_v61, 0.0  ;;  %v4255_v24 = vadd.f32 %v5301_v35, %v9518_v45  ;;  %v4128_v48 = vpop.f32.mrb[163].mxu1  ;;  %v9534_v45 = vld [vmem:[#allocation33_spill] sm:$0xff] }
 0x5a8   : > { %v4284_v22 = vmax.f32 %v4252_v9, 0.0  ;;  %v4253_v18 = vadd.f32 %v4128_v48, %v9519_v58  ;;  %v9535_v58 = vld [vmem:[#allocation34_spill] sm:$0xff] }
 0x5a9   : > { %4318 = vst.msk [vmem:[%s8908_s10 + $0x10] sm:$0xff] %vm170_vm0, %v4286_v40  ;;  %v4287_v57 = vmax.f32 %v4255_v24, 0.0 }
 0x5aa   : > { %4316 = vst.msk [vmem:[%s8908_s10] sm:$0xff] %vm170_vm0, %v4284_v22  ;;  %v4285_v56 = vmax.f32 %v4253_v18, 0.0 }
 0x5ab   : > { %4319 = vst.msk [vmem:[%s8908_s10 + $0x18] sm:$0xff] %vm170_vm0, %v4287_v57 }
 0x5ac   : > { %4317 = vst.msk [vmem:[%s8908_s10 + $0x8] sm:$0xff] %vm170_vm0, %v4285_v56  ;;  %v5304_v7 = vpop.f32.mrb[164].mxu1 }
 0x5ad   : > { %v4258_v13 = vadd.f32 %v5304_v7, %v9520_v42  ;;  %v4141_v50 = vpop.f32.mrb[165].mxu1  ;;  %v9536_v42 = vld [vmem:[#allocation44_spill] sm:$0xff] }
 0x5ae   : > { %v4256_v26 = vadd.f32 %v4141_v50, %v9521_v62  ;;  %v5305_v8 = vpop.f32.mrb[166].mxu1  ;;  %v9537_v62 = vld [vmem:[#allocation43_spill] sm:$0xff] }
 0x5af   : > { %v4290_v37 = vmax.f32 %v4258_v13, 0.0  ;;  %v4259_v43 = vadd.f32 %v5305_v8, %v9522_v17  ;;  %v4144_v12 = vpop.f32.mrb[167].mxu1  ;;  %v9538_v17 = vld [vmem:[#allocation46_spill] sm:$0xff] }
 0x5b0   : > { %v4288_v34 = vmax.f32 %v4256_v26, 0.0  ;;  %v4257_v0 = vadd.f32 %v4144_v12, %v9523_v39  ;;  %v9539_v39 = vld [vmem:[#allocation48_spill] sm:$0xff] }
 0x5b1   : > { %4322 = vst.msk [vmem:[%s8908_s10 + $0x30] sm:$0xff] %vm170_vm0, %v4290_v37  ;;  %v4291_v28 = vmax.f32 %v4259_v43, 0.0 }
 0x5b2   : > { %4320 = vst.msk [vmem:[%s8908_s10 + $0x20] sm:$0xff] %vm170_vm0, %v4288_v34  ;;  %v4289_v25 = vmax.f32 %v4257_v0, 0.0 }
 0x5b3   : > { %4323 = vst.msk [vmem:[%s8908_s10 + $0x38] sm:$0xff] %vm170_vm0, %v4291_v28 }
 0x5b4   : > { %4321 = vst.msk [vmem:[%s8908_s10 + $0x28] sm:$0xff] %vm170_vm0, %v4289_v25  ;;  %v5308_v15 = vpop.f32.mrb[168].mxu1 }
 0x5b5   : > { %v4262_v16 = vadd.f32 %v5308_v15, %v9524_v38  ;;  %v4157_v2 = vpop.f32.mrb[169].mxu1  ;;  %v9540_v38 = vld [vmem:[#allocation51_spill] sm:$0xff] }
 0x5b6   : > { %v4260_v29 = vadd.f32 %v4157_v2, %v9525_v20  ;;  %v5309_v55 = vpop.f32.mrb[170].mxu1  ;;  %v9541_v20 = vld [vmem:[#allocation53_spill] sm:$0xff] }
 0x5b7   : > { %v4294_v14 = vmax.f32 %v4262_v16, 0.0  ;;  %v4263_v46 = vadd.f32 %v5309_v55, %v9526_v1  ;;  %v4160_v59 = vpop.f32.mrb[171].mxu1  ;;  %v9542_v1 = vld [vmem:[#allocation54_spill] sm:$0xff] }
 0x5b8   : > { %v4292_v32 = vmax.f32 %v4260_v29, 0.0  ;;  %v4261_v30 = vadd.f32 %v4160_v59, %v9527_v5  ;;  %v9543_v5 = vld [vmem:[#allocation55_spill] sm:$0xff] }
 0x5b9   : > { %4326 = vst.msk [vmem:[%s8908_s10 + $0x50] sm:$0xff] %vm170_vm0, %v4294_v14  ;;  %v4295_v21 = vmax.f32 %v4263_v46, 0.0 }
 0x5ba   : > { %4324 = vst.msk [vmem:[%s8908_s10 + $0x40] sm:$0xff] %vm170_vm0, %v4292_v32  ;;  %v4293_v11 = vmax.f32 %v4261_v30, 0.0 }
 0x5bb   : > { %4327 = vst.msk [vmem:[%s8908_s10 + $0x58] sm:$0xff] %vm170_vm0, %v4295_v21 }
 0x5bc   : > { %4325 = vst.msk [vmem:[%s8908_s10 + $0x48] sm:$0xff] %vm170_vm0, %v4293_v11  ;;  %v5312_v49 = vpop.f32.mrb[172].mxu1 }
 0x5bd   : > { %v4266_v47 = vadd.f32 %v5312_v49, %v9528_v52  ;;  %v4173_v44 = vpop.f32.mrb[173].mxu1  ;;  %v9544_v52 = vld [vmem:[#allocation58_spill] sm:$0xff] }
 0x5be   : > { %v4264_v51 = vadd.f32 %v4173_v44, %v9529_v6  ;;  %v5313_v3 = vpop.f32.mrb[174].mxu1  ;;  %v9545_v6 = vld [vmem:[#allocation59_spill] sm:$0xff] }
 0x5bf   : > { %v4298_v53 = vmax.f32 %v4266_v47, 0.0  ;;  %v4267_v63 = vadd.f32 %v5313_v3, %v9530_v60  ;;  %v4176_v23 = vpop.f32.mrb[175].mxu1  ;;  %v9546_v60 = vld [vmem:[#allocation60_spill] sm:$0xff] }
 0x5c0   : > { %v4296_v31 = vmax.f32 %v4264_v51, 0.0  ;;  %v4265_v41 = vadd.f32 %v4176_v23, %v9531_v27  ;;  %v9547_v27 = vld [vmem:[#allocation61_spill] sm:$0xff] }
 0x5c1   : > { %4330 = vst.msk [vmem:[%s8908_s10 + $0x70] sm:$0xff] %vm170_vm0, %v4298_v53  ;;  %v4299_v54 = vmax.f32 %v4267_v63, 0.0 }
 0x5c2   : > { %4328 = vst.msk [vmem:[%s8908_s10 + $0x60] sm:$0xff] %vm170_vm0, %v4296_v31  ;;  %v4297_v4 = vmax.f32 %v4265_v41, 0.0 }
 0x5c3   : > { %4331 = vst.msk [vmem:[%s8908_s10 + $0x78] sm:$0xff] %vm170_vm0, %v4299_v54 }
 0x5c4   : > { %4329 = vst.msk [vmem:[%s8908_s10 + $0x68] sm:$0xff] %vm170_vm0, %v4297_v4  ;;  %v5316_v19 = vpop.f32.mrb[176].mxu1 }
 0x5c5   : > { %v4270_v61 = vadd.f32 %v5316_v19, %v9532_v33  ;;  %v4189_v10 = vpop.f32.mrb[177].mxu1 }
 0x5c6   : > { %v4268_v9 = vadd.f32 %v4189_v10, %v9533_v36  ;;  %v5317_v35 = vpop.f32.mrb[178].mxu1 }
 0x5c7   : > { %v4302_v40 = vmax.f32 %v4270_v61, 0.0  ;;  %v4271_v24 = vadd.f32 %v5317_v35, %v9534_v45  ;;  %v4192_v48 = vpop.f32.mrb[179].mxu1 }
 0x5c8   : > { %v4300_v22 = vmax.f32 %v4268_v9, 0.0  ;;  %v4269_v18 = vadd.f32 %v4192_v48, %v9535_v58 }
 0x5c9   : > { %4334 = vst.msk [vmem:[%s8908_s10 + $0x90] sm:$0xff] %vm170_vm0, %v4302_v40  ;;  %v4303_v57 = vmax.f32 %v4271_v24, 0.0 }
 0x5ca   : > { %4332 = vst.msk [vmem:[%s8908_s10 + $0x80] sm:$0xff] %vm170_vm0, %v4300_v22  ;;  %v4301_v56 = vmax.f32 %v4269_v18, 0.0 }
 0x5cb   : > { %4335 = vst.msk [vmem:[%s8908_s10 + $0x98] sm:$0xff] %vm170_vm0, %v4303_v57 }
 0x5cc   : > { %4333 = vst.msk [vmem:[%s8908_s10 + $0x88] sm:$0xff] %vm170_vm0, %v4301_v56  ;;  %v5320_v7 = vpop.f32.mrb[180].mxu1 }
 0x5cd   : > { %v4274_v13 = vadd.f32 %v5320_v7, %v9536_v42  ;;  %v4205_v50 = vpop.f32.mrb[181].mxu1 }
 0x5ce   : > { %v4272_v26 = vadd.f32 %v4205_v50, %v9537_v62  ;;  %v5321_v8 = vpop.f32.mrb[182].mxu1 }
 0x5cf   : > { %v4306_v37 = vmax.f32 %v4274_v13, 0.0  ;;  %v4275_v43 = vadd.f32 %v5321_v8, %v9538_v17  ;;  %v4208_v12 = vpop.f32.mrb[183].mxu1 }
 0x5d0   : > { %v4304_v34 = vmax.f32 %v4272_v26, 0.0  ;;  %v4273_v0 = vadd.f32 %v4208_v12, %v9539_v39 }
 0x5d1   : > { %4338 = vst.msk [vmem:[%s8908_s10 + $0xb0] sm:$0xff] %vm170_vm0, %v4306_v37  ;;  %v4307_v28 = vmax.f32 %v4275_v43, 0.0 }
 0x5d2   : > { %4336 = vst.msk [vmem:[%s8908_s10 + $0xa0] sm:$0xff] %vm170_vm0, %v4304_v34  ;;  %v4305_v25 = vmax.f32 %v4273_v0, 0.0 }
 0x5d3   : > { %4339 = vst.msk [vmem:[%s8908_s10 + $0xb8] sm:$0xff] %vm170_vm0, %v4307_v28 }
 0x5d4   : > { %4337 = vst.msk [vmem:[%s8908_s10 + $0xa8] sm:$0xff] %vm170_vm0, %v4305_v25  ;;  %v5324_v15 = vpop.f32.mrb[184].mxu1 }
 0x5d5   : > { %v4278_v16 = vadd.f32 %v5324_v15, %v9540_v38  ;;  %v4221_v2 = vpop.f32.mrb[185].mxu1 }
 0x5d6   : > { %v4276_v29 = vadd.f32 %v4221_v2, %v9541_v20  ;;  %v5325_v55 = vpop.f32.mrb[186].mxu1 }
 0x5d7   : > { %v4310_v14 = vmax.f32 %v4278_v16, 0.0  ;;  %v4279_v46 = vadd.f32 %v5325_v55, %v9542_v1  ;;  %v4224_v59 = vpop.f32.mrb[187].mxu1 }
 0x5d8   : > { %v4308_v32 = vmax.f32 %v4276_v29, 0.0  ;;  %v4277_v30 = vadd.f32 %v4224_v59, %v9543_v5 }
 0x5d9   : > { %4342 = vst.msk [vmem:[%s8908_s10 + $0xd0] sm:$0xff] %vm170_vm0, %v4310_v14  ;;  %v4311_v21 = vmax.f32 %v4279_v46, 0.0 }
 0x5da   : > { %4340 = vst.msk [vmem:[%s8908_s10 + $0xc0] sm:$0xff] %vm170_vm0, %v4308_v32  ;;  %v4309_v11 = vmax.f32 %v4277_v30, 0.0 }
 0x5db   : > { %4343 = vst.msk [vmem:[%s8908_s10 + $0xd8] sm:$0xff] %vm170_vm0, %v4311_v21 }
 0x5dc   : > { %4341 = vst.msk [vmem:[%s8908_s10 + $0xc8] sm:$0xff] %vm170_vm0, %v4309_v11  ;;  %v5328_v49 = vpop.f32.mrb[188].mxu1 }
 0x5dd   : > { %v4282_v47 = vadd.f32 %v5328_v49, %v9544_v52  ;;  %v4237_v44 = vpop.f32.mrb[189].mxu1 }
 0x5de   : > { %v4280_v51 = vadd.f32 %v4237_v44, %v9545_v6  ;;  %v5329_v3 = vpop.f32.mrb[190].mxu1 }
 0x5df   : > { %v4314_v53 = vmax.f32 %v4282_v47, 0.0  ;;  %v4283_v63 = vadd.f32 %v5329_v3, %v9546_v60  ;;  %v4240_v23 = vpop.f32.mrb[191].mxu1 }
 0x5e0   : > { %v4312_v31 = vmax.f32 %v4280_v51, 0.0  ;;  %v4281_v41 = vadd.f32 %v4240_v23, %v9547_v27 }
 0x5e1   : > { %4346 = vst.msk [vmem:[%s8908_s10 + $0xf0] sm:$0xff] %vm170_vm0, %v4314_v53  ;;  %v4315_v54 = vmax.f32 %v4283_v63, 0.0 }
 0x5e2   : > { %4344 = vst.msk [vmem:[%s8908_s10 + $0xe0] sm:$0xff] %vm170_vm0, %v4312_v31  ;;  %v4313_v4 = vmax.f32 %v4281_v41, 0.0 }
 0x5e3   : > { %4347 = vst.msk [vmem:[%s8908_s10 + $0xf8] sm:$0xff] %vm170_vm0, %v4315_v54 }
 0x5e4   : > { %4345 = vst.msk [vmem:[%s8908_s10 + $0xe8] sm:$0xff] %vm170_vm0, %v4313_v4 }
 0x5e5   : > { %6032 = shalt.err (!%p6029_p3)
}
 0x5e6   : > { %s6033_s28 = scalar_lea.hbm %s9001_s25, 4096  ;;  %s6037_s4 = scalar_lea.hbm %s9057_s3, 8192 }
 0x5e7   : > { %p6034_p4 = scmp.ne.s32.totalorder %s9001_s25, %s6033_s28  ;;  %p6038_p9 = scmp.lt.u32.totalorder %s9001_s25, %s9057_s3 }
 0x5e8   : > { %p6039_p10 = scmp.lt.u32.totalorder %s6037_s4, %s6033_s28  ;;  %p6041_p12 = scmp.lt.u32.totalorder %s6033_s28, %s9001_s25 }
 0x5e9   : > { %p6035_p7 = pnand %p6034_p4, %p6146_p5 }
 0x5ea   : > { %p6040_p11 = por %p6039_p10, %p6038_p9 }
 0x5eb   : > { %p6036_p8 = pneg %p6035_p7 }
 0x5ec   : > { %p6042_p13 = por %p6041_p12, %p6040_p11 }
 0x5ee   : > { %p6043_p0 = pnand %p6042_p13, %p6036_p8 }
 0x5f0   : > { %6046 = shalt.err (!%p6043_p0)
}
 0x5f1   : > { %s6086_s7 = smov 128   ;;  %s6087_s8 = smov 8  }
 0x5f2   : > { %5330 = dma.vmem_to_hbm [thread:$0]  (%p6146_p5), %s9003_s19, 4096, %s9001_s25, %s9013_s16, %s6086_s7, %s6086_s7, %s6087_s8  }
 0x5f3 PF: > { %p5336_p1 = scmp.ge.s32.totalorder %s6081_s15, 2  ;;  %s4377_s10 = sand.u32 1, %s6069_s12  }
 0x5f4   : > { %s4378_s11 = scalar_lea.sflag [#allocation4], %s4377_s10 }
 0x5f5   : > { %p5333_p2 = pnand %p5336_p1, %p6150_p6 }
 0x5f7   : > { %6064 = dma.done.wait (!%p5333_p2), %s4378_s11, 4096  }
 0x5f8   : > { %6066 = vsyncadd (!%p5333_p2), %s4378_s11, 4294963200  ;;  %p13_p3 = scmp.ge.s32.totalorder %s6133_s18, 4   ;;  %s9548_s12 = smov %s6073_s13 }
 0x5f9   : > { %s9549_s13 = smov %s6077_s14  ;;  %s9550_s14 = smov %s6144_s21 }
 0x5fa   : > { %s9551_s15 = smov %s6133_s18  ;;  %15 = sbr.rel (!%p13_p3) target bundleno = 3 (0x3), region = 70 }
 0x601   :  { %4383 = vsyncpa [#allocation4], 1 }
 0x602   :  { %4385 = vsyncpa [#allocation4 + $0x1], 1 }

</bundles_post_ra>
